<compile_context>
chip_gen: v7x
topology: tpu7x:2x2x1
jax: 0.10.0
libtpu: 0.0.40
codegen_flags: <defaults>
</compile_context>

<pallas_src>
import functools

import jax
import jax.numpy as jnp
from jax import lax
from jax.experimental import pallas as pl
from jax.experimental.pallas import tpu as pltpu

HIDDEN = 64
FC_HID = 32


def _discriminator_kernel(
    xproj_ref,  # [T, bb, 4H] f32, time-major, = x*Wih0^T + (b_ih0+b_hh0), gates [i,f,o,g]
    wcomb_ref,  # [H, 8H]     mxu_dtype = [Wih1^T | Whh0^T], gates [i,f,o,g]
    wrec1_ref,  # [H, 4H]     mxu_dtype = Whh1^T,            gates [i,f,o,g]
    b1_ref,     # [1, 4H]     f32 (b_ih1 + b_hh1),           gates [i,f,o,g]
    wf1_ref,    # [H, 32]     f32
    bf1_ref,    # [1, 32]     f32
    wf2_ref,    # [32, 1]     f32
    bf2_ref,    # [1, 1]      f32
    out_ref,    # [bb, 1]     f32
    *,
    mxu_dtype,
):
    H = HIDDEN
    G = 4 * H
    T = xproj_ref.shape[0]
    bb = xproj_ref.shape[1]

    def cell(gates, c_prev):
        # Repacked gate order [i, f, o | g]: sigmoid over 3H lanes, tanh over H.
        sg = jax.nn.sigmoid(gates[:, :3 * H])
        g = jnp.tanh(gates[:, 3 * H:])
        i = sg[:, :H]
        f = sg[:, H:2 * H]
        o = sg[:, 2 * H:]
        c_new = f * c_prev + i * g
        h_new = o * jnp.tanh(c_new)
        return h_new, c_new

    # Hoist weight loads / bias broadcast out of the recurrence.
    wcomb = wcomb_ref[...]
    wrec1 = wrec1_ref[...]
    b1 = jnp.broadcast_to(b1_ref[...], (bb, G))

    zero_h = jnp.zeros((bb, H), jnp.float32)
    zero_g = jnp.zeros((bb, G), jnp.float32)

    def step(t, carry, *, last):
        h0, c0, h1, c1, rec0, rec1 = carry
        # Layer 0: gates = hoisted x-projection (+b0) + h0(t-1)@Whh0^T (rec0).
        gates0 = xproj_ref[t] + rec0
        h0, c0 = cell(gates0, c0)
        # ONE post-h0 matmul: columns [:G]  -> layer-1 input gates (step t),
        #                     columns [G:] -> layer-0 recurrence  (step t+1).
        comb = jnp.dot(h0.astype(mxu_dtype), wcomb,
                       preferred_element_type=jnp.float32)            # [bb, 8H]
        gates1 = comb[:, :G] + b1 + rec1
        h1, c1 = cell(gates1, c1)
        rec0 = comb[:, G:]
        if last:
            rec1_new = rec1            # dead past the last step; skip the matmul
        else:
            rec1_new = jnp.dot(h1.astype(mxu_dtype), wrec1,
                               preferred_element_type=jnp.float32)    # [bb, 4H]
        return h0, c0, h1, c1, rec0, rec1_new

    carry = (zero_h, zero_h, zero_h, zero_h, zero_g, zero_g)
    if T <= 32:
        # Fully unrolled: T is static & small; state stays in vregs and the
        # scheduler can overlap step t's EUP chain with neighbouring MXU pushes.
        for t in range(T):
            carry = step(t, carry, last=(t == T - 1))
    else:
        # Partial unroll caps live ranges / register pressure for long sequences.
        carry = lax.fori_loop(0, T, lambda t, c: step(t, c, last=False),
                              carry, unroll=4)
    h1 = carry[2]

    # Classifier head on the last timestep's top-layer hidden state.
    z = jnp.dot(h1, wf1_ref[...], preferred_element_type=jnp.float32) + bf1_ref[...]
    z = jnp.where(z >= 0.0, z, 0.2 * z)       # LeakyReLU(0.2)
    # Dropout(0.3): identity at inference time.
    y = jnp.dot(z, wf2_ref[...], preferred_element_type=jnp.float32) + bf2_ref[...]
    out_ref[...] = jax.nn.sigmoid(y)


def _reorder_gates(w):
    """PyTorch gate order [i, f, g, o] -> packed order [i, f, o, g] (last axis 4H)."""
    H = HIDDEN
    return jnp.concatenate([w[..., :2 * H], w[..., 3 * H:], w[..., 2 * H:3 * H]],
                           axis=-1)


def discriminator_forward(x, params, *, mxu_dtype=jnp.bfloat16, batch_block=None):
    """x: [B, T, 1] float32 (batch_first, like PyTorch). Returns [B, 1] f32.

    mxu_dtype: default bf16 MXU operands with f32 accumulation (fast on v5e/v6e/
    v7x); pass jnp.float32 for the exact-math validation path.
    batch_block: optional batch tile (multiple of 8). Only useful when it yields
    >=2 blocks (e.g. B>=16 with batch_block=B//2 to shard across v7x's two TCs).
    For larger batches prefer growing bb (rows per invocation) over more grid
    steps: xproj = T*bb*4H*4B stays well under VMEM up to bb of several hundred.
    """
    B, T, F = x.shape
    assert F == 1
    H, G = HIDDEN, 4 * HIDDEN

    if batch_block is None or batch_block >= B or B % batch_block != 0:
        bb, nb = B, 1
    else:
        bb, nb = batch_block, B // batch_block
        assert bb % 8 == 0, "batch_block must be a multiple of 8"

    # Repack gate columns: [i, f, g, o] -> [i, f, o, g].
    wih0 = _reorder_gates(params["wih0_t"])
    b0 = _reorder_gates(params["b0"])
    whh0 = _reorder_gates(params["whh0_t"])
    wih1 = _reorder_gates(params["wih1_t"])
    whh1 = _reorder_gates(params["whh1_t"])
    b1 = _reorder_gates(params["b1"])

    # Hoisted, recurrence-independent layer-0 input projection (bias folded in),
    # time-major and lane-dense: [T, B, 4H].
    x_tm = jnp.transpose(x, (1, 0, 2))                    # [T, B, 1]
    xproj = (x_tm * wih0 + b0).astype(jnp.float32)        # [T, B, 4H]

    # Fused post-h0 RHS: one K=64 matmul yields layer-1 input gates (step t) and
    # layer-0 recurrent gates (step t+1).
    wcomb = jnp.concatenate([wih1, whh0], axis=-1).astype(mxu_dtype)   # [H, 8H]
    wrec1 = whh1.astype(mxu_dtype)                                      # [H, 4H]

    args = (
        xproj, wcomb, wrec1, b1,
        params["wf1_t"], params["bf1"], params["wf2_t"], params["bf2"],
    )

    def full_spec(a):
        return pl.BlockSpec(a.shape, lambda i, _nd=a.ndim: (0,) * _nd)

    in_specs = [pl.BlockSpec((T, bb, G), lambda i: (0, i, 0))]
    in_specs += [full_spec(a) for a in args[1:]]

    kernel = functools.partial(_discriminator_kernel, mxu_dtype=mxu_dtype)

    return pl.pallas_call(
        kernel,
        out_shape=jax.ShapeDtypeStruct((B, 1), jnp.float32),
        grid_spec=pltpu.PrefetchScalarGridSpec(
            num_scalar_prefetch=0,
            grid=(nb,),
            in_specs=in_specs,
            out_specs=pl.BlockSpec((bb, 1), lambda i: (i, 0)),
        ),
        compiler_params=pltpu.CompilerParams(
            dimension_semantics=("parallel",)),
    )(*args)


def init_params(key):
    """Deterministic synthetic weights with the same shapes as the PyTorch module,
    pre-transposed for right-multiplication (PyTorch gate order [i,f,g,o])."""
    H, G = HIDDEN, 4 * HIDDEN
    ks = jax.random.split(key, 12)
    s = 0.1

    w_ih0 = s * jax.random.normal(ks[0], (G, 1), jnp.float32)
    w_hh0 = s * jax.random.normal(ks[1], (G, H), jnp.float32)
    b_ih0 = s * jax.random.normal(ks[2], (G,), jnp.float32)
    b_hh0 = s * jax.random.normal(ks[3], (G,), jnp.float32)

    w_ih1 = s * jax.random.normal(ks[4], (G, H), jnp.float32)
    w_hh1 = s * jax.random.normal(ks[5], (G, H), jnp.float32)
    b_ih1 = s * jax.random.normal(ks[6], (G,), jnp.float32)
    b_hh1 = s * jax.random.normal(ks[7], (G,), jnp.float32)

    w_fc1 = s * jax.random.normal(ks[8], (FC_HID, H), jnp.float32)
    b_fc1 = s * jax.random.normal(ks[9], (FC_HID,), jnp.float32)
    w_fc2 = s * jax.random.normal(ks[10], (1, FC_HID), jnp.float32)
    b_fc2 = s * jax.random.normal(ks[11], (1,), jnp.float32)

    return {
        "wih0_t": w_ih0.T,                       # [1, 4H]
        "whh0_t": w_hh0.T,                       # [H, 4H]
        "b0": (b_ih0 + b_hh0)[None, :],          # [1, 4H]
        "wih1_t": w_ih1.T,                       # [H, 4H]
        "whh1_t": w_hh1.T,                       # [H, 4H]
        "b1": (b_ih1 + b_hh1)[None, :],          # [1, 4H]
        "wf1_t": w_fc1.T,                        # [H, 32]
        "bf1": b_fc1[None, :],                   # [1, 32]
        "wf2_t": w_fc2.T,                        # [32, 1]
        "bf2": b_fc2[None, :],                   # [1, 1]
    }


def reference_forward(x, p):
    """Pure-JAX reference matching PyTorch LSTM semantics (eval-mode dropout)."""
    B, T, _ = x.shape
    H = HIDDEN
    h0 = jnp.zeros((B, H)); c0 = jnp.zeros((B, H))
    h1 = jnp.zeros((B, H)); c1 = jnp.zeros((B, H))

    def cell(gates, c_prev):
        i = jax.nn.sigmoid(gates[:, 0 * H:1 * H])
        f = jax.nn.sigmoid(gates[:, 1 * H:2 * H])
        g = jnp.tanh(gates[:, 2 * H:3 * H])
        o = jax.nn.sigmoid(gates[:, 3 * H:4 * H])
        c_new = f * c_prev + i * g
        return o * jnp.tanh(c_new), c_new

    for t in range(T):
        x_t = x[:, t, :]                                  # [B, 1]
        g0 = x_t @ p["wih0_t"] + h0 @ p["whh0_t"] + p["b0"]
        h0, c0 = cell(g0, c0)
        g1 = h0 @ p["wih1_t"] + h1 @ p["whh1_t"] + p["b1"]
        h1, c1 = cell(g1, c1)

    z = h1 @ p["wf1_t"] + p["bf1"]
    z = jnp.where(z >= 0, z, 0.2 * z)
    return jax.nn.sigmoid(z @ p["wf2_t"] + p["bf2"])


if __name__ == "__main__":
    key = jax.random.PRNGKey(0)
    k_x, k_p = jax.random.split(key)

    B, T, F = 8, 16, 1   # batch=8, seq=16, n_features=1
    x = jax.random.normal(k_x, (B, T, F), jnp.float32)
    params = init_params(k_p)

    ref = reference_forward(x, params)

    # Exact-math validation path (f32 MXU operands).
    out_f32 = jax.block_until_ready(
        discriminator_forward(x, params, mxu_dtype=jnp.float32))
    assert out_f32.shape == (B, 1)
    assert jnp.allclose(out_f32, ref, atol=1e-4, rtol=1e-4), (out_f32, ref)

    # Default fast path (bf16 MXU operands, f32 accumulation) on all generations.
    out_bf16 = jax.block_until_ready(discriminator_forward(x, params))
    assert out_bf16.shape == (B, 1)
    assert jnp.allclose(out_bf16, ref, atol=2e-2, rtol=0.0), (out_bf16, ref)

    print("KERNEL_OK")
</pallas_src>

<mosaic_0001>
module attributes {stable_mosaic.version = 11 : i64} {
  func.func @_discriminator_kernel(%arg0: i32, %arg1: memref<16x8x256xf32, #tpu.memory_space<vmem>>, %arg2: memref<64x512xf32, #tpu.memory_space<vmem>>, %arg3: memref<64x256xf32, #tpu.memory_space<vmem>>, %arg4: memref<1x256xf32, #tpu.memory_space<vmem>>, %arg5: memref<64x32xf32, #tpu.memory_space<vmem>>, %arg6: memref<1x32xf32, #tpu.memory_space<vmem>>, %arg7: memref<32x1xf32, #tpu.memory_space<vmem>>, %arg8: memref<1x1xf32, #tpu.memory_space<vmem>>, %arg9: memref<8x1xf32, #tpu.memory_space<vmem>>) attributes {dimension_semantics = [#tpu.dimension_semantics<parallel>], iteration_bounds = array<i64: 1>, scalar_prefetch = 0 : i64, scratch_operands = 0 : i64, tpu.core_type = #tpu.core_type<tc>, window_params = [{transform_indices = @transform_0, window_bounds = array<i64: 16, 8, 256>}, {pipeline_mode = #tpu.pipeline_mode<synchronous>, transform_indices = @transform_1, window_bounds = array<i64: 64, 512>}, {pipeline_mode = #tpu.pipeline_mode<synchronous>, transform_indices = @transform_2, window_bounds = array<i64: 64, 256>}, {pipeline_mode = #tpu.pipeline_mode<synchronous>, transform_indices = @transform_3, window_bounds = array<i64: 1, 256>}, {pipeline_mode = #tpu.pipeline_mode<synchronous>, transform_indices = @transform_4, window_bounds = array<i64: 64, 32>}, {pipeline_mode = #tpu.pipeline_mode<synchronous>, transform_indices = @transform_5, window_bounds = array<i64: 1, 32>}, {pipeline_mode = #tpu.pipeline_mode<synchronous>, transform_indices = @transform_6, window_bounds = array<i64: 32, 1>}, {pipeline_mode = #tpu.pipeline_mode<synchronous>, transform_indices = @transform_7, window_bounds = array<i64: 1, 1>}, {transform_indices = @transform_8, window_bounds = array<i64: 8, 1>}]} {
    %c0 = arith.constant 0 : index
    %c0_0 = arith.constant 0 : index
    %0 = vector.load %arg2[%c0, %c0_0] : memref<64x512xf32, #tpu.memory_space<vmem>>, vector<64x512xf32>
    %c0_1 = arith.constant 0 : index
    %c0_2 = arith.constant 0 : index
    %1 = vector.load %arg3[%c0_1, %c0_2] : memref<64x256xf32, #tpu.memory_space<vmem>>, vector<64x256xf32>
    %c0_3 = arith.constant 0 : index
    %c0_4 = arith.constant 0 : index
    %2 = vector.load %arg4[%c0_3, %c0_4] : memref<1x256xf32, #tpu.memory_space<vmem>>, vector<1x256xf32>
    %3 = vector.shape_cast %2 : vector<1x256xf32> to vector<1x256xf32>
    %4 = vector.broadcast %3 : vector<1x256xf32> to vector<8x256xf32>
    %cst = arith.constant 0.000000e+00 : f32
    %5 = vector.broadcast %cst : f32 to vector<8x64xf32>
    %cst_5 = arith.constant 0.000000e+00 : f32
    %6 = vector.broadcast %cst_5 : f32 to vector<8x256xf32>
    %c0_6 = arith.constant 0 : index
    %c0_7 = arith.constant 0 : index
    %c0_8 = arith.constant 0 : index
    %7 = vector.load %arg1[%c0_6, %c0_7, %c0_8] : memref<16x8x256xf32, #tpu.memory_space<vmem>>, vector<1x8x256xf32>
    %8 = vector.shape_cast %7 : vector<1x8x256xf32> to vector<8x256xf32>
    %9 = arith.addf %8, %6 : vector<8x256xf32>
    %10 = vector.extract_strided_slice %9 {offsets = [0, 0], sizes = [8, 192], strides = [1, 1]} : vector<8x256xf32> to vector<8x192xf32>
    %11 = arith.negf %10 : vector<8x192xf32>
    %12 = math.exp %11 : vector<8x192xf32>
    %cst_9 = arith.constant 1.000000e+00 : f32
    %13 = vector.broadcast %cst_9 : f32 to vector<8x192xf32>
    %14 = arith.addf %13, %12 : vector<8x192xf32>
    %15 = arith.divf %13, %14 : vector<8x192xf32>
    %16 = vector.extract_strided_slice %9 {offsets = [0, 192], sizes = [8, 64], strides = [1, 1]} : vector<8x256xf32> to vector<8x64xf32>
    %17 = math.tanh %16 : vector<8x64xf32>
    %18 = vector.extract_strided_slice %15 {offsets = [0, 0], sizes = [8, 64], strides = [1, 1]} : vector<8x192xf32> to vector<8x64xf32>
    %19 = vector.extract_strided_slice %15 {offsets = [0, 64], sizes = [8, 64], strides = [1, 1]} : vector<8x192xf32> to vector<8x64xf32>
    %20 = vector.extract_strided_slice %15 {offsets = [0, 128], sizes = [8, 64], strides = [1, 1]} : vector<8x192xf32> to vector<8x64xf32>
    %21 = arith.mulf %19, %5 : vector<8x64xf32>
    %22 = arith.mulf %18, %17 : vector<8x64xf32>
    %23 = arith.addf %21, %22 : vector<8x64xf32>
    %24 = math.tanh %23 : vector<8x64xf32>
    %25 = arith.mulf %20, %24 : vector<8x64xf32>
    %cst_10 = arith.constant dense<0.000000e+00> : vector<8x512xf32>
    %26 = tpu.matmul %25, %0, %cst_10 {dimension_numbers = #tpu.dot_dimension_numbers<[1], [0], [0], [1], [0, 0, 1, 1], [], []>} : vector<8x64xf32>, vector<64x512xf32>, vector<8x512xf32> -> vector<8x512xf32>
    %27 = vector.extract_strided_slice %26 {offsets = [0, 0], sizes = [8, 256], strides = [1, 1]} : vector<8x512xf32> to vector<8x256xf32>
    %28 = arith.addf %27, %4 : vector<8x256xf32>
    %29 = arith.addf %28, %6 : vector<8x256xf32>
    %30 = vector.extract_strided_slice %29 {offsets = [0, 0], sizes = [8, 192], strides = [1, 1]} : vector<8x256xf32> to vector<8x192xf32>
    %31 = arith.negf %30 : vector<8x192xf32>
    %32 = math.exp %31 : vector<8x192xf32>
    %cst_11 = arith.constant 1.000000e+00 : f32
    %33 = vector.broadcast %cst_11 : f32 to vector<8x192xf32>
    %34 = arith.addf %33, %32 : vector<8x192xf32>
    %35 = arith.divf %33, %34 : vector<8x192xf32>
    %36 = vector.extract_strided_slice %29 {offsets = [0, 192], sizes = [8, 64], strides = [1, 1]} : vector<8x256xf32> to vector<8x64xf32>
    %37 = math.tanh %36 : vector<8x64xf32>
    %38 = vector.extract_strided_slice %35 {offsets = [0, 0], sizes = [8, 64], strides = [1, 1]} : vector<8x192xf32> to vector<8x64xf32>
    %39 = vector.extract_strided_slice %35 {offsets = [0, 64], sizes = [8, 64], strides = [1, 1]} : vector<8x192xf32> to vector<8x64xf32>
    %40 = vector.extract_strided_slice %35 {offsets = [0, 128], sizes = [8, 64], strides = [1, 1]} : vector<8x192xf32> to vector<8x64xf32>
    %41 = arith.mulf %39, %5 : vector<8x64xf32>
    %42 = arith.mulf %38, %37 : vector<8x64xf32>
    %43 = arith.addf %41, %42 : vector<8x64xf32>
    %44 = math.tanh %43 : vector<8x64xf32>
    %45 = arith.mulf %40, %44 : vector<8x64xf32>
    %46 = vector.extract_strided_slice %26 {offsets = [0, 256], sizes = [8, 256], strides = [1, 1]} : vector<8x512xf32> to vector<8x256xf32>
    %cst_12 = arith.constant dense<0.000000e+00> : vector<8x256xf32>
    %47 = tpu.matmul %45, %1, %cst_12 {dimension_numbers = #tpu.dot_dimension_numbers<[1], [0], [0], [1], [0, 0, 1, 1], [], []>} : vector<8x64xf32>, vector<64x256xf32>, vector<8x256xf32> -> vector<8x256xf32>
    %c1 = arith.constant 1 : index
    %c0_13 = arith.constant 0 : index
    %c0_14 = arith.constant 0 : index
    %48 = vector.load %arg1[%c1, %c0_13, %c0_14] : memref<16x8x256xf32, #tpu.memory_space<vmem>>, vector<1x8x256xf32>
    %49 = vector.shape_cast %48 : vector<1x8x256xf32> to vector<8x256xf32>
    %50 = arith.addf %49, %46 : vector<8x256xf32>
    %51 = vector.extract_strided_slice %50 {offsets = [0, 0], sizes = [8, 192], strides = [1, 1]} : vector<8x256xf32> to vector<8x192xf32>
    %52 = arith.negf %51 : vector<8x192xf32>
    %53 = math.exp %52 : vector<8x192xf32>
    %cst_15 = arith.constant 1.000000e+00 : f32
    %54 = vector.broadcast %cst_15 : f32 to vector<8x192xf32>
    %55 = arith.addf %54, %53 : vector<8x192xf32>
    %56 = arith.divf %54, %55 : vector<8x192xf32>
    %57 = vector.extract_strided_slice %50 {offsets = [0, 192], sizes = [8, 64], strides = [1, 1]} : vector<8x256xf32> to vector<8x64xf32>
    %58 = math.tanh %57 : vector<8x64xf32>
    %59 = vector.extract_strided_slice %56 {offsets = [0, 0], sizes = [8, 64], strides = [1, 1]} : vector<8x192xf32> to vector<8x64xf32>
    %60 = vector.extract_strided_slice %56 {offsets = [0, 64], sizes = [8, 64], strides = [1, 1]} : vector<8x192xf32> to vector<8x64xf32>
    %61 = vector.extract_strided_slice %56 {offsets = [0, 128], sizes = [8, 64], strides = [1, 1]} : vector<8x192xf32> to vector<8x64xf32>
    %62 = arith.mulf %60, %23 : vector<8x64xf32>
    %63 = arith.mulf %59, %58 : vector<8x64xf32>
    %64 = arith.addf %62, %63 : vector<8x64xf32>
    %65 = math.tanh %64 : vector<8x64xf32>
    %66 = arith.mulf %61, %65 : vector<8x64xf32>
    %cst_16 = arith.constant dense<0.000000e+00> : vector<8x512xf32>
    %67 = tpu.matmul %66, %0, %cst_16 {dimension_numbers = #tpu.dot_dimension_numbers<[1], [0], [0], [1], [0, 0, 1, 1], [], []>} : vector<8x64xf32>, vector<64x512xf32>, vector<8x512xf32> -> vector<8x512xf32>
    %68 = vector.extract_strided_slice %67 {offsets = [0, 0], sizes = [8, 256], strides = [1, 1]} : vector<8x512xf32> to vector<8x256xf32>
    %69 = arith.addf %68, %4 : vector<8x256xf32>
    %70 = arith.addf %69, %47 : vector<8x256xf32>
    %71 = vector.extract_strided_slice %70 {offsets = [0, 0], sizes = [8, 192], strides = [1, 1]} : vector<8x256xf32> to vector<8x192xf32>
    %72 = arith.negf %71 : vector<8x192xf32>
    %73 = math.exp %72 : vector<8x192xf32>
    %cst_17 = arith.constant 1.000000e+00 : f32
    %74 = vector.broadcast %cst_17 : f32 to vector<8x192xf32>
    %75 = arith.addf %74, %73 : vector<8x192xf32>
    %76 = arith.divf %74, %75 : vector<8x192xf32>
    %77 = vector.extract_strided_slice %70 {offsets = [0, 192], sizes = [8, 64], strides = [1, 1]} : vector<8x256xf32> to vector<8x64xf32>
    %78 = math.tanh %77 : vector<8x64xf32>
    %79 = vector.extract_strided_slice %76 {offsets = [0, 0], sizes = [8, 64], strides = [1, 1]} : vector<8x192xf32> to vector<8x64xf32>
    %80 = vector.extract_strided_slice %76 {offsets = [0, 64], sizes = [8, 64], strides = [1, 1]} : vector<8x192xf32> to vector<8x64xf32>
    %81 = vector.extract_strided_slice %76 {offsets = [0, 128], sizes = [8, 64], strides = [1, 1]} : vector<8x192xf32> to vector<8x64xf32>
    %82 = arith.mulf %80, %43 : vector<8x64xf32>
    %83 = arith.mulf %79, %78 : vector<8x64xf32>
    %84 = arith.addf %82, %83 : vector<8x64xf32>
    %85 = math.tanh %84 : vector<8x64xf32>
    %86 = arith.mulf %81, %85 : vector<8x64xf32>
    %87 = vector.extract_strided_slice %67 {offsets = [0, 256], sizes = [8, 256], strides = [1, 1]} : vector<8x512xf32> to vector<8x256xf32>
    %cst_18 = arith.constant dense<0.000000e+00> : vector<8x256xf32>
    %88 = tpu.matmul %86, %1, %cst_18 {dimension_numbers = #tpu.dot_dimension_numbers<[1], [0], [0], [1], [0, 0, 1, 1], [], []>} : vector<8x64xf32>, vector<64x256xf32>, vector<8x256xf32> -> vector<8x256xf32>
    %c2 = arith.constant 2 : index
    %c0_19 = arith.constant 0 : index
    %c0_20 = arith.constant 0 : index
    %89 = vector.load %arg1[%c2, %c0_19, %c0_20] : memref<16x8x256xf32, #tpu.memory_space<vmem>>, vector<1x8x256xf32>
    %90 = vector.shape_cast %89 : vector<1x8x256xf32> to vector<8x256xf32>
    %91 = arith.addf %90, %87 : vector<8x256xf32>
    %92 = vector.extract_strided_slice %91 {offsets = [0, 0], sizes = [8, 192], strides = [1, 1]} : vector<8x256xf32> to vector<8x192xf32>
    %93 = arith.negf %92 : vector<8x192xf32>
    %94 = math.exp %93 : vector<8x192xf32>
    %cst_21 = arith.constant 1.000000e+00 : f32
    %95 = vector.broadcast %cst_21 : f32 to vector<8x192xf32>
    %96 = arith.addf %95, %94 : vector<8x192xf32>
    %97 = arith.divf %95, %96 : vector<8x192xf32>
    %98 = vector.extract_strided_slice %91 {offsets = [0, 192], sizes = [8, 64], strides = [1, 1]} : vector<8x256xf32> to vector<8x64xf32>
    %99 = math.tanh %98 : vector<8x64xf32>
    %100 = vector.extract_strided_slice %97 {offsets = [0, 0], sizes = [8, 64], strides = [1, 1]} : vector<8x192xf32> to vector<8x64xf32>
    %101 = vector.extract_strided_slice %97 {offsets = [0, 64], sizes = [8, 64], strides = [1, 1]} : vector<8x192xf32> to vector<8x64xf32>
    %102 = vector.extract_strided_slice %97 {offsets = [0, 128], sizes = [8, 64], strides = [1, 1]} : vector<8x192xf32> to vector<8x64xf32>
    %103 = arith.mulf %101, %64 : vector<8x64xf32>
    %104 = arith.mulf %100, %99 : vector<8x64xf32>
    %105 = arith.addf %103, %104 : vector<8x64xf32>
    %106 = math.tanh %105 : vector<8x64xf32>
    %107 = arith.mulf %102, %106 : vector<8x64xf32>
    %cst_22 = arith.constant dense<0.000000e+00> : vector<8x512xf32>
    %108 = tpu.matmul %107, %0, %cst_22 {dimension_numbers = #tpu.dot_dimension_numbers<[1], [0], [0], [1], [0, 0, 1, 1], [], []>} : vector<8x64xf32>, vector<64x512xf32>, vector<8x512xf32> -> vector<8x512xf32>
    %109 = vector.extract_strided_slice %108 {offsets = [0, 0], sizes = [8, 256], strides = [1, 1]} : vector<8x512xf32> to vector<8x256xf32>
    %110 = arith.addf %109, %4 : vector<8x256xf32>
    %111 = arith.addf %110, %88 : vector<8x256xf32>
    %112 = vector.extract_strided_slice %111 {offsets = [0, 0], sizes = [8, 192], strides = [1, 1]} : vector<8x256xf32> to vector<8x192xf32>
    %113 = arith.negf %112 : vector<8x192xf32>
    %114 = math.exp %113 : vector<8x192xf32>
    %cst_23 = arith.constant 1.000000e+00 : f32
    %115 = vector.broadcast %cst_23 : f32 to vector<8x192xf32>
    %116 = arith.addf %115, %114 : vector<8x192xf32>
    %117 = arith.divf %115, %116 : vector<8x192xf32>
    %118 = vector.extract_strided_slice %111 {offsets = [0, 192], sizes = [8, 64], strides = [1, 1]} : vector<8x256xf32> to vector<8x64xf32>
    %119 = math.tanh %118 : vector<8x64xf32>
    %120 = vector.extract_strided_slice %117 {offsets = [0, 0], sizes = [8, 64], strides = [1, 1]} : vector<8x192xf32> to vector<8x64xf32>
    %121 = vector.extract_strided_slice %117 {offsets = [0, 64], sizes = [8, 64], strides = [1, 1]} : vector<8x192xf32> to vector<8x64xf32>
    %122 = vector.extract_strided_slice %117 {offsets = [0, 128], sizes = [8, 64], strides = [1, 1]} : vector<8x192xf32> to vector<8x64xf32>
    %123 = arith.mulf %121, %84 : vector<8x64xf32>
    %124 = arith.mulf %120, %119 : vector<8x64xf32>
    %125 = arith.addf %123, %124 : vector<8x64xf32>
    %126 = math.tanh %125 : vector<8x64xf32>
    %127 = arith.mulf %122, %126 : vector<8x64xf32>
    %128 = vector.extract_strided_slice %108 {offsets = [0, 256], sizes = [8, 256], strides = [1, 1]} : vector<8x512xf32> to vector<8x256xf32>
    %cst_24 = arith.constant dense<0.000000e+00> : vector<8x256xf32>
    %129 = tpu.matmul %127, %1, %cst_24 {dimension_numbers = #tpu.dot_dimension_numbers<[1], [0], [0], [1], [0, 0, 1, 1], [], []>} : vector<8x64xf32>, vector<64x256xf32>, vector<8x256xf32> -> vector<8x256xf32>
    %c3 = arith.constant 3 : index
    %c0_25 = arith.constant 0 : index
    %c0_26 = arith.constant 0 : index
    %130 = vector.load %arg1[%c3, %c0_25, %c0_26] : memref<16x8x256xf32, #tpu.memory_space<vmem>>, vector<1x8x256xf32>
    %131 = vector.shape_cast %130 : vector<1x8x256xf32> to vector<8x256xf32>
    %132 = arith.addf %131, %128 : vector<8x256xf32>
    %133 = vector.extract_strided_slice %132 {offsets = [0, 0], sizes = [8, 192], strides = [1, 1]} : vector<8x256xf32> to vector<8x192xf32>
    %134 = arith.negf %133 : vector<8x192xf32>
    %135 = math.exp %134 : vector<8x192xf32>
    %cst_27 = arith.constant 1.000000e+00 : f32
    %136 = vector.broadcast %cst_27 : f32 to vector<8x192xf32>
    %137 = arith.addf %136, %135 : vector<8x192xf32>
    %138 = arith.divf %136, %137 : vector<8x192xf32>
    %139 = vector.extract_strided_slice %132 {offsets = [0, 192], sizes = [8, 64], strides = [1, 1]} : vector<8x256xf32> to vector<8x64xf32>
    %140 = math.tanh %139 : vector<8x64xf32>
    %141 = vector.extract_strided_slice %138 {offsets = [0, 0], sizes = [8, 64], strides = [1, 1]} : vector<8x192xf32> to vector<8x64xf32>
    %142 = vector.extract_strided_slice %138 {offsets = [0, 64], sizes = [8, 64], strides = [1, 1]} : vector<8x192xf32> to vector<8x64xf32>
    %143 = vector.extract_strided_slice %138 {offsets = [0, 128], sizes = [8, 64], strides = [1, 1]} : vector<8x192xf32> to vector<8x64xf32>
    %144 = arith.mulf %142, %105 : vector<8x64xf32>
    %145 = arith.mulf %141, %140 : vector<8x64xf32>
    %146 = arith.addf %144, %145 : vector<8x64xf32>
    %147 = math.tanh %146 : vector<8x64xf32>
    %148 = arith.mulf %143, %147 : vector<8x64xf32>
    %cst_28 = arith.constant dense<0.000000e+00> : vector<8x512xf32>
    %149 = tpu.matmul %148, %0, %cst_28 {dimension_numbers = #tpu.dot_dimension_numbers<[1], [0], [0], [1], [0, 0, 1, 1], [], []>} : vector<8x64xf32>, vector<64x512xf32>, vector<8x512xf32> -> vector<8x512xf32>
    %150 = vector.extract_strided_slice %149 {offsets = [0, 0], sizes = [8, 256], strides = [1, 1]} : vector<8x512xf32> to vector<8x256xf32>
    %151 = arith.addf %150, %4 : vector<8x256xf32>
    %152 = arith.addf %151, %129 : vector<8x256xf32>
    %153 = vector.extract_strided_slice %152 {offsets = [0, 0], sizes = [8, 192], strides = [1, 1]} : vector<8x256xf32> to vector<8x192xf32>
    %154 = arith.negf %153 : vector<8x192xf32>
    %155 = math.exp %154 : vector<8x192xf32>
    %cst_29 = arith.constant 1.000000e+00 : f32
    %156 = vector.broadcast %cst_29 : f32 to vector<8x192xf32>
    %157 = arith.addf %156, %155 : vector<8x192xf32>
    %158 = arith.divf %156, %157 : vector<8x192xf32>
    %159 = vector.extract_strided_slice %152 {offsets = [0, 192], sizes = [8, 64], strides = [1, 1]} : vector<8x256xf32> to vector<8x64xf32>
    %160 = math.tanh %159 : vector<8x64xf32>
    %161 = vector.extract_strided_slice %158 {offsets = [0, 0], sizes = [8, 64], strides = [1, 1]} : vector<8x192xf32> to vector<8x64xf32>
    %162 = vector.extract_strided_slice %158 {offsets = [0, 64], sizes = [8, 64], strides = [1, 1]} : vector<8x192xf32> to vector<8x64xf32>
    %163 = vector.extract_strided_slice %158 {offsets = [0, 128], sizes = [8, 64], strides = [1, 1]} : vector<8x192xf32> to vector<8x64xf32>
    %164 = arith.mulf %162, %125 : vector<8x64xf32>
    %165 = arith.mulf %161, %160 : vector<8x64xf32>
    %166 = arith.addf %164, %165 : vector<8x64xf32>
    %167 = math.tanh %166 : vector<8x64xf32>
    %168 = arith.mulf %163, %167 : vector<8x64xf32>
    %169 = vector.extract_strided_slice %149 {offsets = [0, 256], sizes = [8, 256], strides = [1, 1]} : vector<8x512xf32> to vector<8x256xf32>
    %cst_30 = arith.constant dense<0.000000e+00> : vector<8x256xf32>
    %170 = tpu.matmul %168, %1, %cst_30 {dimension_numbers = #tpu.dot_dimension_numbers<[1], [0], [0], [1], [0, 0, 1, 1], [], []>} : vector<8x64xf32>, vector<64x256xf32>, vector<8x256xf32> -> vector<8x256xf32>
    %c4 = arith.constant 4 : index
    %c0_31 = arith.constant 0 : index
    %c0_32 = arith.constant 0 : index
    %171 = vector.load %arg1[%c4, %c0_31, %c0_32] : memref<16x8x256xf32, #tpu.memory_space<vmem>>, vector<1x8x256xf32>
    %172 = vector.shape_cast %171 : vector<1x8x256xf32> to vector<8x256xf32>
    %173 = arith.addf %172, %169 : vector<8x256xf32>
    %174 = vector.extract_strided_slice %173 {offsets = [0, 0], sizes = [8, 192], strides = [1, 1]} : vector<8x256xf32> to vector<8x192xf32>
    %175 = arith.negf %174 : vector<8x192xf32>
    %176 = math.exp %175 : vector<8x192xf32>
    %cst_33 = arith.constant 1.000000e+00 : f32
    %177 = vector.broadcast %cst_33 : f32 to vector<8x192xf32>
    %178 = arith.addf %177, %176 : vector<8x192xf32>
    %179 = arith.divf %177, %178 : vector<8x192xf32>
    %180 = vector.extract_strided_slice %173 {offsets = [0, 192], sizes = [8, 64], strides = [1, 1]} : vector<8x256xf32> to vector<8x64xf32>
    %181 = math.tanh %180 : vector<8x64xf32>
    %182 = vector.extract_strided_slice %179 {offsets = [0, 0], sizes = [8, 64], strides = [1, 1]} : vector<8x192xf32> to vector<8x64xf32>
    %183 = vector.extract_strided_slice %179 {offsets = [0, 64], sizes = [8, 64], strides = [1, 1]} : vector<8x192xf32> to vector<8x64xf32>
    %184 = vector.extract_strided_slice %179 {offsets = [0, 128], sizes = [8, 64], strides = [1, 1]} : vector<8x192xf32> to vector<8x64xf32>
    %185 = arith.mulf %183, %146 : vector<8x64xf32>
    %186 = arith.mulf %182, %181 : vector<8x64xf32>
    %187 = arith.addf %185, %186 : vector<8x64xf32>
    %188 = math.tanh %187 : vector<8x64xf32>
    %189 = arith.mulf %184, %188 : vector<8x64xf32>
    %cst_34 = arith.constant dense<0.000000e+00> : vector<8x512xf32>
    %190 = tpu.matmul %189, %0, %cst_34 {dimension_numbers = #tpu.dot_dimension_numbers<[1], [0], [0], [1], [0, 0, 1, 1], [], []>} : vector<8x64xf32>, vector<64x512xf32>, vector<8x512xf32> -> vector<8x512xf32>
    %191 = vector.extract_strided_slice %190 {offsets = [0, 0], sizes = [8, 256], strides = [1, 1]} : vector<8x512xf32> to vector<8x256xf32>
    %192 = arith.addf %191, %4 : vector<8x256xf32>
    %193 = arith.addf %192, %170 : vector<8x256xf32>
    %194 = vector.extract_strided_slice %193 {offsets = [0, 0], sizes = [8, 192], strides = [1, 1]} : vector<8x256xf32> to vector<8x192xf32>
    %195 = arith.negf %194 : vector<8x192xf32>
    %196 = math.exp %195 : vector<8x192xf32>
    %cst_35 = arith.constant 1.000000e+00 : f32
    %197 = vector.broadcast %cst_35 : f32 to vector<8x192xf32>
    %198 = arith.addf %197, %196 : vector<8x192xf32>
    %199 = arith.divf %197, %198 : vector<8x192xf32>
    %200 = vector.extract_strided_slice %193 {offsets = [0, 192], sizes = [8, 64], strides = [1, 1]} : vector<8x256xf32> to vector<8x64xf32>
    %201 = math.tanh %200 : vector<8x64xf32>
    %202 = vector.extract_strided_slice %199 {offsets = [0, 0], sizes = [8, 64], strides = [1, 1]} : vector<8x192xf32> to vector<8x64xf32>
    %203 = vector.extract_strided_slice %199 {offsets = [0, 64], sizes = [8, 64], strides = [1, 1]} : vector<8x192xf32> to vector<8x64xf32>
    %204 = vector.extract_strided_slice %199 {offsets = [0, 128], sizes = [8, 64], strides = [1, 1]} : vector<8x192xf32> to vector<8x64xf32>
    %205 = arith.mulf %203, %166 : vector<8x64xf32>
    %206 = arith.mulf %202, %201 : vector<8x64xf32>
    %207 = arith.addf %205, %206 : vector<8x64xf32>
    %208 = math.tanh %207 : vector<8x64xf32>
    %209 = arith.mulf %204, %208 : vector<8x64xf32>
    %210 = vector.extract_strided_slice %190 {offsets = [0, 256], sizes = [8, 256], strides = [1, 1]} : vector<8x512xf32> to vector<8x256xf32>
    %cst_36 = arith.constant dense<0.000000e+00> : vector<8x256xf32>
    %211 = tpu.matmul %209, %1, %cst_36 {dimension_numbers = #tpu.dot_dimension_numbers<[1], [0], [0], [1], [0, 0, 1, 1], [], []>} : vector<8x64xf32>, vector<64x256xf32>, vector<8x256xf32> -> vector<8x256xf32>
    %c5 = arith.constant 5 : index
    %c0_37 = arith.constant 0 : index
    %c0_38 = arith.constant 0 : index
    %212 = vector.load %arg1[%c5, %c0_37, %c0_38] : memref<16x8x256xf32, #tpu.memory_space<vmem>>, vector<1x8x256xf32>
    %213 = vector.shape_cast %212 : vector<1x8x256xf32> to vector<8x256xf32>
    %214 = arith.addf %213, %210 : vector<8x256xf32>
    %215 = vector.extract_strided_slice %214 {offsets = [0, 0], sizes = [8, 192], strides = [1, 1]} : vector<8x256xf32> to vector<8x192xf32>
    %216 = arith.negf %215 : vector<8x192xf32>
    %217 = math.exp %216 : vector<8x192xf32>
    %cst_39 = arith.constant 1.000000e+00 : f32
    %218 = vector.broadcast %cst_39 : f32 to vector<8x192xf32>
    %219 = arith.addf %218, %217 : vector<8x192xf32>
    %220 = arith.divf %218, %219 : vector<8x192xf32>
    %221 = vector.extract_strided_slice %214 {offsets = [0, 192], sizes = [8, 64], strides = [1, 1]} : vector<8x256xf32> to vector<8x64xf32>
    %222 = math.tanh %221 : vector<8x64xf32>
    %223 = vector.extract_strided_slice %220 {offsets = [0, 0], sizes = [8, 64], strides = [1, 1]} : vector<8x192xf32> to vector<8x64xf32>
    %224 = vector.extract_strided_slice %220 {offsets = [0, 64], sizes = [8, 64], strides = [1, 1]} : vector<8x192xf32> to vector<8x64xf32>
    %225 = vector.extract_strided_slice %220 {offsets = [0, 128], sizes = [8, 64], strides = [1, 1]} : vector<8x192xf32> to vector<8x64xf32>
    %226 = arith.mulf %224, %187 : vector<8x64xf32>
    %227 = arith.mulf %223, %222 : vector<8x64xf32>
    %228 = arith.addf %226, %227 : vector<8x64xf32>
    %229 = math.tanh %228 : vector<8x64xf32>
    %230 = arith.mulf %225, %229 : vector<8x64xf32>
    %cst_40 = arith.constant dense<0.000000e+00> : vector<8x512xf32>
    %231 = tpu.matmul %230, %0, %cst_40 {dimension_numbers = #tpu.dot_dimension_numbers<[1], [0], [0], [1], [0, 0, 1, 1], [], []>} : vector<8x64xf32>, vector<64x512xf32>, vector<8x512xf32> -> vector<8x512xf32>
    %232 = vector.extract_strided_slice %231 {offsets = [0, 0], sizes = [8, 256], strides = [1, 1]} : vector<8x512xf32> to vector<8x256xf32>
    %233 = arith.addf %232, %4 : vector<8x256xf32>
    %234 = arith.addf %233, %211 : vector<8x256xf32>
    %235 = vector.extract_strided_slice %234 {offsets = [0, 0], sizes = [8, 192], strides = [1, 1]} : vector<8x256xf32> to vector<8x192xf32>
    %236 = arith.negf %235 : vector<8x192xf32>
    %237 = math.exp %236 : vector<8x192xf32>
    %cst_41 = arith.constant 1.000000e+00 : f32
    %238 = vector.broadcast %cst_41 : f32 to vector<8x192xf32>
    %239 = arith.addf %238, %237 : vector<8x192xf32>
    %240 = arith.divf %238, %239 : vector<8x192xf32>
    %241 = vector.extract_strided_slice %234 {offsets = [0, 192], sizes = [8, 64], strides = [1, 1]} : vector<8x256xf32> to vector<8x64xf32>
    %242 = math.tanh %241 : vector<8x64xf32>
    %243 = vector.extract_strided_slice %240 {offsets = [0, 0], sizes = [8, 64], strides = [1, 1]} : vector<8x192xf32> to vector<8x64xf32>
    %244 = vector.extract_strided_slice %240 {offsets = [0, 64], sizes = [8, 64], strides = [1, 1]} : vector<8x192xf32> to vector<8x64xf32>
    %245 = vector.extract_strided_slice %240 {offsets = [0, 128], sizes = [8, 64], strides = [1, 1]} : vector<8x192xf32> to vector<8x64xf32>
    %246 = arith.mulf %244, %207 : vector<8x64xf32>
    %247 = arith.mulf %243, %242 : vector<8x64xf32>
    %248 = arith.addf %246, %247 : vector<8x64xf32>
    %249 = math.tanh %248 : vector<8x64xf32>
    %250 = arith.mulf %245, %249 : vector<8x64xf32>
    %251 = vector.extract_strided_slice %231 {offsets = [0, 256], sizes = [8, 256], strides = [1, 1]} : vector<8x512xf32> to vector<8x256xf32>
    %cst_42 = arith.constant dense<0.000000e+00> : vector<8x256xf32>
    %252 = tpu.matmul %250, %1, %cst_42 {dimension_numbers = #tpu.dot_dimension_numbers<[1], [0], [0], [1], [0, 0, 1, 1], [], []>} : vector<8x64xf32>, vector<64x256xf32>, vector<8x256xf32> -> vector<8x256xf32>
    %c6 = arith.constant 6 : index
    %c0_43 = arith.constant 0 : index
    %c0_44 = arith.constant 0 : index
    %253 = vector.load %arg1[%c6, %c0_43, %c0_44] : memref<16x8x256xf32, #tpu.memory_space<vmem>>, vector<1x8x256xf32>
    %254 = vector.shape_cast %253 : vector<1x8x256xf32> to vector<8x256xf32>
    %255 = arith.addf %254, %251 : vector<8x256xf32>
    %256 = vector.extract_strided_slice %255 {offsets = [0, 0], sizes = [8, 192], strides = [1, 1]} : vector<8x256xf32> to vector<8x192xf32>
    %257 = arith.negf %256 : vector<8x192xf32>
    %258 = math.exp %257 : vector<8x192xf32>
    %cst_45 = arith.constant 1.000000e+00 : f32
    %259 = vector.broadcast %cst_45 : f32 to vector<8x192xf32>
    %260 = arith.addf %259, %258 : vector<8x192xf32>
    %261 = arith.divf %259, %260 : vector<8x192xf32>
    %262 = vector.extract_strided_slice %255 {offsets = [0, 192], sizes = [8, 64], strides = [1, 1]} : vector<8x256xf32> to vector<8x64xf32>
    %263 = math.tanh %262 : vector<8x64xf32>
    %264 = vector.extract_strided_slice %261 {offsets = [0, 0], sizes = [8, 64], strides = [1, 1]} : vector<8x192xf32> to vector<8x64xf32>
    %265 = vector.extract_strided_slice %261 {offsets = [0, 64], sizes = [8, 64], strides = [1, 1]} : vector<8x192xf32> to vector<8x64xf32>
    %266 = vector.extract_strided_slice %261 {offsets = [0, 128], sizes = [8, 64], strides = [1, 1]} : vector<8x192xf32> to vector<8x64xf32>
    %267 = arith.mulf %265, %228 : vector<8x64xf32>
    %268 = arith.mulf %264, %263 : vector<8x64xf32>
    %269 = arith.addf %267, %268 : vector<8x64xf32>
    %270 = math.tanh %269 : vector<8x64xf32>
    %271 = arith.mulf %266, %270 : vector<8x64xf32>
    %cst_46 = arith.constant dense<0.000000e+00> : vector<8x512xf32>
    %272 = tpu.matmul %271, %0, %cst_46 {dimension_numbers = #tpu.dot_dimension_numbers<[1], [0], [0], [1], [0, 0, 1, 1], [], []>} : vector<8x64xf32>, vector<64x512xf32>, vector<8x512xf32> -> vector<8x512xf32>
    %273 = vector.extract_strided_slice %272 {offsets = [0, 0], sizes = [8, 256], strides = [1, 1]} : vector<8x512xf32> to vector<8x256xf32>
    %274 = arith.addf %273, %4 : vector<8x256xf32>
    %275 = arith.addf %274, %252 : vector<8x256xf32>
    %276 = vector.extract_strided_slice %275 {offsets = [0, 0], sizes = [8, 192], strides = [1, 1]} : vector<8x256xf32> to vector<8x192xf32>
    %277 = arith.negf %276 : vector<8x192xf32>
    %278 = math.exp %277 : vector<8x192xf32>
    %cst_47 = arith.constant 1.000000e+00 : f32
    %279 = vector.broadcast %cst_47 : f32 to vector<8x192xf32>
    %280 = arith.addf %279, %278 : vector<8x192xf32>
    %281 = arith.divf %279, %280 : vector<8x192xf32>
    %282 = vector.extract_strided_slice %275 {offsets = [0, 192], sizes = [8, 64], strides = [1, 1]} : vector<8x256xf32> to vector<8x64xf32>
    %283 = math.tanh %282 : vector<8x64xf32>
    %284 = vector.extract_strided_slice %281 {offsets = [0, 0], sizes = [8, 64], strides = [1, 1]} : vector<8x192xf32> to vector<8x64xf32>
    %285 = vector.extract_strided_slice %281 {offsets = [0, 64], sizes = [8, 64], strides = [1, 1]} : vector<8x192xf32> to vector<8x64xf32>
    %286 = vector.extract_strided_slice %281 {offsets = [0, 128], sizes = [8, 64], strides = [1, 1]} : vector<8x192xf32> to vector<8x64xf32>
    %287 = arith.mulf %285, %248 : vector<8x64xf32>
    %288 = arith.mulf %284, %283 : vector<8x64xf32>
    %289 = arith.addf %287, %288 : vector<8x64xf32>
    %290 = math.tanh %289 : vector<8x64xf32>
    %291 = arith.mulf %286, %290 : vector<8x64xf32>
    %292 = vector.extract_strided_slice %272 {offsets = [0, 256], sizes = [8, 256], strides = [1, 1]} : vector<8x512xf32> to vector<8x256xf32>
    %cst_48 = arith.constant dense<0.000000e+00> : vector<8x256xf32>
    %293 = tpu.matmul %291, %1, %cst_48 {dimension_numbers = #tpu.dot_dimension_numbers<[1], [0], [0], [1], [0, 0, 1, 1], [], []>} : vector<8x64xf32>, vector<64x256xf32>, vector<8x256xf32> -> vector<8x256xf32>
    %c7 = arith.constant 7 : index
    %c0_49 = arith.constant 0 : index
    %c0_50 = arith.constant 0 : index
    %294 = vector.load %arg1[%c7, %c0_49, %c0_50] : memref<16x8x256xf32, #tpu.memory_space<vmem>>, vector<1x8x256xf32>
    %295 = vector.shape_cast %294 : vector<1x8x256xf32> to vector<8x256xf32>
    %296 = arith.addf %295, %292 : vector<8x256xf32>
    %297 = vector.extract_strided_slice %296 {offsets = [0, 0], sizes = [8, 192], strides = [1, 1]} : vector<8x256xf32> to vector<8x192xf32>
    %298 = arith.negf %297 : vector<8x192xf32>
    %299 = math.exp %298 : vector<8x192xf32>
    %cst_51 = arith.constant 1.000000e+00 : f32
    %300 = vector.broadcast %cst_51 : f32 to vector<8x192xf32>
    %301 = arith.addf %300, %299 : vector<8x192xf32>
    %302 = arith.divf %300, %301 : vector<8x192xf32>
    %303 = vector.extract_strided_slice %296 {offsets = [0, 192], sizes = [8, 64], strides = [1, 1]} : vector<8x256xf32> to vector<8x64xf32>
    %304 = math.tanh %303 : vector<8x64xf32>
    %305 = vector.extract_strided_slice %302 {offsets = [0, 0], sizes = [8, 64], strides = [1, 1]} : vector<8x192xf32> to vector<8x64xf32>
    %306 = vector.extract_strided_slice %302 {offsets = [0, 64], sizes = [8, 64], strides = [1, 1]} : vector<8x192xf32> to vector<8x64xf32>
    %307 = vector.extract_strided_slice %302 {offsets = [0, 128], sizes = [8, 64], strides = [1, 1]} : vector<8x192xf32> to vector<8x64xf32>
    %308 = arith.mulf %306, %269 : vector<8x64xf32>
    %309 = arith.mulf %305, %304 : vector<8x64xf32>
    %310 = arith.addf %308, %309 : vector<8x64xf32>
    %311 = math.tanh %310 : vector<8x64xf32>
    %312 = arith.mulf %307, %311 : vector<8x64xf32>
    %cst_52 = arith.constant dense<0.000000e+00> : vector<8x512xf32>
    %313 = tpu.matmul %312, %0, %cst_52 {dimension_numbers = #tpu.dot_dimension_numbers<[1], [0], [0], [1], [0, 0, 1, 1], [], []>} : vector<8x64xf32>, vector<64x512xf32>, vector<8x512xf32> -> vector<8x512xf32>
    %314 = vector.extract_strided_slice %313 {offsets = [0, 0], sizes = [8, 256], strides = [1, 1]} : vector<8x512xf32> to vector<8x256xf32>
    %315 = arith.addf %314, %4 : vector<8x256xf32>
    %316 = arith.addf %315, %293 : vector<8x256xf32>
    %317 = vector.extract_strided_slice %316 {offsets = [0, 0], sizes = [8, 192], strides = [1, 1]} : vector<8x256xf32> to vector<8x192xf32>
    %318 = arith.negf %317 : vector<8x192xf32>
    %319 = math.exp %318 : vector<8x192xf32>
    %cst_53 = arith.constant 1.000000e+00 : f32
    %320 = vector.broadcast %cst_53 : f32 to vector<8x192xf32>
    %321 = arith.addf %320, %319 : vector<8x192xf32>
    %322 = arith.divf %320, %321 : vector<8x192xf32>
    %323 = vector.extract_strided_slice %316 {offsets = [0, 192], sizes = [8, 64], strides = [1, 1]} : vector<8x256xf32> to vector<8x64xf32>
    %324 = math.tanh %323 : vector<8x64xf32>
    %325 = vector.extract_strided_slice %322 {offsets = [0, 0], sizes = [8, 64], strides = [1, 1]} : vector<8x192xf32> to vector<8x64xf32>
    %326 = vector.extract_strided_slice %322 {offsets = [0, 64], sizes = [8, 64], strides = [1, 1]} : vector<8x192xf32> to vector<8x64xf32>
    %327 = vector.extract_strided_slice %322 {offsets = [0, 128], sizes = [8, 64], strides = [1, 1]} : vector<8x192xf32> to vector<8x64xf32>
    %328 = arith.mulf %326, %289 : vector<8x64xf32>
    %329 = arith.mulf %325, %324 : vector<8x64xf32>
    %330 = arith.addf %328, %329 : vector<8x64xf32>
    %331 = math.tanh %330 : vector<8x64xf32>
    %332 = arith.mulf %327, %331 : vector<8x64xf32>
    %333 = vector.extract_strided_slice %313 {offsets = [0, 256], sizes = [8, 256], strides = [1, 1]} : vector<8x512xf32> to vector<8x256xf32>
    %cst_54 = arith.constant dense<0.000000e+00> : vector<8x256xf32>
    %334 = tpu.matmul %332, %1, %cst_54 {dimension_numbers = #tpu.dot_dimension_numbers<[1], [0], [0], [1], [0, 0, 1, 1], [], []>} : vector<8x64xf32>, vector<64x256xf32>, vector<8x256xf32> -> vector<8x256xf32>
    %c8 = arith.constant 8 : index
    %c0_55 = arith.constant 0 : index
    %c0_56 = arith.constant 0 : index
    %335 = vector.load %arg1[%c8, %c0_55, %c0_56] : memref<16x8x256xf32, #tpu.memory_space<vmem>>, vector<1x8x256xf32>
    %336 = vector.shape_cast %335 : vector<1x8x256xf32> to vector<8x256xf32>
    %337 = arith.addf %336, %333 : vector<8x256xf32>
    %338 = vector.extract_strided_slice %337 {offsets = [0, 0], sizes = [8, 192], strides = [1, 1]} : vector<8x256xf32> to vector<8x192xf32>
    %339 = arith.negf %338 : vector<8x192xf32>
    %340 = math.exp %339 : vector<8x192xf32>
    %cst_57 = arith.constant 1.000000e+00 : f32
    %341 = vector.broadcast %cst_57 : f32 to vector<8x192xf32>
    %342 = arith.addf %341, %340 : vector<8x192xf32>
    %343 = arith.divf %341, %342 : vector<8x192xf32>
    %344 = vector.extract_strided_slice %337 {offsets = [0, 192], sizes = [8, 64], strides = [1, 1]} : vector<8x256xf32> to vector<8x64xf32>
    %345 = math.tanh %344 : vector<8x64xf32>
    %346 = vector.extract_strided_slice %343 {offsets = [0, 0], sizes = [8, 64], strides = [1, 1]} : vector<8x192xf32> to vector<8x64xf32>
    %347 = vector.extract_strided_slice %343 {offsets = [0, 64], sizes = [8, 64], strides = [1, 1]} : vector<8x192xf32> to vector<8x64xf32>
    %348 = vector.extract_strided_slice %343 {offsets = [0, 128], sizes = [8, 64], strides = [1, 1]} : vector<8x192xf32> to vector<8x64xf32>
    %349 = arith.mulf %347, %310 : vector<8x64xf32>
    %350 = arith.mulf %346, %345 : vector<8x64xf32>
    %351 = arith.addf %349, %350 : vector<8x64xf32>
    %352 = math.tanh %351 : vector<8x64xf32>
    %353 = arith.mulf %348, %352 : vector<8x64xf32>
    %cst_58 = arith.constant dense<0.000000e+00> : vector<8x512xf32>
    %354 = tpu.matmul %353, %0, %cst_58 {dimension_numbers = #tpu.dot_dimension_numbers<[1], [0], [0], [1], [0, 0, 1, 1], [], []>} : vector<8x64xf32>, vector<64x512xf32>, vector<8x512xf32> -> vector<8x512xf32>
    %355 = vector.extract_strided_slice %354 {offsets = [0, 0], sizes = [8, 256], strides = [1, 1]} : vector<8x512xf32> to vector<8x256xf32>
    %356 = arith.addf %355, %4 : vector<8x256xf32>
    %357 = arith.addf %356, %334 : vector<8x256xf32>
    %358 = vector.extract_strided_slice %357 {offsets = [0, 0], sizes = [8, 192], strides = [1, 1]} : vector<8x256xf32> to vector<8x192xf32>
    %359 = arith.negf %358 : vector<8x192xf32>
    %360 = math.exp %359 : vector<8x192xf32>
    %cst_59 = arith.constant 1.000000e+00 : f32
    %361 = vector.broadcast %cst_59 : f32 to vector<8x192xf32>
    %362 = arith.addf %361, %360 : vector<8x192xf32>
    %363 = arith.divf %361, %362 : vector<8x192xf32>
    %364 = vector.extract_strided_slice %357 {offsets = [0, 192], sizes = [8, 64], strides = [1, 1]} : vector<8x256xf32> to vector<8x64xf32>
    %365 = math.tanh %364 : vector<8x64xf32>
    %366 = vector.extract_strided_slice %363 {offsets = [0, 0], sizes = [8, 64], strides = [1, 1]} : vector<8x192xf32> to vector<8x64xf32>
    %367 = vector.extract_strided_slice %363 {offsets = [0, 64], sizes = [8, 64], strides = [1, 1]} : vector<8x192xf32> to vector<8x64xf32>
    %368 = vector.extract_strided_slice %363 {offsets = [0, 128], sizes = [8, 64], strides = [1, 1]} : vector<8x192xf32> to vector<8x64xf32>
    %369 = arith.mulf %367, %330 : vector<8x64xf32>
    %370 = arith.mulf %366, %365 : vector<8x64xf32>
    %371 = arith.addf %369, %370 : vector<8x64xf32>
    %372 = math.tanh %371 : vector<8x64xf32>
    %373 = arith.mulf %368, %372 : vector<8x64xf32>
    %374 = vector.extract_strided_slice %354 {offsets = [0, 256], sizes = [8, 256], strides = [1, 1]} : vector<8x512xf32> to vector<8x256xf32>
    %cst_60 = arith.constant dense<0.000000e+00> : vector<8x256xf32>
    %375 = tpu.matmul %373, %1, %cst_60 {dimension_numbers = #tpu.dot_dimension_numbers<[1], [0], [0], [1], [0, 0, 1, 1], [], []>} : vector<8x64xf32>, vector<64x256xf32>, vector<8x256xf32> -> vector<8x256xf32>
    %c9 = arith.constant 9 : index
    %c0_61 = arith.constant 0 : index
    %c0_62 = arith.constant 0 : index
    %376 = vector.load %arg1[%c9, %c0_61, %c0_62] : memref<16x8x256xf32, #tpu.memory_space<vmem>>, vector<1x8x256xf32>
    %377 = vector.shape_cast %376 : vector<1x8x256xf32> to vector<8x256xf32>
    %378 = arith.addf %377, %374 : vector<8x256xf32>
    %379 = vector.extract_strided_slice %378 {offsets = [0, 0], sizes = [8, 192], strides = [1, 1]} : vector<8x256xf32> to vector<8x192xf32>
    %380 = arith.negf %379 : vector<8x192xf32>
    %381 = math.exp %380 : vector<8x192xf32>
    %cst_63 = arith.constant 1.000000e+00 : f32
    %382 = vector.broadcast %cst_63 : f32 to vector<8x192xf32>
    %383 = arith.addf %382, %381 : vector<8x192xf32>
    %384 = arith.divf %382, %383 : vector<8x192xf32>
    %385 = vector.extract_strided_slice %378 {offsets = [0, 192], sizes = [8, 64], strides = [1, 1]} : vector<8x256xf32> to vector<8x64xf32>
    %386 = math.tanh %385 : vector<8x64xf32>
    %387 = vector.extract_strided_slice %384 {offsets = [0, 0], sizes = [8, 64], strides = [1, 1]} : vector<8x192xf32> to vector<8x64xf32>
    %388 = vector.extract_strided_slice %384 {offsets = [0, 64], sizes = [8, 64], strides = [1, 1]} : vector<8x192xf32> to vector<8x64xf32>
    %389 = vector.extract_strided_slice %384 {offsets = [0, 128], sizes = [8, 64], strides = [1, 1]} : vector<8x192xf32> to vector<8x64xf32>
    %390 = arith.mulf %388, %351 : vector<8x64xf32>
    %391 = arith.mulf %387, %386 : vector<8x64xf32>
    %392 = arith.addf %390, %391 : vector<8x64xf32>
    %393 = math.tanh %392 : vector<8x64xf32>
    %394 = arith.mulf %389, %393 : vector<8x64xf32>
    %cst_64 = arith.constant dense<0.000000e+00> : vector<8x512xf32>
    %395 = tpu.matmul %394, %0, %cst_64 {dimension_numbers = #tpu.dot_dimension_numbers<[1], [0], [0], [1], [0, 0, 1, 1], [], []>} : vector<8x64xf32>, vector<64x512xf32>, vector<8x512xf32> -> vector<8x512xf32>
    %396 = vector.extract_strided_slice %395 {offsets = [0, 0], sizes = [8, 256], strides = [1, 1]} : vector<8x512xf32> to vector<8x256xf32>
    %397 = arith.addf %396, %4 : vector<8x256xf32>
    %398 = arith.addf %397, %375 : vector<8x256xf32>
    %399 = vector.extract_strided_slice %398 {offsets = [0, 0], sizes = [8, 192], strides = [1, 1]} : vector<8x256xf32> to vector<8x192xf32>
    %400 = arith.negf %399 : vector<8x192xf32>
    %401 = math.exp %400 : vector<8x192xf32>
    %cst_65 = arith.constant 1.000000e+00 : f32
    %402 = vector.broadcast %cst_65 : f32 to vector<8x192xf32>
    %403 = arith.addf %402, %401 : vector<8x192xf32>
    %404 = arith.divf %402, %403 : vector<8x192xf32>
    %405 = vector.extract_strided_slice %398 {offsets = [0, 192], sizes = [8, 64], strides = [1, 1]} : vector<8x256xf32> to vector<8x64xf32>
    %406 = math.tanh %405 : vector<8x64xf32>
    %407 = vector.extract_strided_slice %404 {offsets = [0, 0], sizes = [8, 64], strides = [1, 1]} : vector<8x192xf32> to vector<8x64xf32>
    %408 = vector.extract_strided_slice %404 {offsets = [0, 64], sizes = [8, 64], strides = [1, 1]} : vector<8x192xf32> to vector<8x64xf32>
    %409 = vector.extract_strided_slice %404 {offsets = [0, 128], sizes = [8, 64], strides = [1, 1]} : vector<8x192xf32> to vector<8x64xf32>
    %410 = arith.mulf %408, %371 : vector<8x64xf32>
    %411 = arith.mulf %407, %406 : vector<8x64xf32>
    %412 = arith.addf %410, %411 : vector<8x64xf32>
    %413 = math.tanh %412 : vector<8x64xf32>
    %414 = arith.mulf %409, %413 : vector<8x64xf32>
    %415 = vector.extract_strided_slice %395 {offsets = [0, 256], sizes = [8, 256], strides = [1, 1]} : vector<8x512xf32> to vector<8x256xf32>
    %cst_66 = arith.constant dense<0.000000e+00> : vector<8x256xf32>
    %416 = tpu.matmul %414, %1, %cst_66 {dimension_numbers = #tpu.dot_dimension_numbers<[1], [0], [0], [1], [0, 0, 1, 1], [], []>} : vector<8x64xf32>, vector<64x256xf32>, vector<8x256xf32> -> vector<8x256xf32>
    %c10 = arith.constant 10 : index
    %c0_67 = arith.constant 0 : index
    %c0_68 = arith.constant 0 : index
    %417 = vector.load %arg1[%c10, %c0_67, %c0_68] : memref<16x8x256xf32, #tpu.memory_space<vmem>>, vector<1x8x256xf32>
    %418 = vector.shape_cast %417 : vector<1x8x256xf32> to vector<8x256xf32>
    %419 = arith.addf %418, %415 : vector<8x256xf32>
    %420 = vector.extract_strided_slice %419 {offsets = [0, 0], sizes = [8, 192], strides = [1, 1]} : vector<8x256xf32> to vector<8x192xf32>
    %421 = arith.negf %420 : vector<8x192xf32>
    %422 = math.exp %421 : vector<8x192xf32>
    %cst_69 = arith.constant 1.000000e+00 : f32
    %423 = vector.broadcast %cst_69 : f32 to vector<8x192xf32>
    %424 = arith.addf %423, %422 : vector<8x192xf32>
    %425 = arith.divf %423, %424 : vector<8x192xf32>
    %426 = vector.extract_strided_slice %419 {offsets = [0, 192], sizes = [8, 64], strides = [1, 1]} : vector<8x256xf32> to vector<8x64xf32>
    %427 = math.tanh %426 : vector<8x64xf32>
    %428 = vector.extract_strided_slice %425 {offsets = [0, 0], sizes = [8, 64], strides = [1, 1]} : vector<8x192xf32> to vector<8x64xf32>
    %429 = vector.extract_strided_slice %425 {offsets = [0, 64], sizes = [8, 64], strides = [1, 1]} : vector<8x192xf32> to vector<8x64xf32>
    %430 = vector.extract_strided_slice %425 {offsets = [0, 128], sizes = [8, 64], strides = [1, 1]} : vector<8x192xf32> to vector<8x64xf32>
    %431 = arith.mulf %429, %392 : vector<8x64xf32>
    %432 = arith.mulf %428, %427 : vector<8x64xf32>
    %433 = arith.addf %431, %432 : vector<8x64xf32>
    %434 = math.tanh %433 : vector<8x64xf32>
    %435 = arith.mulf %430, %434 : vector<8x64xf32>
    %cst_70 = arith.constant dense<0.000000e+00> : vector<8x512xf32>
    %436 = tpu.matmul %435, %0, %cst_70 {dimension_numbers = #tpu.dot_dimension_numbers<[1], [0], [0], [1], [0, 0, 1, 1], [], []>} : vector<8x64xf32>, vector<64x512xf32>, vector<8x512xf32> -> vector<8x512xf32>
    %437 = vector.extract_strided_slice %436 {offsets = [0, 0], sizes = [8, 256], strides = [1, 1]} : vector<8x512xf32> to vector<8x256xf32>
    %438 = arith.addf %437, %4 : vector<8x256xf32>
    %439 = arith.addf %438, %416 : vector<8x256xf32>
    %440 = vector.extract_strided_slice %439 {offsets = [0, 0], sizes = [8, 192], strides = [1, 1]} : vector<8x256xf32> to vector<8x192xf32>
    %441 = arith.negf %440 : vector<8x192xf32>
    %442 = math.exp %441 : vector<8x192xf32>
    %cst_71 = arith.constant 1.000000e+00 : f32
    %443 = vector.broadcast %cst_71 : f32 to vector<8x192xf32>
    %444 = arith.addf %443, %442 : vector<8x192xf32>
    %445 = arith.divf %443, %444 : vector<8x192xf32>
    %446 = vector.extract_strided_slice %439 {offsets = [0, 192], sizes = [8, 64], strides = [1, 1]} : vector<8x256xf32> to vector<8x64xf32>
    %447 = math.tanh %446 : vector<8x64xf32>
    %448 = vector.extract_strided_slice %445 {offsets = [0, 0], sizes = [8, 64], strides = [1, 1]} : vector<8x192xf32> to vector<8x64xf32>
    %449 = vector.extract_strided_slice %445 {offsets = [0, 64], sizes = [8, 64], strides = [1, 1]} : vector<8x192xf32> to vector<8x64xf32>
    %450 = vector.extract_strided_slice %445 {offsets = [0, 128], sizes = [8, 64], strides = [1, 1]} : vector<8x192xf32> to vector<8x64xf32>
    %451 = arith.mulf %449, %412 : vector<8x64xf32>
    %452 = arith.mulf %448, %447 : vector<8x64xf32>
    %453 = arith.addf %451, %452 : vector<8x64xf32>
    %454 = math.tanh %453 : vector<8x64xf32>
    %455 = arith.mulf %450, %454 : vector<8x64xf32>
    %456 = vector.extract_strided_slice %436 {offsets = [0, 256], sizes = [8, 256], strides = [1, 1]} : vector<8x512xf32> to vector<8x256xf32>
    %cst_72 = arith.constant dense<0.000000e+00> : vector<8x256xf32>
    %457 = tpu.matmul %455, %1, %cst_72 {dimension_numbers = #tpu.dot_dimension_numbers<[1], [0], [0], [1], [0, 0, 1, 1], [], []>} : vector<8x64xf32>, vector<64x256xf32>, vector<8x256xf32> -> vector<8x256xf32>
    %c11 = arith.constant 11 : index
    %c0_73 = arith.constant 0 : index
    %c0_74 = arith.constant 0 : index
    %458 = vector.load %arg1[%c11, %c0_73, %c0_74] : memref<16x8x256xf32, #tpu.memory_space<vmem>>, vector<1x8x256xf32>
    %459 = vector.shape_cast %458 : vector<1x8x256xf32> to vector<8x256xf32>
    %460 = arith.addf %459, %456 : vector<8x256xf32>
    %461 = vector.extract_strided_slice %460 {offsets = [0, 0], sizes = [8, 192], strides = [1, 1]} : vector<8x256xf32> to vector<8x192xf32>
    %462 = arith.negf %461 : vector<8x192xf32>
    %463 = math.exp %462 : vector<8x192xf32>
    %cst_75 = arith.constant 1.000000e+00 : f32
    %464 = vector.broadcast %cst_75 : f32 to vector<8x192xf32>
    %465 = arith.addf %464, %463 : vector<8x192xf32>
    %466 = arith.divf %464, %465 : vector<8x192xf32>
    %467 = vector.extract_strided_slice %460 {offsets = [0, 192], sizes = [8, 64], strides = [1, 1]} : vector<8x256xf32> to vector<8x64xf32>
    %468 = math.tanh %467 : vector<8x64xf32>
    %469 = vector.extract_strided_slice %466 {offsets = [0, 0], sizes = [8, 64], strides = [1, 1]} : vector<8x192xf32> to vector<8x64xf32>
    %470 = vector.extract_strided_slice %466 {offsets = [0, 64], sizes = [8, 64], strides = [1, 1]} : vector<8x192xf32> to vector<8x64xf32>
    %471 = vector.extract_strided_slice %466 {offsets = [0, 128], sizes = [8, 64], strides = [1, 1]} : vector<8x192xf32> to vector<8x64xf32>
    %472 = arith.mulf %470, %433 : vector<8x64xf32>
    %473 = arith.mulf %469, %468 : vector<8x64xf32>
    %474 = arith.addf %472, %473 : vector<8x64xf32>
    %475 = math.tanh %474 : vector<8x64xf32>
    %476 = arith.mulf %471, %475 : vector<8x64xf32>
    %cst_76 = arith.constant dense<0.000000e+00> : vector<8x512xf32>
    %477 = tpu.matmul %476, %0, %cst_76 {dimension_numbers = #tpu.dot_dimension_numbers<[1], [0], [0], [1], [0, 0, 1, 1], [], []>} : vector<8x64xf32>, vector<64x512xf32>, vector<8x512xf32> -> vector<8x512xf32>
    %478 = vector.extract_strided_slice %477 {offsets = [0, 0], sizes = [8, 256], strides = [1, 1]} : vector<8x512xf32> to vector<8x256xf32>
    %479 = arith.addf %478, %4 : vector<8x256xf32>
    %480 = arith.addf %479, %457 : vector<8x256xf32>
    %481 = vector.extract_strided_slice %480 {offsets = [0, 0], sizes = [8, 192], strides = [1, 1]} : vector<8x256xf32> to vector<8x192xf32>
    %482 = arith.negf %481 : vector<8x192xf32>
    %483 = math.exp %482 : vector<8x192xf32>
    %cst_77 = arith.constant 1.000000e+00 : f32
    %484 = vector.broadcast %cst_77 : f32 to vector<8x192xf32>
    %485 = arith.addf %484, %483 : vector<8x192xf32>
    %486 = arith.divf %484, %485 : vector<8x192xf32>
    %487 = vector.extract_strided_slice %480 {offsets = [0, 192], sizes = [8, 64], strides = [1, 1]} : vector<8x256xf32> to vector<8x64xf32>
    %488 = math.tanh %487 : vector<8x64xf32>
    %489 = vector.extract_strided_slice %486 {offsets = [0, 0], sizes = [8, 64], strides = [1, 1]} : vector<8x192xf32> to vector<8x64xf32>
    %490 = vector.extract_strided_slice %486 {offsets = [0, 64], sizes = [8, 64], strides = [1, 1]} : vector<8x192xf32> to vector<8x64xf32>
    %491 = vector.extract_strided_slice %486 {offsets = [0, 128], sizes = [8, 64], strides = [1, 1]} : vector<8x192xf32> to vector<8x64xf32>
    %492 = arith.mulf %490, %453 : vector<8x64xf32>
    %493 = arith.mulf %489, %488 : vector<8x64xf32>
    %494 = arith.addf %492, %493 : vector<8x64xf32>
    %495 = math.tanh %494 : vector<8x64xf32>
    %496 = arith.mulf %491, %495 : vector<8x64xf32>
    %497 = vector.extract_strided_slice %477 {offsets = [0, 256], sizes = [8, 256], strides = [1, 1]} : vector<8x512xf32> to vector<8x256xf32>
    %cst_78 = arith.constant dense<0.000000e+00> : vector<8x256xf32>
    %498 = tpu.matmul %496, %1, %cst_78 {dimension_numbers = #tpu.dot_dimension_numbers<[1], [0], [0], [1], [0, 0, 1, 1], [], []>} : vector<8x64xf32>, vector<64x256xf32>, vector<8x256xf32> -> vector<8x256xf32>
    %c12 = arith.constant 12 : index
    %c0_79 = arith.constant 0 : index
    %c0_80 = arith.constant 0 : index
    %499 = vector.load %arg1[%c12, %c0_79, %c0_80] : memref<16x8x256xf32, #tpu.memory_space<vmem>>, vector<1x8x256xf32>
    %500 = vector.shape_cast %499 : vector<1x8x256xf32> to vector<8x256xf32>
    %501 = arith.addf %500, %497 : vector<8x256xf32>
    %502 = vector.extract_strided_slice %501 {offsets = [0, 0], sizes = [8, 192], strides = [1, 1]} : vector<8x256xf32> to vector<8x192xf32>
    %503 = arith.negf %502 : vector<8x192xf32>
    %504 = math.exp %503 : vector<8x192xf32>
    %cst_81 = arith.constant 1.000000e+00 : f32
    %505 = vector.broadcast %cst_81 : f32 to vector<8x192xf32>
    %506 = arith.addf %505, %504 : vector<8x192xf32>
    %507 = arith.divf %505, %506 : vector<8x192xf32>
    %508 = vector.extract_strided_slice %501 {offsets = [0, 192], sizes = [8, 64], strides = [1, 1]} : vector<8x256xf32> to vector<8x64xf32>
    %509 = math.tanh %508 : vector<8x64xf32>
    %510 = vector.extract_strided_slice %507 {offsets = [0, 0], sizes = [8, 64], strides = [1, 1]} : vector<8x192xf32> to vector<8x64xf32>
    %511 = vector.extract_strided_slice %507 {offsets = [0, 64], sizes = [8, 64], strides = [1, 1]} : vector<8x192xf32> to vector<8x64xf32>
    %512 = vector.extract_strided_slice %507 {offsets = [0, 128], sizes = [8, 64], strides = [1, 1]} : vector<8x192xf32> to vector<8x64xf32>
    %513 = arith.mulf %511, %474 : vector<8x64xf32>
    %514 = arith.mulf %510, %509 : vector<8x64xf32>
    %515 = arith.addf %513, %514 : vector<8x64xf32>
    %516 = math.tanh %515 : vector<8x64xf32>
    %517 = arith.mulf %512, %516 : vector<8x64xf32>
    %cst_82 = arith.constant dense<0.000000e+00> : vector<8x512xf32>
    %518 = tpu.matmul %517, %0, %cst_82 {dimension_numbers = #tpu.dot_dimension_numbers<[1], [0], [0], [1], [0, 0, 1, 1], [], []>} : vector<8x64xf32>, vector<64x512xf32>, vector<8x512xf32> -> vector<8x512xf32>
    %519 = vector.extract_strided_slice %518 {offsets = [0, 0], sizes = [8, 256], strides = [1, 1]} : vector<8x512xf32> to vector<8x256xf32>
    %520 = arith.addf %519, %4 : vector<8x256xf32>
    %521 = arith.addf %520, %498 : vector<8x256xf32>
    %522 = vector.extract_strided_slice %521 {offsets = [0, 0], sizes = [8, 192], strides = [1, 1]} : vector<8x256xf32> to vector<8x192xf32>
    %523 = arith.negf %522 : vector<8x192xf32>
    %524 = math.exp %523 : vector<8x192xf32>
    %cst_83 = arith.constant 1.000000e+00 : f32
    %525 = vector.broadcast %cst_83 : f32 to vector<8x192xf32>
    %526 = arith.addf %525, %524 : vector<8x192xf32>
    %527 = arith.divf %525, %526 : vector<8x192xf32>
    %528 = vector.extract_strided_slice %521 {offsets = [0, 192], sizes = [8, 64], strides = [1, 1]} : vector<8x256xf32> to vector<8x64xf32>
    %529 = math.tanh %528 : vector<8x64xf32>
    %530 = vector.extract_strided_slice %527 {offsets = [0, 0], sizes = [8, 64], strides = [1, 1]} : vector<8x192xf32> to vector<8x64xf32>
    %531 = vector.extract_strided_slice %527 {offsets = [0, 64], sizes = [8, 64], strides = [1, 1]} : vector<8x192xf32> to vector<8x64xf32>
    %532 = vector.extract_strided_slice %527 {offsets = [0, 128], sizes = [8, 64], strides = [1, 1]} : vector<8x192xf32> to vector<8x64xf32>
    %533 = arith.mulf %531, %494 : vector<8x64xf32>
    %534 = arith.mulf %530, %529 : vector<8x64xf32>
    %535 = arith.addf %533, %534 : vector<8x64xf32>
    %536 = math.tanh %535 : vector<8x64xf32>
    %537 = arith.mulf %532, %536 : vector<8x64xf32>
    %538 = vector.extract_strided_slice %518 {offsets = [0, 256], sizes = [8, 256], strides = [1, 1]} : vector<8x512xf32> to vector<8x256xf32>
    %cst_84 = arith.constant dense<0.000000e+00> : vector<8x256xf32>
    %539 = tpu.matmul %537, %1, %cst_84 {dimension_numbers = #tpu.dot_dimension_numbers<[1], [0], [0], [1], [0, 0, 1, 1], [], []>} : vector<8x64xf32>, vector<64x256xf32>, vector<8x256xf32> -> vector<8x256xf32>
    %c13 = arith.constant 13 : index
    %c0_85 = arith.constant 0 : index
    %c0_86 = arith.constant 0 : index
    %540 = vector.load %arg1[%c13, %c0_85, %c0_86] : memref<16x8x256xf32, #tpu.memory_space<vmem>>, vector<1x8x256xf32>
    %541 = vector.shape_cast %540 : vector<1x8x256xf32> to vector<8x256xf32>
    %542 = arith.addf %541, %538 : vector<8x256xf32>
    %543 = vector.extract_strided_slice %542 {offsets = [0, 0], sizes = [8, 192], strides = [1, 1]} : vector<8x256xf32> to vector<8x192xf32>
    %544 = arith.negf %543 : vector<8x192xf32>
    %545 = math.exp %544 : vector<8x192xf32>
    %cst_87 = arith.constant 1.000000e+00 : f32
    %546 = vector.broadcast %cst_87 : f32 to vector<8x192xf32>
    %547 = arith.addf %546, %545 : vector<8x192xf32>
    %548 = arith.divf %546, %547 : vector<8x192xf32>
    %549 = vector.extract_strided_slice %542 {offsets = [0, 192], sizes = [8, 64], strides = [1, 1]} : vector<8x256xf32> to vector<8x64xf32>
    %550 = math.tanh %549 : vector<8x64xf32>
    %551 = vector.extract_strided_slice %548 {offsets = [0, 0], sizes = [8, 64], strides = [1, 1]} : vector<8x192xf32> to vector<8x64xf32>
    %552 = vector.extract_strided_slice %548 {offsets = [0, 64], sizes = [8, 64], strides = [1, 1]} : vector<8x192xf32> to vector<8x64xf32>
    %553 = vector.extract_strided_slice %548 {offsets = [0, 128], sizes = [8, 64], strides = [1, 1]} : vector<8x192xf32> to vector<8x64xf32>
    %554 = arith.mulf %552, %515 : vector<8x64xf32>
    %555 = arith.mulf %551, %550 : vector<8x64xf32>
    %556 = arith.addf %554, %555 : vector<8x64xf32>
    %557 = math.tanh %556 : vector<8x64xf32>
    %558 = arith.mulf %553, %557 : vector<8x64xf32>
    %cst_88 = arith.constant dense<0.000000e+00> : vector<8x512xf32>
    %559 = tpu.matmul %558, %0, %cst_88 {dimension_numbers = #tpu.dot_dimension_numbers<[1], [0], [0], [1], [0, 0, 1, 1], [], []>} : vector<8x64xf32>, vector<64x512xf32>, vector<8x512xf32> -> vector<8x512xf32>
    %560 = vector.extract_strided_slice %559 {offsets = [0, 0], sizes = [8, 256], strides = [1, 1]} : vector<8x512xf32> to vector<8x256xf32>
    %561 = arith.addf %560, %4 : vector<8x256xf32>
    %562 = arith.addf %561, %539 : vector<8x256xf32>
    %563 = vector.extract_strided_slice %562 {offsets = [0, 0], sizes = [8, 192], strides = [1, 1]} : vector<8x256xf32> to vector<8x192xf32>
    %564 = arith.negf %563 : vector<8x192xf32>
    %565 = math.exp %564 : vector<8x192xf32>
    %cst_89 = arith.constant 1.000000e+00 : f32
    %566 = vector.broadcast %cst_89 : f32 to vector<8x192xf32>
    %567 = arith.addf %566, %565 : vector<8x192xf32>
    %568 = arith.divf %566, %567 : vector<8x192xf32>
    %569 = vector.extract_strided_slice %562 {offsets = [0, 192], sizes = [8, 64], strides = [1, 1]} : vector<8x256xf32> to vector<8x64xf32>
    %570 = math.tanh %569 : vector<8x64xf32>
    %571 = vector.extract_strided_slice %568 {offsets = [0, 0], sizes = [8, 64], strides = [1, 1]} : vector<8x192xf32> to vector<8x64xf32>
    %572 = vector.extract_strided_slice %568 {offsets = [0, 64], sizes = [8, 64], strides = [1, 1]} : vector<8x192xf32> to vector<8x64xf32>
    %573 = vector.extract_strided_slice %568 {offsets = [0, 128], sizes = [8, 64], strides = [1, 1]} : vector<8x192xf32> to vector<8x64xf32>
    %574 = arith.mulf %572, %535 : vector<8x64xf32>
    %575 = arith.mulf %571, %570 : vector<8x64xf32>
    %576 = arith.addf %574, %575 : vector<8x64xf32>
    %577 = math.tanh %576 : vector<8x64xf32>
    %578 = arith.mulf %573, %577 : vector<8x64xf32>
    %579 = vector.extract_strided_slice %559 {offsets = [0, 256], sizes = [8, 256], strides = [1, 1]} : vector<8x512xf32> to vector<8x256xf32>
    %cst_90 = arith.constant dense<0.000000e+00> : vector<8x256xf32>
    %580 = tpu.matmul %578, %1, %cst_90 {dimension_numbers = #tpu.dot_dimension_numbers<[1], [0], [0], [1], [0, 0, 1, 1], [], []>} : vector<8x64xf32>, vector<64x256xf32>, vector<8x256xf32> -> vector<8x256xf32>
    %c14 = arith.constant 14 : index
    %c0_91 = arith.constant 0 : index
    %c0_92 = arith.constant 0 : index
    %581 = vector.load %arg1[%c14, %c0_91, %c0_92] : memref<16x8x256xf32, #tpu.memory_space<vmem>>, vector<1x8x256xf32>
    %582 = vector.shape_cast %581 : vector<1x8x256xf32> to vector<8x256xf32>
    %583 = arith.addf %582, %579 : vector<8x256xf32>
    %584 = vector.extract_strided_slice %583 {offsets = [0, 0], sizes = [8, 192], strides = [1, 1]} : vector<8x256xf32> to vector<8x192xf32>
    %585 = arith.negf %584 : vector<8x192xf32>
    %586 = math.exp %585 : vector<8x192xf32>
    %cst_93 = arith.constant 1.000000e+00 : f32
    %587 = vector.broadcast %cst_93 : f32 to vector<8x192xf32>
    %588 = arith.addf %587, %586 : vector<8x192xf32>
    %589 = arith.divf %587, %588 : vector<8x192xf32>
    %590 = vector.extract_strided_slice %583 {offsets = [0, 192], sizes = [8, 64], strides = [1, 1]} : vector<8x256xf32> to vector<8x64xf32>
    %591 = math.tanh %590 : vector<8x64xf32>
    %592 = vector.extract_strided_slice %589 {offsets = [0, 0], sizes = [8, 64], strides = [1, 1]} : vector<8x192xf32> to vector<8x64xf32>
    %593 = vector.extract_strided_slice %589 {offsets = [0, 64], sizes = [8, 64], strides = [1, 1]} : vector<8x192xf32> to vector<8x64xf32>
    %594 = vector.extract_strided_slice %589 {offsets = [0, 128], sizes = [8, 64], strides = [1, 1]} : vector<8x192xf32> to vector<8x64xf32>
    %595 = arith.mulf %593, %556 : vector<8x64xf32>
    %596 = arith.mulf %592, %591 : vector<8x64xf32>
    %597 = arith.addf %595, %596 : vector<8x64xf32>
    %598 = math.tanh %597 : vector<8x64xf32>
    %599 = arith.mulf %594, %598 : vector<8x64xf32>
    %cst_94 = arith.constant dense<0.000000e+00> : vector<8x512xf32>
    %600 = tpu.matmul %599, %0, %cst_94 {dimension_numbers = #tpu.dot_dimension_numbers<[1], [0], [0], [1], [0, 0, 1, 1], [], []>} : vector<8x64xf32>, vector<64x512xf32>, vector<8x512xf32> -> vector<8x512xf32>
    %601 = vector.extract_strided_slice %600 {offsets = [0, 0], sizes = [8, 256], strides = [1, 1]} : vector<8x512xf32> to vector<8x256xf32>
    %602 = arith.addf %601, %4 : vector<8x256xf32>
    %603 = arith.addf %602, %580 : vector<8x256xf32>
    %604 = vector.extract_strided_slice %603 {offsets = [0, 0], sizes = [8, 192], strides = [1, 1]} : vector<8x256xf32> to vector<8x192xf32>
    %605 = arith.negf %604 : vector<8x192xf32>
    %606 = math.exp %605 : vector<8x192xf32>
    %cst_95 = arith.constant 1.000000e+00 : f32
    %607 = vector.broadcast %cst_95 : f32 to vector<8x192xf32>
    %608 = arith.addf %607, %606 : vector<8x192xf32>
    %609 = arith.divf %607, %608 : vector<8x192xf32>
    %610 = vector.extract_strided_slice %603 {offsets = [0, 192], sizes = [8, 64], strides = [1, 1]} : vector<8x256xf32> to vector<8x64xf32>
    %611 = math.tanh %610 : vector<8x64xf32>
    %612 = vector.extract_strided_slice %609 {offsets = [0, 0], sizes = [8, 64], strides = [1, 1]} : vector<8x192xf32> to vector<8x64xf32>
    %613 = vector.extract_strided_slice %609 {offsets = [0, 64], sizes = [8, 64], strides = [1, 1]} : vector<8x192xf32> to vector<8x64xf32>
    %614 = vector.extract_strided_slice %609 {offsets = [0, 128], sizes = [8, 64], strides = [1, 1]} : vector<8x192xf32> to vector<8x64xf32>
    %615 = arith.mulf %613, %576 : vector<8x64xf32>
    %616 = arith.mulf %612, %611 : vector<8x64xf32>
    %617 = arith.addf %615, %616 : vector<8x64xf32>
    %618 = math.tanh %617 : vector<8x64xf32>
    %619 = arith.mulf %614, %618 : vector<8x64xf32>
    %620 = vector.extract_strided_slice %600 {offsets = [0, 256], sizes = [8, 256], strides = [1, 1]} : vector<8x512xf32> to vector<8x256xf32>
    %cst_96 = arith.constant dense<0.000000e+00> : vector<8x256xf32>
    %621 = tpu.matmul %619, %1, %cst_96 {dimension_numbers = #tpu.dot_dimension_numbers<[1], [0], [0], [1], [0, 0, 1, 1], [], []>} : vector<8x64xf32>, vector<64x256xf32>, vector<8x256xf32> -> vector<8x256xf32>
    %c15 = arith.constant 15 : index
    %c0_97 = arith.constant 0 : index
    %c0_98 = arith.constant 0 : index
    %622 = vector.load %arg1[%c15, %c0_97, %c0_98] : memref<16x8x256xf32, #tpu.memory_space<vmem>>, vector<1x8x256xf32>
    %623 = vector.shape_cast %622 : vector<1x8x256xf32> to vector<8x256xf32>
    %624 = arith.addf %623, %620 : vector<8x256xf32>
    %625 = vector.extract_strided_slice %624 {offsets = [0, 0], sizes = [8, 192], strides = [1, 1]} : vector<8x256xf32> to vector<8x192xf32>
    %626 = arith.negf %625 : vector<8x192xf32>
    %627 = math.exp %626 : vector<8x192xf32>
    %cst_99 = arith.constant 1.000000e+00 : f32
    %628 = vector.broadcast %cst_99 : f32 to vector<8x192xf32>
    %629 = arith.addf %628, %627 : vector<8x192xf32>
    %630 = arith.divf %628, %629 : vector<8x192xf32>
    %631 = vector.extract_strided_slice %624 {offsets = [0, 192], sizes = [8, 64], strides = [1, 1]} : vector<8x256xf32> to vector<8x64xf32>
    %632 = math.tanh %631 : vector<8x64xf32>
    %633 = vector.extract_strided_slice %630 {offsets = [0, 0], sizes = [8, 64], strides = [1, 1]} : vector<8x192xf32> to vector<8x64xf32>
    %634 = vector.extract_strided_slice %630 {offsets = [0, 64], sizes = [8, 64], strides = [1, 1]} : vector<8x192xf32> to vector<8x64xf32>
    %635 = vector.extract_strided_slice %630 {offsets = [0, 128], sizes = [8, 64], strides = [1, 1]} : vector<8x192xf32> to vector<8x64xf32>
    %636 = arith.mulf %634, %597 : vector<8x64xf32>
    %637 = arith.mulf %633, %632 : vector<8x64xf32>
    %638 = arith.addf %636, %637 : vector<8x64xf32>
    %639 = math.tanh %638 : vector<8x64xf32>
    %640 = arith.mulf %635, %639 : vector<8x64xf32>
    %cst_100 = arith.constant dense<0.000000e+00> : vector<8x512xf32>
    %641 = tpu.matmul %640, %0, %cst_100 {dimension_numbers = #tpu.dot_dimension_numbers<[1], [0], [0], [1], [0, 0, 1, 1], [], []>} : vector<8x64xf32>, vector<64x512xf32>, vector<8x512xf32> -> vector<8x512xf32>
    %642 = vector.extract_strided_slice %641 {offsets = [0, 0], sizes = [8, 256], strides = [1, 1]} : vector<8x512xf32> to vector<8x256xf32>
    %643 = arith.addf %642, %4 : vector<8x256xf32>
    %644 = arith.addf %643, %621 : vector<8x256xf32>
    %645 = vector.extract_strided_slice %644 {offsets = [0, 0], sizes = [8, 192], strides = [1, 1]} : vector<8x256xf32> to vector<8x192xf32>
    %646 = arith.negf %645 : vector<8x192xf32>
    %647 = math.exp %646 : vector<8x192xf32>
    %cst_101 = arith.constant 1.000000e+00 : f32
    %648 = vector.broadcast %cst_101 : f32 to vector<8x192xf32>
    %649 = arith.addf %648, %647 : vector<8x192xf32>
    %650 = arith.divf %648, %649 : vector<8x192xf32>
    %651 = vector.extract_strided_slice %644 {offsets = [0, 192], sizes = [8, 64], strides = [1, 1]} : vector<8x256xf32> to vector<8x64xf32>
    %652 = math.tanh %651 : vector<8x64xf32>
    %653 = vector.extract_strided_slice %650 {offsets = [0, 0], sizes = [8, 64], strides = [1, 1]} : vector<8x192xf32> to vector<8x64xf32>
    %654 = vector.extract_strided_slice %650 {offsets = [0, 64], sizes = [8, 64], strides = [1, 1]} : vector<8x192xf32> to vector<8x64xf32>
    %655 = vector.extract_strided_slice %650 {offsets = [0, 128], sizes = [8, 64], strides = [1, 1]} : vector<8x192xf32> to vector<8x64xf32>
    %656 = arith.mulf %654, %617 : vector<8x64xf32>
    %657 = arith.mulf %653, %652 : vector<8x64xf32>
    %658 = arith.addf %656, %657 : vector<8x64xf32>
    %659 = math.tanh %658 : vector<8x64xf32>
    %660 = arith.mulf %655, %659 : vector<8x64xf32>
    %c0_102 = arith.constant 0 : index
    %c0_103 = arith.constant 0 : index
    %661 = vector.load %arg5[%c0_102, %c0_103] : memref<64x32xf32, #tpu.memory_space<vmem>>, vector<64x32xf32>
    %cst_104 = arith.constant dense<0.000000e+00> : vector<8x32xf32>
    %662 = tpu.matmul %660, %661, %cst_104 {dimension_numbers = #tpu.dot_dimension_numbers<[1], [0], [0], [1], [0, 0, 1, 1], [], []>} : vector<8x64xf32>, vector<64x32xf32>, vector<8x32xf32> -> vector<8x32xf32>
    %c0_105 = arith.constant 0 : index
    %c0_106 = arith.constant 0 : index
    %663 = vector.load %arg6[%c0_105, %c0_106] : memref<1x32xf32, #tpu.memory_space<vmem>>, vector<1x32xf32>
    %664 = vector.broadcast %663 : vector<1x32xf32> to vector<8x32xf32>
    %665 = arith.addf %662, %664 : vector<8x32xf32>
    %cst_107 = arith.constant 0.000000e+00 : f32
    %666 = vector.broadcast %cst_107 : f32 to vector<8x32xf32>
    %667 = arith.cmpf oge, %665, %666 : vector<8x32xf32>
    %cst_108 = arith.constant 2.000000e-01 : f32
    %668 = vector.broadcast %cst_108 : f32 to vector<8x32xf32>
    %669 = arith.mulf %668, %665 : vector<8x32xf32>
    %670 = arith.select %667, %665, %669 : vector<8x32xi1>, vector<8x32xf32>
    %c0_109 = arith.constant 0 : index
    %c0_110 = arith.constant 0 : index
    %671 = vector.load %arg7[%c0_109, %c0_110] : memref<32x1xf32, #tpu.memory_space<vmem>>, vector<32x1xf32>
    %cst_111 = arith.constant dense<0.000000e+00> : vector<8x1xf32>
    %672 = tpu.matmul %670, %671, %cst_111 {dimension_numbers = #tpu.dot_dimension_numbers<[1], [0], [0], [1], [0, 0, 1, 1], [], []>} : vector<8x32xf32>, vector<32x1xf32>, vector<8x1xf32> -> vector<8x1xf32>
    %c0_112 = arith.constant 0 : index
    %c0_113 = arith.constant 0 : index
    %673 = vector.load %arg8[%c0_112, %c0_113] : memref<1x1xf32, #tpu.memory_space<vmem>>, vector<1x1xf32>
    %674 = vector.broadcast %673 : vector<1x1xf32> to vector<8x1xf32>
    %675 = arith.addf %672, %674 : vector<8x1xf32>
    %676 = arith.negf %675 : vector<8x1xf32>
    %677 = math.exp %676 : vector<8x1xf32>
    %cst_114 = arith.constant 1.000000e+00 : f32
    %678 = vector.broadcast %cst_114 : f32 to vector<8x1xf32>
    %679 = arith.addf %678, %677 : vector<8x1xf32>
    %680 = arith.divf %678, %679 : vector<8x1xf32>
    %c0_115 = arith.constant 0 : index
    %c0_116 = arith.constant 0 : index
    %681 = vector.load %arg9[%c0_115, %c0_116] : memref<8x1xf32, #tpu.memory_space<vmem>>, vector<8x1xf32>
    tpu.vector_store %arg9[%c0_115, %c0_116], %680 {strides = array<i32>} : memref<8x1xf32, #tpu.memory_space<vmem>>, vector<8x1xf32>,
    return
  }
  func.func @transform_0(%arg0: i32) -> (i32, i32, i32) {
    %c0_i32 = arith.constant 0 : i32
    %c0_i32_0 = arith.constant 0 : i32
    %c0_i32_1 = arith.constant 0 : i32
    return %c0_i32, %arg0, %c0_i32_0 : i32, i32, i32
  }
  func.func @transform_1(%arg0: i32) -> (i32, i32) {
    %c0_i32 = arith.constant 0 : i32
    %c0_i32_0 = arith.constant 0 : i32
    %c0_i32_1 = arith.constant 0 : i32
    return %c0_i32, %c0_i32_0 : i32, i32
  }
  func.func @transform_2(%arg0: i32) -> (i32, i32) {
    %c0_i32 = arith.constant 0 : i32
    %c0_i32_0 = arith.constant 0 : i32
    %c0_i32_1 = arith.constant 0 : i32
    return %c0_i32, %c0_i32_0 : i32, i32
  }
  func.func @transform_3(%arg0: i32) -> (i32, i32) {
    %c0_i32 = arith.constant 0 : i32
    %c0_i32_0 = arith.constant 0 : i32
    %c0_i32_1 = arith.constant 0 : i32
    return %c0_i32, %c0_i32_0 : i32, i32
  }
  func.func @transform_4(%arg0: i32) -> (i32, i32) {
    %c0_i32 = arith.constant 0 : i32
    %c0_i32_0 = arith.constant 0 : i32
    %c0_i32_1 = arith.constant 0 : i32
    return %c0_i32, %c0_i32_0 : i32, i32
  }
  func.func @transform_5(%arg0: i32) -> (i32, i32) {
    %c0_i32 = arith.constant 0 : i32
    %c0_i32_0 = arith.constant 0 : i32
    %c0_i32_1 = arith.constant 0 : i32
    return %c0_i32, %c0_i32_0 : i32, i32
  }
  func.func @transform_6(%arg0: i32) -> (i32, i32) {
    %c0_i32 = arith.constant 0 : i32
    %c0_i32_0 = arith.constant 0 : i32
    %c0_i32_1 = arith.constant 0 : i32
    return %c0_i32, %c0_i32_0 : i32, i32
  }
  func.func @transform_7(%arg0: i32) -> (i32, i32) {
    %c0_i32 = arith.constant 0 : i32
    %c0_i32_0 = arith.constant 0 : i32
    %c0_i32_1 = arith.constant 0 : i32
    return %c0_i32, %c0_i32_0 : i32, i32
  }
  func.func @transform_8(%arg0: i32) -> (i32, i32) {
    %c0_i32 = arith.constant 0 : i32
    %c0_i32_0 = arith.constant 0 : i32
    return %arg0, %c0_i32 : i32, i32
  }
}

</mosaic_0001>

<bundles_post_ra>
// kernel: tpu_custom_call.1
= control target key start
LH: loop header
LB: loop body
LE: loop exit
PB: predicated region body
PF: predicated region fallthrough
CT: control target
= control target key end

     0   :  { %s7139_s0 = inlined_call_operand.hbm [shape: f32[16,8,256], index: 0, kind: input, shape index: {}]   ;;  %s7140_s1 = inlined_call_operand.hbm [shape: f32[64,512], index: 1, kind: input, shape index: {}]   ;;  %s7141_s2 = inlined_call_operand.vmem [shape: f32[64,256], index: 2, kind: input, shape index: {}]   ;;  %s7142_s3 = inlined_call_operand.vmem [shape: f32[1,256], index: 3, kind: input, shape index: {}]   ;;  %s7143_s4 = inlined_call_operand.vmem [shape: f32[64,32], index: 4, kind: input, shape index: {}]   ;;  %s7144_s5 = inlined_call_operand.vmem [shape: f32[1,32], index: 5, kind: input, shape index: {}]   ;;  %s7145_s6 = inlined_call_operand.vmem [shape: f32[32,1], index: 6, kind: input, shape index: {}]   ;;  %s7146_s7 = inlined_call_operand.<no memory space> [shape: f32[1,1], index: 7, kind: input, shape index: {}]   ;;  %s7147_s8 = inlined_call_operand.vmem [shape: f32[8,1], index: 8, kind: output, shape index: {}]  }
   0x1   :  { %v13_v0 = vstv %s7146_s7 }
   0x2   :  { %14 = vst [vmem:[#allocation2] sm:$0x1] %v13_v0 }
   0x3   :  { %15 = vsyncpa [#allocation4], 0 }
   0x4   :  { %16 = vsyncpa [#allocation6], 0  ;;  %s6191_s29 = smov [#allocation3]   ;;  %s6143_s11 = scalar_lea.hbm %s7139_s0, 4096 }
   0x5   :  { %s22_s30 = sshll.u32 %s6191_s29, 4  ;;  %p6144_p0 = scmp.ne.s32.totalorder %s7139_s0, %s6143_s11  ;;  %s23_s30 = int_to_ptr.vmem [resolvable:$true] %s22_s30 }
   0x6   :  { %p6147_p1 = scmp.lt.u32.totalorder %s6143_s11, %s7139_s0 }
   0x8   :  { %p6149_p2 = pnand %p6147_p1, %p6144_p0 }
   0xa   :  { %6152 = shalt.err (!%p6149_p2)
}
   0xb   :  { %s6153_s7 = scalar_lea.vmem %s23_s30, 4096  ;;  %p6158_p4 = scmp.lt.s32.totalorder %s23_s30, %s23_s30 }
   0xc   :  { %p6154_p3 = scmp.ne.s32.totalorder %s23_s30, %s6153_s7  ;;  %p6159_p5 = scmp.lt.s32.totalorder %s6153_s7, %s6153_s7 }
   0xe   :  { %p6160_p6 = por %p6159_p5, %p6158_p4 }
  0x10   :  { %p6161_p7 = pnand %p6160_p6, %p6154_p3 }
  0x12   :  { %6164 = shalt.err (!%p6161_p7)
}
  0x13   :  { %s6192_s16 = smov 256   ;;  %s6193_s17 = smov 16  }
  0x14   :  { %28 = dma.hbm_to_vmem [thread:$0]  %s7139_s0, 4096, %s23_s30, [#allocation4], %s6192_s16, %s6192_s16, %s6193_s17  }
  0x15   :  { %s6194_s20 = smov [#allocation5]   ;;  %s6165_s24 = scalar_lea.hbm %s7140_s1, 4096 }
  0x16   :  { %s34_s21 = sshll.u32 %s6194_s20, 4  ;;  %p6166_p8 = scmp.ne.s32.totalorder %s7140_s1, %s6165_s24  ;;  %s35_s21 = int_to_ptr.vmem [resolvable:$true] %s34_s21 }
  0x17   :  { %p6169_p9 = scmp.lt.u32.totalorder %s6165_s24, %s7140_s1 }
  0x19   :  { %p6171_p10 = pnand %p6169_p9, %p6166_p8 }
  0x1b   :  { %6174 = shalt.err (!%p6171_p10)
}
  0x1c   :  { %s6175_s29 = scalar_lea.vmem %s35_s21, 4096  ;;  %p6180_p12 = scmp.lt.s32.totalorder %s35_s21, %s35_s21 }
  0x1d   :  { %p6176_p11 = scmp.ne.s32.totalorder %s35_s21, %s6175_s29  ;;  %p6181_p13 = scmp.lt.s32.totalorder %s6175_s29, %s6175_s29 }
  0x1f   :  { %p6182_p0 = por %p6181_p13, %p6180_p12 }
  0x21   :  { %p6183_p1 = pnand %p6182_p0, %p6176_p11 }
  0x23   :  { %6186 = shalt.err (!%p6183_p1)
}
  0x24   :  { %s6195_s0 = smov 512   ;;  %s6196_s30 = smov 32  }
  0x25   :  { %40 = dma.hbm_to_vmem [thread:$0]  %s7140_s1, 4096, %s35_s21, [#allocation6], %s6195_s0, %s6195_s0, %s6196_s30  }
  0x26   :  { %6187 = dma.done.wait [#allocation4], 4096  }
  0x27   :  { %6188 = vsyncadd [#allocation4], 4294963200 }
  0x28   :  { %6189 = dma.done.wait [#allocation6], 4096  }
  0x29   :  { %6190 = vsyncadd [#allocation6], 4294963200  ;;  %v6273_v1 = vld [vmem:[#allocation3 + $0x8] sm:$0xff]  ;;  %s6197_s11 = smov 64   ;;  %v119_v3 = vld [vmem:[#allocation3] sm:$0xff]  ;;  %v6198_v61 = vmov 0.0  }
  0x2a   :  { %5755 = vtanh.f32 %v6273_v1  ;;  %v4772_v4 = vmul.f32 -1.442695, %v119_v3  ;;  %v60_v10 = vld [vmem:[#allocation5 + $0x8] sm:$0xff]  ;;  %v62_v12 = vld [vmem:[#allocation5 + $0x18] sm:$0xff]  ;;  %v59_v15 = vld [vmem:[#allocation5] sm:$0xff]  ;;  %221 = vmatprep.mubr.f32.mxu0 %v6198_v61  ;;  %292 = vmatprep.mubr.f32.mxu1 %v6198_v61  ;;  %vm153_vm0 = vcmask 523264  }
  0x2b   :  { %v64_v11 = vld [vmem:[#allocation5 + $0x28] sm:$0xff]  ;;  %v66_v14 = vld [vmem:[#allocation5 + $0x38] sm:$0xff]  ;;  %v63_v16 = vld [vmem:[#allocation5 + $0x20] sm:$0xff]  ;;  %v4773_v63 = vmul.f32 -1.442695, %v6273_v1  ;;  %v109_v1 = vlaneseq  ;;  %vm6200_vm1 = vmmov 0  }
  0x2c   :  { %5757 = vpow2.f32 %v4772_v4  ;;  %v6278_v13 = vpack.c.bf16 %v64_v11, %v60_v10  ;;  %v6280_v17 = vpack.c.bf16 %v66_v14, %v62_v12  ;;  %v6282_v18 = vpack.c.bf16 %v63_v16, %v59_v15  ;;  %v61_v19 = vld [vmem:[#allocation5 + $0x10] sm:$0xff]  ;;  %v68_v21 = vld [vmem:[#allocation5 + $0x48] sm:$0xff]  ;;  %v70_v24 = vld [vmem:[#allocation5 + $0x58] sm:$0xff] }
  0x2d   :  { %v65_v20 = vld [vmem:[#allocation5 + $0x30] sm:$0xff]  ;;  %v72_v23 = vld [vmem:[#allocation5 + $0x68] sm:$0xff]  ;;  %v74_v25 = vld [vmem:[#allocation5 + $0x78] sm:$0xff]  ;;  %vm4684_vm3 = vcmask 261120   ;;  %vm4764_vm4 = vcmask 7168  }
  0x2e   :  { %4932 = vmatprep.subr.bf16.mxu0 %v6278_v13  ;;  %v6285_v22 = vpack.c.bf16 %v65_v20, %v61_v19  ;;  %4948 = vmatprep.subr.bf16.mxu1 %v6280_v17  ;;  %v6289_v26 = vpack.c.bf16 %v72_v23, %v68_v21  ;;  %v6291_v27 = vpack.c.bf16 %v74_v25, %v70_v24  ;;  %v67_v28 = vld [vmem:[#allocation5 + $0x40] sm:$0xff]  ;;  %v69_v30 = vld [vmem:[#allocation5 + $0x50] sm:$0xff]  ;;  %v76_v33 = vld [vmem:[#allocation5 + $0x88] sm:$0xff] }
  0x2f   :  { %4934 = vmatpush1.bf16.msra.mxu0 %v6282_v18  ;;  %v71_v29 = vld [vmem:[#allocation5 + $0x60] sm:$0xff]  ;;  %v73_v32 = vld [vmem:[#allocation5 + $0x70] sm:$0xff]  ;;  %v80_v34 = vld [vmem:[#allocation5 + $0xa8] sm:$0xff] }
  0x30   :  { %4950 = vmatpush1.bf16.msra.mxu1 %v6285_v22  ;;  %v6294_v31 = vpack.c.bf16 %v71_v29, %v67_v28  ;;  %4936 = vmatprep.subr.bf16.mxu0 %v6289_v26  ;;  %v6298_v35 = vpack.c.bf16 %v73_v32, %v69_v30  ;;  %v6300_v36 = vpack.c.bf16 %v80_v34, %v76_v33  ;;  %v78_v37 = vld [vmem:[#allocation5 + $0x98] sm:$0xff]  ;;  %v75_v39 = vld [vmem:[#allocation5 + $0x80] sm:$0xff]  ;;  %v77_v42 = vld [vmem:[#allocation5 + $0x90] sm:$0xff] }
  0x31   :  { %4952 = vmatprep.subr.bf16.mxu1 %v6291_v27  ;;  %v82_v38 = vld [vmem:[#allocation5 + $0xb8] sm:$0xff]  ;;  %v79_v41 = vld [vmem:[#allocation5 + $0xa0] sm:$0xff]  ;;  %v81_v43 = vld [vmem:[#allocation5 + $0xb0] sm:$0xff] }
  0x32   :  { %v6302_v40 = vpack.c.bf16 %v82_v38, %v78_v37  ;;  %v6305_v44 = vpack.c.bf16 %v79_v41, %v75_v39  ;;  %v84_v45 = vld [vmem:[#allocation5 + $0xc8] sm:$0xff]  ;;  %v86_v47 = vld [vmem:[#allocation5 + $0xd8] sm:$0xff]  ;;  %v6309_v48 = vpack.c.bf16 %v81_v43, %v77_v42  ;;  %v83_v53 = vld [vmem:[#allocation5 + $0xc0] sm:$0xff] }
  0x33   :  { %4938 = vmatpush1.bf16.msra.mxu0 %v6294_v31  ;;  %v88_v46 = vld [vmem:[#allocation5 + $0xe8] sm:$0xff]  ;;  %v90_v50 = vld [vmem:[#allocation5 + $0xf8] sm:$0xff]  ;;  %v87_v54 = vld [vmem:[#allocation5 + $0xe0] sm:$0xff] }
  0x34   :  { %v5756_v2 = vpop.eup %5755  ;;  %4954 = vmatpush1.bf16.msra.mxu1 %v6298_v35  ;;  %4940 = vmatprep.subr.bf16.mxu0 %v6300_v36  ;;  %v6311_v49 = vpack.c.bf16 %v88_v46, %v84_v45  ;;  %v6314_v51 = vpack.c.bf16 %v90_v50, %v86_v47  ;;  %v85_v55 = vld [vmem:[#allocation5 + $0xd0] sm:$0xff]  ;;  %v6320_v56 = vpack.c.bf16 %v87_v54, %v83_v53  ;;  %v409_v16 = vld [vmem:[#allocation3 + $0x18] sm:$0xff]  ;;  %v92_v47 = vld [vmem:[%s7141_s2 + $0x8] sm:$0xff] }
  0x35   :  { %138 = vrot.lane.b32.xlu0 %v5756_v2, %s6197_s11  ;;  %4956 = vmatprep.subr.bf16.mxu1 %v6302_v40  ;;  %v89_v57 = vld [vmem:[#allocation5 + $0xf0] sm:$0xff] }
  0x36   :  { %v5758_v5 = vpop.eup %5757  ;;  %v6322_v58 = vpack.c.bf16 %v89_v57, %v85_v55  ;;  %v408_v28 = vld [vmem:[#allocation3 + $0x10] sm:$0xff]  ;;  %v96_v55 = vld [vmem:[%s7141_s2 + $0x28] sm:$0xff] }
  0x37   :  { %v129_v6 = vadd.f32 1.0, %v5758_v5  ;;  %4942 = vmatpush1.bf16.msra.mxu0 %v6305_v44  ;;  %v94_v50 = vld [vmem:[%s7141_s2 + $0x18] sm:$0xff]  ;;  %v93_v54 = vld [vmem:[%s7141_s2 + $0x10] sm:$0xff] }
  0x38   :  { %4958 = vmatpush1.bf16.msra.mxu1 %v6309_v48  ;;  %4944 = vmatprep.subr.bf16.mxu0 %v6311_v49  ;;  %v6373_v53 = vpack.c.bf16 %v94_v50, %v92_v47  ;;  %v98_v57 = vld [vmem:[%s7141_s2 + $0x38] sm:$0xff] }
  0x39   :  { %5759 = vrcp.f32 %v129_v6  ;;  %4960 = vmatprep.subr.bf16.mxu1 %v6314_v51  ;;  %v110_v6 = vshrl.u32 %v109_v1, 7  ;;  %v99_v1 = vld [vmem:[%s7141_s2 + $0x40] sm:$0xff] }
  0x3b   :  { %4946 = vmatpush1.bf16.msra.mxu0 %v6320_v56  ;;  %v111_v23 = vsub.s32 0, %v110_v6 }
  0x3c   :  { %4962 = vmatpush1.bf16.msra.mxu1 %v6322_v58  ;;  %4964 = vmatprep.subr.bf16.mxu0 %v6373_v53 }
  0x3d   :  { %4996 = vmatprep.subr.bf16.mxu1 %v6280_v17 }
  0x43   :  { %v5760_v7 = vpop.eup %5759 }
  0x44   :  { %v136_v52 = vmul.f32 0.0, %v5760_v7 }
  0xa7   :  { %v139_v8 = vpop.permute.xlu0 %138 }
  0xa8   :  { %v141_v9 = vmul.f32 %v5760_v7, %v139_v8  ;;  %v115_v7 = vsub.s32 1, %v110_v6  ;;  %v107_v8 = vld [vmem:[%s7142_s3] sm:$0x3]  ;;  %v101_v6 = vld [vmem:[%s7141_s2 + $0x50] sm:$0xff] }
  0xa9   :  { %v6359_v24 = vrot.slane %v107_v8, %v111_v23 }
  0xaa   :  { %143 = vrot.lane.b32.xlu0 %v141_v9, %s6197_s11  ;;  %v6348_v9 = vrot.slane %v107_v8, %v115_v7  ;;  %v104_v7 = vld [vmem:[%s7141_s2 + $0x68] sm:$0xff]  ;;  %v106_v8 = vld [vmem:[%s7141_s2 + $0x78] sm:$0xff] }
 0x11c   :  { %v144_v59 = vpop.permute.xlu0 %143 }
 0x11d   :  { %v6325_v60 = vadd.f32 %v144_v59, %v136_v52  ;;  %v91_v52 = vld [vmem:[%s7141_s2] sm:$0xff] }
 0x11e   :  { %v6384_v59 = vpack.c.bf16 %v93_v54, %v91_v52 }
 0x11f   :  { %5761 = vtanh.f32 %v6325_v60 }
 0x120   :  { %5763 = vpow2.f32 %v4773_v63  ;;  %v95_v63 = vld [vmem:[%s7141_s2 + $0x20] sm:$0xff] }
 0x129   :  { %v5762_v62 = vpop.eup %5761 }
 0x12a   :  { %149 = vrot.lane.b32.xlu1 %v5762_v62, %s6197_s11  ;;  %v5764_v0 = vpop.eup %5763  ;;  %v6386_v62 = vpack.c.bf16 %v98_v57, %v96_v55 }
 0x12b   :  { %v130_v2 = vadd.f32 1.0, %v5764_v0  ;;  %v97_v0 = vld [vmem:[%s7141_s2 + $0x30] sm:$0xff] }
 0x12d   :  { %5765 = vrcp.f32 %v130_v2  ;;  %v100_v2 = vld [vmem:[%s7141_s2 + $0x48] sm:$0xff] }
 0x137   :  { %v5766_v3 = vpop.eup %5765 }
 0x19c   :  { %v150_v4 = vpop.permute.xlu1 %149 }
 0x19d   :  { %v152_v5 = vmul.f32 %v5766_v3, %v150_v4  ;;  %v102_v3 = vld [vmem:[%s7141_s2 + $0x58] sm:$0xff]  ;;  %v6403_v4 = vpack.c.bf16 %v97_v0, %v95_v63 }
 0x19f   :  { %4774 = vmatmul.mubr.msk.f32.vlgmr.msra.gmra.mrb[0].mxu0 %vm153_vm0, %v152_v5  ;;  %4775 = vmatmul.mubr.msk.f32.vlgmr.msra.gmra.mrb[0].mxu1 %vm153_vm0, %v152_v5  ;;  %v6406_v5 = vpack.c.bf16 %v102_v3, %v100_v2  ;;  %v696_v2 = vld [vmem:[#allocation3 + $0x20] sm:$0xff] }
 0x1a0   :  { %4998 = vmatpush1.bf16.msra.mxu1 %v6285_v22  ;;  %400 = vmatprep.mubr.f32.mxu0 %v6198_v61 }
 0x1a1   :  { %5000 = vmatprep.subr.bf16.mxu1 %v6291_v27  ;;  %580 = vmatprep.mubr.f32.mxu1 %v6198_v61 }
 0x1a2   :  { %4966 = vmatpush1.bf16.msra.mxu0 %v6384_v59 }
 0x1a3   :  { %4968 = vmatprep.subr.bf16.mxu0 %v6386_v62 }
 0x1a4   :  { %5002 = vmatpush1.bf16.msra.mxu1 %v6298_v35 }
 0x1a5   :  { %5004 = vmatprep.subr.bf16.mxu1 %v6302_v40 }
 0x1a6   :  { %4970 = vmatpush1.bf16.msra.mxu0 %v6403_v4 }
 0x1a7   :  { %4972 = vmatprep.subr.bf16.mxu0 %v6406_v5 }
 0x1a8   :  { %5006 = vmatpush1.bf16.msra.mxu1 %v6309_v48 }
 0x1a9   :  { %5008 = vmatprep.subr.bf16.mxu1 %v6314_v51 }
 0x1ac   :  { %5010 = vmatpush1.bf16.msra.mxu1 %v6322_v58 }
 0x1ad   :  { %5012 = vmatprep.subr.bf16.mxu1 %v6373_v53 }
 0x272   :  { %v223_v10 = vpop.f32.mrb[0].mxu0  ;;  %v294_v11 = vpop.f32.mrb[0].mxu1 }
 0x273   :  { %v225_v12 = vpop.f32.mrb[1].mxu0  ;;  %v296_v14 = vpop.f32.mrb[1].mxu1  ;;  %v299_v25 = vadd.f32 %v223_v10, %v6359_v24  ;;  %v410_v30 = vadd.f32 %v408_v28, %v294_v11  ;;  %v6421_v10 = vpack.c.bf16 %v101_v6, %v99_v1  ;;  %v6424_v11 = vpack.c.bf16 %v106_v8, %v104_v7 }
 0x274   :  { %v6351_v15 = vadd.f32 %v225_v12, %v6348_v9  ;;  %v6354_v19 = vadd.f32 %v409_v16, %v296_v14  ;;  %v103_v12 = vld [vmem:[%s7141_s2 + $0x60] sm:$0xff]  ;;  %v105_v14 = vld [vmem:[%s7141_s2 + $0x70] sm:$0xff] }
 0x275   :  { %v4776_v29 = vmul.f32 -1.442695, %v299_v25  ;;  %v4779_v32 = vmul.f32 -1.442695, %v410_v30  ;;  %4974 = vmatpush1.bf16.msra.mxu0 %v6421_v10  ;;  %v6433_v16 = vpack.c.bf16 %v105_v14, %v103_v12 }
 0x276   :  { %5767 = vtanh.f32 %v6351_v15  ;;  %4976 = vmatprep.subr.bf16.mxu0 %v6424_v11 }
 0x277   :  { %5769 = vtanh.f32 %v6354_v19 }
 0x278   :  { %5771 = vpow2.f32 %v4776_v29 }
 0x279   :  { %5773 = vpow2.f32 %v4779_v32  ;;  %4978 = vmatpush1.bf16.msra.mxu0 %v6433_v16 }
 0x27a   :  { %4980 = vmatprep.subr.bf16.mxu0 %v6278_v13 }
 0x280   :  { %v5768_v20 = vpop.eup %5767 }
 0x281   :  { %318 = vrot.lane.b32.xlu1 %v5768_v20, %s6197_s11  ;;  %v5770_v21 = vpop.eup %5769 }
 0x282   :  { %427 = vrot.lane.b32.xlu0 %v5770_v21, %s6197_s11  ;;  %v5772_v33 = vpop.eup %5771 }
 0x283   :  { %v309_v34 = vadd.f32 1.0, %v5772_v33  ;;  %v5774_v37 = vpop.eup %5773  ;;  %v4777_v33 = vmul.f32 -1.442695, %v6351_v15 }
 0x284   :  { %v418_v38 = vadd.f32 1.0, %v5774_v37 }
 0x285   :  { %5775 = vrcp.f32 %v309_v34  ;;  %v4780_v34 = vmul.f32 -1.442695, %v6354_v19 }
 0x286   :  { %5777 = vrcp.f32 %v418_v38 }
 0x28f   :  { %v5776_v39 = vpop.eup %5775 }
 0x290   :  { %v5778_v43 = vpop.eup %5777  ;;  %v316_v20 = vmul.f32 0.0, %v5776_v39 }
 0x291   :  { %v425_v25 = vmul.f32 %v5778_v43, %v6325_v60 }
 0x2f3   :  { %v319_v41 = vpop.permute.xlu1 %318 }
 0x2f4   :  { %v321_v42 = vmul.f32 %v5776_v39, %v319_v41  ;;  %v428_v45 = vpop.permute.xlu0 %427 }
 0x2f5   :  { %v430_v46 = vmul.f32 %v5778_v43, %v428_v45 }
 0x2f6   :  { %323 = vrot.lane.b32.xlu1 %v321_v42, %s6197_s11 }
 0x2f7   :  { %432 = vrot.lane.b32.xlu0 %v430_v46, %s6197_s11  ;;  %v697_v46 = vld [vmem:[#allocation3 + $0x28] sm:$0xff] }
 0x368   :  { %v324_v21 = vpop.permute.xlu1 %323 }
 0x369   :  { %v6438_v23 = vadd.f32 %v324_v21, %v316_v20  ;;  %v433_v28 = vpop.permute.xlu0 %432 }
 0x36a   :  { %v6442_v29 = vadd.f32 %v433_v28, %v425_v25 }
 0x36b   :  { %5779 = vtanh.f32 %v6438_v23 }
 0x36c   :  { %5781 = vtanh.f32 %v6442_v29 }
 0x36d   :  { %5783 = vpow2.f32 %v4777_v33 }
 0x36e   :  { %5785 = vpow2.f32 %v4780_v34 }
 0x375   :  { %v5780_v30 = vpop.eup %5779 }
 0x376   :  { %329 = vrot.lane.b32.xlu1 %v5780_v30, %s6197_s11  ;;  %v5782_v32 = vpop.eup %5781 }
 0x377   :  { %438 = vrot.lane.b32.xlu0 %v5782_v32, %s6197_s11  ;;  %v5784_v37 = vpop.eup %5783 }
 0x378   :  { %v310_v38 = vadd.f32 1.0, %v5784_v37  ;;  %v5786_v60 = vpop.eup %5785 }
 0x379   :  { %v419_v39 = vadd.f32 1.0, %v5786_v60 }
 0x37a   :  { %5787 = vrcp.f32 %v310_v38 }
 0x37b   :  { %5789 = vrcp.f32 %v419_v39 }
 0x384   :  { %v5788_v41 = vpop.eup %5787 }
 0x385   :  { %v5790_v15 = vpop.eup %5789 }
 0x3e8   :  { %v330_v42 = vpop.permute.xlu1 %329 }
 0x3e9   :  { %v332_v43 = vmul.f32 %v5788_v41, %v330_v42  ;;  %v439_v45 = vpop.permute.xlu0 %438 }
 0x3ea   :  { %v441_v19 = vmul.f32 %v5790_v15, %v439_v45 }
 0x3eb   :  { %4778 = vmatmul.mubr.msk.f32.vlgmr.msra.gmra.mrb[2].mxu0 %vm153_vm0, %v332_v43 }
 0x3ec   :  { %4982 = vmatpush1.bf16.msra.mxu0 %v6282_v18  ;;  %509 = vmatprep.mubr.f32.mxu0 %v6198_v61 }
 0x3ed   :  { %4984 = vmatprep.subr.bf16.mxu0 %v6289_v26  ;;  %4782 = vmatmul.mubr.msk.f32.vlgmr.msra.gmra.mrb[2].mxu1 %vm153_vm0, %v441_v19 }
 0x3ee   :  { %5014 = vmatpush1.bf16.msra.mxu1 %v6384_v59  ;;  %688 = vmatprep.mubr.f32.mxu1 %v6198_v61 }
 0x3ef   :  { %5016 = vmatprep.subr.bf16.mxu1 %v6386_v62 }
 0x3f0   :  { %4986 = vmatpush1.bf16.msra.mxu0 %v6294_v31 }
 0x3f1   :  { %4988 = vmatprep.subr.bf16.mxu0 %v6300_v36 }
 0x3f2   :  { %5018 = vmatpush1.bf16.msra.mxu1 %v6403_v4 }
 0x3f3   :  { %5020 = vmatprep.subr.bf16.mxu1 %v6406_v5 }
 0x3f4   :  { %4990 = vmatpush1.bf16.msra.mxu0 %v6305_v44 }
 0x3f5   :  { %4992 = vmatprep.subr.bf16.mxu0 %v6311_v49 }
 0x3f6   :  { %5022 = vmatpush1.bf16.msra.mxu1 %v6421_v10 }
 0x3f7   :  { %5024 = vmatprep.subr.bf16.mxu1 %v6424_v11 }
 0x3f8   :  { %4994 = vmatpush1.bf16.msra.mxu0 %v6320_v56 }
 0x3f9   :  { %5044 = vmatprep.subr.bf16.mxu0 %v6280_v17 }
 0x3fa   :  { %5026 = vmatpush1.bf16.msra.mxu1 %v6433_v16 }
 0x3fb   :  { %4781 = vmatmul.mubr.msk.f32.vlgmr.msra.gmra.mrb[2].mxu0 %vm153_vm0, %v441_v19  ;;  %5028 = vmatprep.subr.bf16.mxu1 %v6278_v13 }
 0x3fc   :  { %5046 = vmatpush1.bf16.msra.mxu0 %v6285_v22  ;;  %868 = vmatprep.mubr.f32.mxu0 %v6198_v61 }
 0x3fd   :  { %5048 = vmatprep.subr.bf16.mxu0 %v6291_v27 }
 0x400   :  { %5050 = vmatpush1.bf16.msra.mxu0 %v6298_v35 }
 0x401   :  { %5052 = vmatprep.subr.bf16.mxu0 %v6302_v40 }
 0x404   :  { %5054 = vmatpush1.bf16.msra.mxu0 %v6309_v48 }
 0x405   :  { %5056 = vmatprep.subr.bf16.mxu0 %v6314_v51 }
 0x408   :  { %5058 = vmatpush1.bf16.msra.mxu0 %v6322_v58 }
 0x409   :  { %5060 = vmatprep.subr.bf16.mxu0 %v6373_v53 }
 0x4c0   :  { %v582_v47 = vpop.f32.mrb[2].mxu1 }
 0x4c1   :  { %v584_v50 = vpop.f32.mrb[3].mxu1  ;;  %v698_v3 = vadd.f32 %v696_v2, %v582_v47 }
 0x4c2   :  { %v699_v52 = vadd.f32 %v697_v46, %v584_v50 }
 0x4c3   :  { %v4786_v1 = vmul.f32 -1.442695, %v698_v3 }
 0x4c4   :  { %5791 = vtanh.f32 %v699_v52  ;;  %v4787_v15 = vmul.f32 -1.442695, %v699_v52 }
 0x4ce   :  { %v511_v54 = vpop.f32.mrb[2].mxu0  ;;  %v5792_v63 = vpop.eup %5791 }
 0x4cf   :  { %v513_v55 = vpop.f32.mrb[3].mxu0  ;;  %715 = vrot.lane.b32.xlu0 %v5792_v63, %s6197_s11  ;;  %v587_v6 = vadd.f32 %v511_v54, %v6359_v24  ;;  %v985_v63 = vld [vmem:[#allocation3 + $0x38] sm:$0xff] }
 0x4d0   :  { %v588_v57 = vadd.f32 %v513_v55, %v6348_v9 }
 0x4d1   :  { %v4783_v7 = vmul.f32 -1.442695, %v587_v6 }
 0x4d2   :  { %5793 = vtanh.f32 %v588_v57 }
 0x4d3   :  { %5795 = vpow2.f32 %v4786_v1 }
 0x4d4   :  { %5797 = vpow2.f32 %v4783_v7 }
 0x4dc   :  { %v5794_v0 = vpop.eup %5793 }
 0x4dd   :  { %606 = vrot.lane.b32.xlu1 %v5794_v0, %s6197_s11  ;;  %v5796_v8 = vpop.eup %5795 }
 0x4de   :  { %v706_v12 = vadd.f32 1.0, %v5796_v8  ;;  %v5798_v14 = vpop.eup %5797 }
 0x4df   :  { %v597_v20 = vadd.f32 1.0, %v5798_v14  ;;  %v984_v14 = vld [vmem:[#allocation3 + $0x30] sm:$0xff] }
 0x4e0   :  { %5799 = vrcp.f32 %v706_v12 }
 0x4e1   :  { %5801 = vrcp.f32 %v597_v20 }
 0x4ea   :  { %v5800_v21 = vpop.eup %5799 }
 0x4eb   :  { %v5802_v30 = vpop.eup %5801  ;;  %v713_v34 = vmul.f32 %v5800_v21, %v6442_v29  ;;  %v4784_v29 = vmul.f32 -1.442695, %v588_v57 }
 0x4ec   :  { %v604_v60 = vmul.f32 %v5802_v30, %v6438_v23 }
 0x541   :  { %v716_v25 = vpop.permute.xlu0 %715 }
 0x542   :  { %v718_v28 = vmul.f32 %v5800_v21, %v716_v25 }
 0x544   :  { %720 = vrot.lane.b32.xlu0 %v718_v28, %s6197_s11 }
 0x54f   :  { %v607_v32 = vpop.permute.xlu1 %606 }
 0x550   :  { %v609_v33 = vmul.f32 %v5802_v30, %v607_v32 }
 0x552   :  { %611 = vrot.lane.b32.xlu1 %v609_v33, %s6197_s11 }
 0x5b6   :  { %v721_v37 = vpop.permute.xlu0 %720 }
 0x5b7   :  { %v6486_v38 = vadd.f32 %v721_v37, %v713_v34 }
 0x5b9   :  { %5803 = vtanh.f32 %v6486_v38 }
 0x5c3   :  { %v5804_v42 = vpop.eup %5803 }
 0x5c4   :  { %v612_v39 = vpop.permute.xlu1 %611  ;;  %726 = vrot.lane.b32.xlu0 %v5804_v42, %s6197_s11 }
 0x5c5   :  { %v6490_v41 = vadd.f32 %v612_v39, %v604_v60 }
 0x5c7   :  { %5805 = vtanh.f32 %v6490_v41 }
 0x5c8   :  { %5807 = vpow2.f32 %v4787_v15 }
 0x5c9   :  { %5809 = vpow2.f32 %v4784_v29 }
 0x5d1   :  { %v5806_v43 = vpop.eup %5805 }
 0x5d2   :  { %617 = vrot.lane.b32.xlu1 %v5806_v43, %s6197_s11  ;;  %v5808_v45 = vpop.eup %5807 }
 0x5d3   :  { %v707_v19 = vadd.f32 1.0, %v5808_v45  ;;  %v5810_v46 = vpop.eup %5809 }
 0x5d4   :  { %v598_v23 = vadd.f32 1.0, %v5810_v46 }
 0x5d5   :  { %5811 = vrcp.f32 %v707_v19 }
 0x5d6   :  { %5813 = vrcp.f32 %v598_v23 }
 0x5df   :  { %v5812_v47 = vpop.eup %5811 }
 0x5e0   :  { %v5814_v52 = vpop.eup %5813 }
 0x636   :  { %v727_v50 = vpop.permute.xlu0 %726 }
 0x637   :  { %v729_v54 = vmul.f32 %v5812_v47, %v727_v50 }
 0x639   :  { %4789 = vmatmul.mubr.msk.f32.vlgmr.msra.gmra.mrb[4].mxu0 %vm153_vm0, %v729_v54 }
 0x63a   :  { %5062 = vmatpush1.bf16.msra.mxu0 %v6384_v59  ;;  %976 = vmatprep.mubr.f32.mxu0 %v6198_v61 }
 0x63b   :  { %5064 = vmatprep.subr.bf16.mxu0 %v6386_v62 }
 0x63e   :  { %5066 = vmatpush1.bf16.msra.mxu0 %v6403_v4 }
 0x63f   :  { %5068 = vmatprep.subr.bf16.mxu0 %v6406_v5 }
 0x642   :  { %5070 = vmatpush1.bf16.msra.mxu0 %v6421_v10 }
 0x643   :  { %5072 = vmatprep.subr.bf16.mxu0 %v6424_v11 }
 0x644   :  { %v618_v55 = vpop.permute.xlu1 %617 }
 0x645   :  { %v620_v57 = vmul.f32 %v5814_v52, %v618_v55 }
 0x646   :  { %5074 = vmatpush1.bf16.msra.mxu0 %v6433_v16 }
 0x647   :  { %4785 = vmatmul.mubr.msk.f32.vlgmr.msra.gmra.mrb[4].mxu1 %vm153_vm0, %v620_v57  ;;  %5076 = vmatprep.subr.bf16.mxu0 %v6278_v13 }
 0x648   :  { %5030 = vmatpush1.bf16.msra.mxu1 %v6282_v18  ;;  %797 = vmatprep.mubr.f32.mxu1 %v6198_v61 }
 0x649   :  { %5032 = vmatprep.subr.bf16.mxu1 %v6289_v26 }
 0x64c   :  { %5034 = vmatpush1.bf16.msra.mxu1 %v6294_v31 }
 0x64d   :  { %5036 = vmatprep.subr.bf16.mxu1 %v6300_v36 }
 0x650   :  { %5038 = vmatpush1.bf16.msra.mxu1 %v6305_v44 }
 0x651   :  { %5040 = vmatprep.subr.bf16.mxu1 %v6311_v49 }
 0x654   :  { %5042 = vmatpush1.bf16.msra.mxu1 %v6320_v56 }
 0x655   :  { %5092 = vmatprep.subr.bf16.mxu1 %v6280_v17 }
 0x657   :  { %4788 = vmatmul.mubr.msk.f32.vlgmr.msra.gmra.mrb[4].mxu1 %vm153_vm0, %v729_v54 }
 0x658   :  { %5094 = vmatpush1.bf16.msra.mxu1 %v6285_v22  ;;  %1156 = vmatprep.mubr.f32.mxu1 %v6198_v61 }
 0x659   :  { %5096 = vmatprep.subr.bf16.mxu1 %v6291_v27 }
 0x65c   :  { %5098 = vmatpush1.bf16.msra.mxu1 %v6298_v35 }
 0x65d   :  { %5100 = vmatprep.subr.bf16.mxu1 %v6302_v40 }
 0x660   :  { %5102 = vmatpush1.bf16.msra.mxu1 %v6309_v48 }
 0x661   :  { %5104 = vmatprep.subr.bf16.mxu1 %v6314_v51 }
 0x664   :  { %5106 = vmatpush1.bf16.msra.mxu1 %v6322_v58 }
 0x665   :  { %5108 = vmatprep.subr.bf16.mxu1 %v6373_v53 }
 0x70c   :  { %v870_v0 = vpop.f32.mrb[4].mxu0 }
 0x70d   :  { %v872_v2 = vpop.f32.mrb[5].mxu0  ;;  %v986_v20 = vadd.f32 %v984_v14, %v870_v0 }
 0x70e   :  { %v987_v3 = vadd.f32 %v985_v63, %v872_v2 }
 0x70f   :  { %v4793_v21 = vmul.f32 -1.442695, %v986_v20 }
 0x710   :  { %5815 = vtanh.f32 %v987_v3  ;;  %v4794_v52 = vmul.f32 -1.442695, %v987_v3 }
 0x71a   :  { %v5816_v1 = vpop.eup %5815 }
 0x71b   :  { %1003 = vrot.lane.b32.xlu0 %v5816_v1, %s6197_s11 }
 0x72a   :  { %v799_v6 = vpop.f32.mrb[4].mxu1 }
 0x72b   :  { %v801_v7 = vpop.f32.mrb[5].mxu1  ;;  %v875_v30 = vadd.f32 %v799_v6, %v6359_v24 }
 0x72c   :  { %v876_v8 = vadd.f32 %v801_v7, %v6348_v9 }
 0x72d   :  { %v4790_v32 = vmul.f32 -1.442695, %v875_v30 }
 0x72e   :  { %5817 = vtanh.f32 %v876_v8  ;;  %v4791_v57 = vmul.f32 -1.442695, %v876_v8  ;;  %v1273_v8 = vld [vmem:[#allocation3 + $0x48] sm:$0xff] }
 0x72f   :  { %5819 = vpow2.f32 %v4793_v21 }
 0x738   :  { %v5818_v12 = vpop.eup %5817 }
 0x739   :  { %894 = vrot.lane.b32.xlu1 %v5818_v12, %s6197_s11  ;;  %v5820_v25 = vpop.eup %5819 }
 0x73a   :  { %v994_v28 = vadd.f32 1.0, %v5820_v25 }
 0x73c   :  { %5821 = vrcp.f32 %v994_v28 }
 0x73d   :  { %5823 = vpow2.f32 %v4790_v32 }
 0x746   :  { %v5822_v33 = vpop.eup %5821 }
 0x747   :  { %v5824_v60 = vpop.eup %5823  ;;  %v1001_v29 = vmul.f32 %v5822_v33, %v6486_v38 }
 0x748   :  { %v885_v39 = vadd.f32 1.0, %v5824_v60 }
 0x74a   :  { %5825 = vrcp.f32 %v885_v39 }
 0x754   :  { %v5826_v42 = vpop.eup %5825 }
 0x755   :  { %v892_v23 = vmul.f32 %v5826_v42, %v6490_v41 }
 0x78d   :  { %v1004_v34 = vpop.permute.xlu0 %1003 }
 0x78e   :  { %v1006_v37 = vmul.f32 %v5822_v33, %v1004_v34  ;;  %v1272_v33 = vld [vmem:[#allocation3 + $0x40] sm:$0xff] }
 0x790   :  { %1008 = vrot.lane.b32.xlu0 %v1006_v37, %s6197_s11 }
 0x7ab   :  { %v895_v43 = vpop.permute.xlu1 %894 }
 0x7ac   :  { %v897_v15 = vmul.f32 %v5826_v42, %v895_v43 }
 0x7ae   :  { %899 = vrot.lane.b32.xlu1 %v897_v15, %s6197_s11 }
 0x802   :  { %v1009_v45 = vpop.permute.xlu0 %1008 }
 0x803   :  { %v6532_v19 = vadd.f32 %v1009_v45, %v1001_v29 }
 0x805   :  { %5827 = vtanh.f32 %v6532_v19 }
 0x80f   :  { %v5828_v46 = vpop.eup %5827 }
 0x810   :  { %1014 = vrot.lane.b32.xlu0 %v5828_v46, %s6197_s11 }
 0x820   :  { %v900_v47 = vpop.permute.xlu1 %899 }
 0x821   :  { %v6537_v50 = vadd.f32 %v900_v47, %v892_v23 }
 0x823   :  { %5829 = vtanh.f32 %v6537_v50 }
 0x824   :  { %5831 = vpow2.f32 %v4794_v52 }
 0x82d   :  { %v5830_v54 = vpop.eup %5829 }
 0x82e   :  { %905 = vrot.lane.b32.xlu1 %v5830_v54, %s6197_s11  ;;  %v5832_v38 = vpop.eup %5831 }
 0x82f   :  { %v995_v55 = vadd.f32 1.0, %v5832_v38 }
 0x831   :  { %5833 = vrcp.f32 %v995_v55 }
 0x832   :  { %5835 = vpow2.f32 %v4791_v57 }
 0x83b   :  { %v5834_v63 = vpop.eup %5833 }
 0x83c   :  { %v5836_v41 = vpop.eup %5835 }
 0x83d   :  { %v886_v3 = vadd.f32 1.0, %v5836_v41 }
 0x83f   :  { %5837 = vrcp.f32 %v886_v3 }
 0x849   :  { %v5838_v1 = vpop.eup %5837 }
 0x882   :  { %v1015_v0 = vpop.permute.xlu0 %1014 }
 0x883   :  { %v1017_v2 = vmul.f32 %v5834_v63, %v1015_v0 }
 0x885   :  { %4796 = vmatmul.mubr.msk.f32.vlgmr.msra.gmra.mrb[6].mxu1 %vm153_vm0, %v1017_v2 }
 0x886   :  { %5110 = vmatpush1.bf16.msra.mxu1 %v6384_v59  ;;  %1264 = vmatprep.mubr.f32.mxu1 %v6198_v61 }
 0x887   :  { %5112 = vmatprep.subr.bf16.mxu1 %v6386_v62 }
 0x88a   :  { %5114 = vmatpush1.bf16.msra.mxu1 %v6403_v4 }
 0x88b   :  { %5116 = vmatprep.subr.bf16.mxu1 %v6406_v5 }
 0x88e   :  { %5118 = vmatpush1.bf16.msra.mxu1 %v6421_v10 }
 0x88f   :  { %5120 = vmatprep.subr.bf16.mxu1 %v6424_v11 }
 0x892   :  { %5122 = vmatpush1.bf16.msra.mxu1 %v6433_v16 }
 0x893   :  { %5124 = vmatprep.subr.bf16.mxu1 %v6278_v13 }
 0x8a0   :  { %v906_v6 = vpop.permute.xlu1 %905 }
 0x8a1   :  { %v908_v7 = vmul.f32 %v5838_v1, %v906_v6 }
 0x8a3   :  { %4792 = vmatmul.mubr.msk.f32.vlgmr.msra.gmra.mrb[6].mxu0 %vm153_vm0, %v908_v7 }
 0x8a4   :  { %5078 = vmatpush1.bf16.msra.mxu0 %v6282_v18  ;;  %1085 = vmatprep.mubr.f32.mxu0 %v6198_v61 }
 0x8a5   :  { %5080 = vmatprep.subr.bf16.mxu0 %v6289_v26 }
 0x8a8   :  { %5082 = vmatpush1.bf16.msra.mxu0 %v6294_v31 }
 0x8a9   :  { %5084 = vmatprep.subr.bf16.mxu0 %v6300_v36 }
 0x8ac   :  { %5086 = vmatpush1.bf16.msra.mxu0 %v6305_v44 }
 0x8ad   :  { %5088 = vmatprep.subr.bf16.mxu0 %v6311_v49 }
 0x8b0   :  { %5090 = vmatpush1.bf16.msra.mxu0 %v6320_v56 }
 0x8b1   :  { %5140 = vmatprep.subr.bf16.mxu0 %v6280_v17 }
 0x8b3   :  { %4795 = vmatmul.mubr.msk.f32.vlgmr.msra.gmra.mrb[6].mxu0 %vm153_vm0, %v1017_v2 }
 0x8b4   :  { %5142 = vmatpush1.bf16.msra.mxu0 %v6285_v22  ;;  %1444 = vmatprep.mubr.f32.mxu0 %v6198_v61 }
 0x8b5   :  { %5144 = vmatprep.subr.bf16.mxu0 %v6291_v27 }
 0x8b8   :  { %5146 = vmatpush1.bf16.msra.mxu0 %v6298_v35 }
 0x8b9   :  { %5148 = vmatprep.subr.bf16.mxu0 %v6302_v40 }
 0x8bc   :  { %5150 = vmatpush1.bf16.msra.mxu0 %v6309_v48 }
 0x8bd   :  { %5152 = vmatprep.subr.bf16.mxu0 %v6314_v51 }
 0x8c0   :  { %5154 = vmatpush1.bf16.msra.mxu0 %v6322_v58 }
 0x8c1   :  { %5156 = vmatprep.subr.bf16.mxu0 %v6373_v53 }
 0x958   :  { %v1158_v12 = vpop.f32.mrb[6].mxu1 }
 0x959   :  { %v1160_v14 = vpop.f32.mrb[7].mxu1  ;;  %v1274_v34 = vadd.f32 %v1272_v33, %v1158_v12 }
 0x95a   :  { %v1275_v20 = vadd.f32 %v1273_v8, %v1160_v14 }
 0x95b   :  { %v4800_v37 = vmul.f32 -1.442695, %v1274_v34 }
 0x95c   :  { %5839 = vtanh.f32 %v1275_v20  ;;  %v4801_v1 = vmul.f32 -1.442695, %v1275_v20 }
 0x966   :  { %v5840_v21 = vpop.eup %5839 }
 0x967   :  { %1291 = vrot.lane.b32.xlu0 %v5840_v21, %s6197_s11 }
 0x986   :  { %v1087_v25 = vpop.f32.mrb[6].mxu0 }
 0x987   :  { %v1089_v28 = vpop.f32.mrb[7].mxu0  ;;  %v1163_v29 = vadd.f32 %v1087_v25, %v6359_v24 }
 0x988   :  { %v1164_v30 = vadd.f32 %v1089_v28, %v6348_v9 }
 0x989   :  { %v4797_v45 = vmul.f32 -1.442695, %v1163_v29 }
 0x98a   :  { %5841 = vtanh.f32 %v1164_v30 }
 0x98b   :  { %5843 = vpow2.f32 %v4800_v37 }
 0x994   :  { %v5842_v32 = vpop.eup %5841 }
 0x995   :  { %1182 = vrot.lane.b32.xlu1 %v5842_v32, %s6197_s11  ;;  %v5844_v60 = vpop.eup %5843 }
 0x996   :  { %v1282_v39 = vadd.f32 1.0, %v5844_v60 }
 0x998   :  { %5845 = vrcp.f32 %v1282_v39 }
 0x999   :  { %5847 = vpow2.f32 %v4797_v45 }
 0x9a2   :  { %v5846_v42 = vpop.eup %5845 }
 0x9a3   :  { %v5848_v46 = vpop.eup %5847  ;;  %v1289_v38 = vmul.f32 %v5846_v42, %v6532_v19 }
 0x9a4   :  { %v1173_v23 = vadd.f32 1.0, %v5848_v46 }
 0x9a6   :  { %5849 = vrcp.f32 %v1173_v23 }
 0x9b0   :  { %v5850_v47 = vpop.eup %5849 }
 0x9b1   :  { %v1180_v0 = vmul.f32 %v5850_v47, %v6537_v50  ;;  %v4798_v50 = vmul.f32 -1.442695, %v1164_v30  ;;  %v1561_v30 = vld [vmem:[#allocation3 + $0x58] sm:$0xff] }
 0x9d9   :  { %v1292_v43 = vpop.permute.xlu0 %1291 }
 0x9da   :  { %v1294_v15 = vmul.f32 %v5846_v42, %v1292_v43 }
 0x9dc   :  { %1296 = vrot.lane.b32.xlu0 %v1294_v15, %s6197_s11  ;;  %v1560_v15 = vld [vmem:[#allocation3 + $0x50] sm:$0xff] }
 0xa07   :  { %v1183_v54 = vpop.permute.xlu1 %1182 }
 0xa08   :  { %v1185_v52 = vmul.f32 %v5850_v47, %v1183_v54 }
 0xa0a   :  { %1187 = vrot.lane.b32.xlu1 %v1185_v52, %s6197_s11 }
 0xa4e   :  { %v1297_v55 = vpop.permute.xlu0 %1296 }
 0xa4f   :  { %v6578_v57 = vadd.f32 %v1297_v55, %v1289_v38 }
 0xa51   :  { %5851 = vtanh.f32 %v6578_v57 }
 0xa5b   :  { %v5852_v63 = vpop.eup %5851 }
 0xa5c   :  { %1302 = vrot.lane.b32.xlu0 %v5852_v63, %s6197_s11 }
 0xa7c   :  { %v1188_v2 = vpop.permute.xlu1 %1187 }
 0xa7d   :  { %v6583_v41 = vadd.f32 %v1188_v2, %v1180_v0 }
 0xa7f   :  { %5853 = vtanh.f32 %v6583_v41 }
 0xa80   :  { %5855 = vpow2.f32 %v4801_v1 }
 0xa89   :  { %v5854_v3 = vpop.eup %5853 }
 0xa8a   :  { %1193 = vrot.lane.b32.xlu1 %v5854_v3, %s6197_s11  ;;  %v5856_v19 = vpop.eup %5855 }
 0xa8b   :  { %v1283_v6 = vadd.f32 1.0, %v5856_v19 }
 0xa8d   :  { %5857 = vrcp.f32 %v1283_v6 }
 0xa8e   :  { %5859 = vpow2.f32 %v4798_v50 }
 0xa97   :  { %v5858_v7 = vpop.eup %5857 }
 0xa98   :  { %v5860_v14 = vpop.eup %5859 }
 0xa99   :  { %v1174_v20 = vadd.f32 1.0, %v5860_v14 }
 0xa9b   :  { %5861 = vrcp.f32 %v1174_v20 }
 0xaa5   :  { %v5862_v21 = vpop.eup %5861 }
 0xace   :  { %v1303_v8 = vpop.permute.xlu0 %1302 }
 0xacf   :  { %v1305_v12 = vmul.f32 %v5858_v7, %v1303_v8 }
 0xad1   :  { %4803 = vmatmul.mubr.msk.f32.vlgmr.msra.gmra.mrb[8].mxu0 %vm153_vm0, %v1305_v12 }
 0xad2   :  { %5158 = vmatpush1.bf16.msra.mxu0 %v6384_v59  ;;  %1552 = vmatprep.mubr.f32.mxu0 %v6198_v61 }
 0xad3   :  { %5160 = vmatprep.subr.bf16.mxu0 %v6386_v62 }
 0xad6   :  { %5162 = vmatpush1.bf16.msra.mxu0 %v6403_v4 }
 0xad7   :  { %5164 = vmatprep.subr.bf16.mxu0 %v6406_v5 }
 0xada   :  { %5166 = vmatpush1.bf16.msra.mxu0 %v6421_v10 }
 0xadb   :  { %5168 = vmatprep.subr.bf16.mxu0 %v6424_v11 }
 0xade   :  { %5170 = vmatpush1.bf16.msra.mxu0 %v6433_v16 }
 0xadf   :  { %5172 = vmatprep.subr.bf16.mxu0 %v6278_v13 }
 0xafc   :  { %v1194_v25 = vpop.permute.xlu1 %1193 }
 0xafd   :  { %v1196_v28 = vmul.f32 %v5862_v21, %v1194_v25 }
 0xaff   :  { %4799 = vmatmul.mubr.msk.f32.vlgmr.msra.gmra.mrb[8].mxu1 %vm153_vm0, %v1196_v28 }
 0xb00   :  { %5126 = vmatpush1.bf16.msra.mxu1 %v6282_v18  ;;  %1373 = vmatprep.mubr.f32.mxu1 %v6198_v61 }
 0xb01   :  { %5128 = vmatprep.subr.bf16.mxu1 %v6289_v26 }
 0xb04   :  { %5130 = vmatpush1.bf16.msra.mxu1 %v6294_v31 }
 0xb05   :  { %5132 = vmatprep.subr.bf16.mxu1 %v6300_v36 }
 0xb08   :  { %5134 = vmatpush1.bf16.msra.mxu1 %v6305_v44 }
 0xb09   :  { %5136 = vmatprep.subr.bf16.mxu1 %v6311_v49 }
 0xb0c   :  { %5138 = vmatpush1.bf16.msra.mxu1 %v6320_v56 }
 0xb0d   :  { %5188 = vmatprep.subr.bf16.mxu1 %v6280_v17 }
 0xb0f   :  { %4802 = vmatmul.mubr.msk.f32.vlgmr.msra.gmra.mrb[8].mxu1 %vm153_vm0, %v1305_v12 }
 0xb10   :  { %5190 = vmatpush1.bf16.msra.mxu1 %v6285_v22  ;;  %1732 = vmatprep.mubr.f32.mxu1 %v6198_v61 }
 0xb11   :  { %5192 = vmatprep.subr.bf16.mxu1 %v6291_v27 }
 0xb14   :  { %5194 = vmatpush1.bf16.msra.mxu1 %v6298_v35 }
 0xb15   :  { %5196 = vmatprep.subr.bf16.mxu1 %v6302_v40 }
 0xb18   :  { %5198 = vmatpush1.bf16.msra.mxu1 %v6309_v48 }
 0xb19   :  { %5200 = vmatprep.subr.bf16.mxu1 %v6314_v51 }
 0xb1c   :  { %5202 = vmatpush1.bf16.msra.mxu1 %v6322_v58 }
 0xb1d   :  { %5204 = vmatprep.subr.bf16.mxu1 %v6373_v53 }
 0xba4   :  { %v1446_v32 = vpop.f32.mrb[8].mxu0 }
 0xba5   :  { %v1448_v33 = vpop.f32.mrb[9].mxu0  ;;  %v1562_v29 = vadd.f32 %v1560_v15, %v1446_v32 }
 0xba6   :  { %v1563_v34 = vadd.f32 %v1561_v30, %v1448_v33 }
 0xba7   :  { %v4807_v45 = vmul.f32 -1.442695, %v1562_v29 }
 0xba8   :  { %5863 = vtanh.f32 %v1563_v34  ;;  %v4808_v21 = vmul.f32 -1.442695, %v1563_v34 }
 0xbb2   :  { %v5864_v37 = vpop.eup %5863 }
 0xbb3   :  { %1579 = vrot.lane.b32.xlu0 %v5864_v37, %s6197_s11 }
 0xbe2   :  { %v1375_v60 = vpop.f32.mrb[8].mxu1 }
 0xbe3   :  { %v1377_v39 = vpop.f32.mrb[9].mxu1  ;;  %v1451_v38 = vadd.f32 %v1375_v60, %v6359_v24 }
 0xbe4   :  { %v1452_v42 = vadd.f32 %v1377_v39, %v6348_v9 }
 0xbe5   :  { %v4804_v55 = vmul.f32 -1.442695, %v1451_v38 }
 0xbe6   :  { %5865 = vtanh.f32 %v1452_v42 }
 0xbe7   :  { %5867 = vpow2.f32 %v4807_v45 }
 0xbf0   :  { %v5866_v43 = vpop.eup %5865 }
 0xbf1   :  { %1470 = vrot.lane.b32.xlu1 %v5866_v43, %s6197_s11  ;;  %v5868_v46 = vpop.eup %5867 }
 0xbf2   :  { %v1570_v23 = vadd.f32 1.0, %v5868_v46 }
 0xbf4   :  { %5869 = vrcp.f32 %v1570_v23 }
 0xbf5   :  { %5871 = vpow2.f32 %v4804_v55 }
 0xbfe   :  { %v5870_v47 = vpop.eup %5869 }
 0xbff   :  { %v5872_v63 = vpop.eup %5871  ;;  %v1577_v19 = vmul.f32 %v5870_v47, %v6578_v57 }
 0xc00   :  { %v1461_v0 = vadd.f32 1.0, %v5872_v63 }
 0xc02   :  { %5873 = vrcp.f32 %v1461_v0 }
 0xc0c   :  { %v5874_v2 = vpop.eup %5873 }
 0xc0d   :  { %v1468_v12 = vmul.f32 %v5874_v2, %v6583_v41  ;;  %v4805_v41 = vmul.f32 -1.442695, %v1452_v42  ;;  %v1849_v42 = vld [vmem:[#allocation3 + $0x68] sm:$0xff] }
 0xc25   :  { %v1580_v54 = vpop.permute.xlu0 %1579 }
 0xc26   :  { %v1582_v52 = vmul.f32 %v5870_v47, %v1580_v54 }
 0xc28   :  { %1584 = vrot.lane.b32.xlu0 %v1582_v52, %s6197_s11  ;;  %v1848_v52 = vld [vmem:[#allocation3 + $0x60] sm:$0xff] }
 0xc63   :  { %v1471_v3 = vpop.permute.xlu1 %1470 }
 0xc64   :  { %v1473_v1 = vmul.f32 %v5874_v2, %v1471_v3 }
 0xc66   :  { %1475 = vrot.lane.b32.xlu1 %v1473_v1, %s6197_s11 }
 0xc9a   :  { %v1585_v6 = vpop.permute.xlu0 %1584 }
 0xc9b   :  { %v6624_v7 = vadd.f32 %v1585_v6, %v1577_v19 }
 0xc9d   :  { %5875 = vtanh.f32 %v6624_v7 }
 0xca7   :  { %v5876_v8 = vpop.eup %5875 }
 0xca8   :  { %1590 = vrot.lane.b32.xlu0 %v5876_v8, %s6197_s11 }
 0xcd8   :  { %v1476_v50 = vpop.permute.xlu1 %1475 }
 0xcd9   :  { %v6629_v14 = vadd.f32 %v1476_v50, %v1468_v12 }
 0xcdb   :  { %5877 = vtanh.f32 %v6629_v14 }
 0xcdc   :  { %5879 = vpow2.f32 %v4808_v21 }
 0xce5   :  { %v5878_v20 = vpop.eup %5877 }
 0xce6   :  { %1481 = vrot.lane.b32.xlu1 %v5878_v20, %s6197_s11  ;;  %v5880_v57 = vpop.eup %5879 }
 0xce7   :  { %v1571_v25 = vadd.f32 1.0, %v5880_v57 }
 0xce9   :  { %5881 = vrcp.f32 %v1571_v25 }
 0xcea   :  { %5883 = vpow2.f32 %v4805_v41 }
 0xcf3   :  { %v5882_v28 = vpop.eup %5881 }
 0xcf4   :  { %v5884_v33 = vpop.eup %5883 }
 0xcf5   :  { %v1462_v34 = vadd.f32 1.0, %v5884_v33 }
 0xcf7   :  { %5885 = vrcp.f32 %v1462_v34 }
 0xd01   :  { %v5886_v37 = vpop.eup %5885 }
 0xd1a   :  { %v1591_v30 = vpop.permute.xlu0 %1590 }
 0xd1b   :  { %v1593_v32 = vmul.f32 %v5882_v28, %v1591_v30 }
 0xd1d   :  { %4810 = vmatmul.mubr.msk.f32.vlgmr.msra.gmra.mrb[10].mxu1 %vm153_vm0, %v1593_v32 }
 0xd1e   :  { %5206 = vmatpush1.bf16.msra.mxu1 %v6384_v59  ;;  %1840 = vmatprep.mubr.f32.mxu1 %v6198_v61 }
 0xd1f   :  { %5208 = vmatprep.subr.bf16.mxu1 %v6386_v62 }
 0xd22   :  { %5210 = vmatpush1.bf16.msra.mxu1 %v6403_v4 }
 0xd23   :  { %5212 = vmatprep.subr.bf16.mxu1 %v6406_v5 }
 0xd26   :  { %5214 = vmatpush1.bf16.msra.mxu1 %v6421_v10 }
 0xd27   :  { %5216 = vmatprep.subr.bf16.mxu1 %v6424_v11 }
 0xd2a   :  { %5218 = vmatpush1.bf16.msra.mxu1 %v6433_v16 }
 0xd2b   :  { %5220 = vmatprep.subr.bf16.mxu1 %v6278_v13 }
 0xd58   :  { %v1482_v60 = vpop.permute.xlu1 %1481 }
 0xd59   :  { %v1484_v39 = vmul.f32 %v5886_v37, %v1482_v60 }
 0xd5b   :  { %4806 = vmatmul.mubr.msk.f32.vlgmr.msra.gmra.mrb[10].mxu0 %vm153_vm0, %v1484_v39 }
 0xd5c   :  { %5174 = vmatpush1.bf16.msra.mxu0 %v6282_v18  ;;  %1661 = vmatprep.mubr.f32.mxu0 %v6198_v61 }
 0xd5d   :  { %5176 = vmatprep.subr.bf16.mxu0 %v6289_v26 }
 0xd60   :  { %5178 = vmatpush1.bf16.msra.mxu0 %v6294_v31 }
 0xd61   :  { %5180 = vmatprep.subr.bf16.mxu0 %v6300_v36 }
 0xd64   :  { %5182 = vmatpush1.bf16.msra.mxu0 %v6305_v44 }
 0xd65   :  { %5184 = vmatprep.subr.bf16.mxu0 %v6311_v49 }
 0xd68   :  { %5186 = vmatpush1.bf16.msra.mxu0 %v6320_v56 }
 0xd69   :  { %5236 = vmatprep.subr.bf16.mxu0 %v6280_v17 }
 0xd6b   :  { %4809 = vmatmul.mubr.msk.f32.vlgmr.msra.gmra.mrb[10].mxu0 %vm153_vm0, %v1593_v32 }
 0xd6c   :  { %5238 = vmatpush1.bf16.msra.mxu0 %v6285_v22  ;;  %2020 = vmatprep.mubr.f32.mxu0 %v6198_v61 }
 0xd6d   :  { %5240 = vmatprep.subr.bf16.mxu0 %v6291_v27 }
 0xd70   :  { %5242 = vmatpush1.bf16.msra.mxu0 %v6298_v35 }
 0xd71   :  { %5244 = vmatprep.subr.bf16.mxu0 %v6302_v40 }
 0xd74   :  { %5246 = vmatpush1.bf16.msra.mxu0 %v6309_v48 }
 0xd75   :  { %5248 = vmatprep.subr.bf16.mxu0 %v6314_v51 }
 0xd78   :  { %5250 = vmatpush1.bf16.msra.mxu0 %v6322_v58 }
 0xd79   :  { %5252 = vmatprep.subr.bf16.mxu0 %v6373_v53 }
 0xdf0   :  { %v1734_v43 = vpop.f32.mrb[10].mxu1 }
 0xdf1   :  { %v1736_v15 = vpop.f32.mrb[11].mxu1  ;;  %v1850_v38 = vadd.f32 %v1848_v52, %v1734_v43 }
 0xdf2   :  { %v1851_v29 = vadd.f32 %v1849_v42, %v1736_v15 }
 0xdf3   :  { %v4814_v55 = vmul.f32 -1.442695, %v1850_v38 }
 0xdf4   :  { %5887 = vtanh.f32 %v1851_v29  ;;  %v4815_v37 = vmul.f32 -1.442695, %v1851_v29 }
 0xdfe   :  { %v5888_v45 = vpop.eup %5887 }
 0xdff   :  { %1867 = vrot.lane.b32.xlu0 %v5888_v45, %s6197_s11 }
 0xe3e   :  { %v1663_v46 = vpop.f32.mrb[10].mxu0 }
 0xe3f   :  { %v1665_v23 = vpop.f32.mrb[11].mxu0  ;;  %v1739_v19 = vadd.f32 %v1663_v46, %v6359_v24 }
 0xe40   :  { %v1740_v47 = vadd.f32 %v1665_v23, %v6348_v9 }
 0xe41   :  { %v4811_v6 = vmul.f32 -1.442695, %v1739_v19 }
 0xe42   :  { %5889 = vtanh.f32 %v1740_v47 }
 0xe43   :  { %5891 = vpow2.f32 %v4814_v55 }
 0xe4c   :  { %v5890_v54 = vpop.eup %5889 }
 0xe4d   :  { %1758 = vrot.lane.b32.xlu1 %v5890_v54, %s6197_s11  ;;  %v5892_v63 = vpop.eup %5891 }
 0xe4e   :  { %v1858_v0 = vadd.f32 1.0, %v5892_v63  ;;  %v2136_v63 = vld [vmem:[#allocation3 + $0x70] sm:$0xff] }
 0xe50   :  { %5893 = vrcp.f32 %v1858_v0 }
 0xe51   :  { %5895 = vpow2.f32 %v4811_v6 }
 0xe5a   :  { %v5894_v2 = vpop.eup %5893 }
 0xe5b   :  { %v5896_v8 = vpop.eup %5895  ;;  %v1865_v57 = vmul.f32 %v5894_v2, %v6624_v7 }
 0xe5c   :  { %v1749_v12 = vadd.f32 1.0, %v5896_v8 }
 0xe5e   :  { %5897 = vrcp.f32 %v1749_v12 }
 0xe68   :  { %v5898_v50 = vpop.eup %5897 }
 0xe69   :  { %v1756_v32 = vmul.f32 %v5898_v50, %v6629_v14  ;;  %v4812_v14 = vmul.f32 -1.442695, %v1740_v47  ;;  %v2137_v47 = vld [vmem:[#allocation3 + $0x78] sm:$0xff] }
 0xe71   :  { %v1868_v3 = vpop.permute.xlu0 %1867 }
 0xe72   :  { %v1870_v1 = vmul.f32 %v5894_v2, %v1868_v3 }
 0xe74   :  { %1872 = vrot.lane.b32.xlu0 %v1870_v1, %s6197_s11 }
 0xebf   :  { %v1759_v20 = vpop.permute.xlu1 %1758 }
 0xec0   :  { %v1761_v21 = vmul.f32 %v5898_v50, %v1759_v20 }
 0xec2   :  { %1763 = vrot.lane.b32.xlu1 %v1761_v21, %s6197_s11 }
 0xee6   :  { %v1873_v25 = vpop.permute.xlu0 %1872 }
 0xee7   :  { %v6670_v28 = vadd.f32 %v1873_v25, %v1865_v57 }
 0xee9   :  { %5899 = vtanh.f32 %v6670_v28 }
 0xef3   :  { %v5900_v30 = vpop.eup %5899 }
 0xef4   :  { %1878 = vrot.lane.b32.xlu0 %v5900_v30, %s6197_s11 }
 0xf34   :  { %v1764_v41 = vpop.permute.xlu1 %1763 }
 0xf35   :  { %v6675_v33 = vadd.f32 %v1764_v41, %v1756_v32 }
 0xf37   :  { %5901 = vtanh.f32 %v6675_v33 }
 0xf38   :  { %5903 = vpow2.f32 %v4815_v37 }
 0xf41   :  { %v5902_v34 = vpop.eup %5901 }
 0xf42   :  { %1769 = vrot.lane.b32.xlu1 %v5902_v34, %s6197_s11  ;;  %v5904_v7 = vpop.eup %5903 }
 0xf43   :  { %v1859_v60 = vadd.f32 1.0, %v5904_v7 }
 0xf45   :  { %5905 = vrcp.f32 %v1859_v60 }
 0xf46   :  { %5907 = vpow2.f32 %v4812_v14 }
 0xf4f   :  { %v5906_v39 = vpop.eup %5905 }
 0xf50   :  { %v5908_v15 = vpop.eup %5907 }
 0xf51   :  { %v1750_v29 = vadd.f32 1.0, %v5908_v15 }
 0xf53   :  { %5909 = vrcp.f32 %v1750_v29 }
 0xf5d   :  { %v5910_v45 = vpop.eup %5909 }
 0xf66   :  { %v1879_v42 = vpop.permute.xlu0 %1878 }
 0xf67   :  { %v1881_v43 = vmul.f32 %v5906_v39, %v1879_v42 }
 0xf69   :  { %4817 = vmatmul.mubr.msk.f32.vlgmr.msra.gmra.mrb[12].mxu0 %vm153_vm0, %v1881_v43 }
 0xf6a   :  { %5254 = vmatpush1.bf16.msra.mxu0 %v6384_v59  ;;  %2128 = vmatprep.mubr.f32.mxu0 %v6198_v61 }
 0xf6b   :  { %5256 = vmatprep.subr.bf16.mxu0 %v6386_v62 }
 0xf6e   :  { %5258 = vmatpush1.bf16.msra.mxu0 %v6403_v4 }
 0xf6f   :  { %5260 = vmatprep.subr.bf16.mxu0 %v6406_v5 }
 0xf72   :  { %5262 = vmatpush1.bf16.msra.mxu0 %v6421_v10 }
 0xf73   :  { %5264 = vmatprep.subr.bf16.mxu0 %v6424_v11 }
 0xf76   :  { %5266 = vmatpush1.bf16.msra.mxu0 %v6433_v16 }
 0xf77   :  { %5268 = vmatprep.subr.bf16.mxu0 %v6278_v13 }
 0xfb4   :  { %v1770_v46 = vpop.permute.xlu1 %1769 }
 0xfb5   :  { %v1772_v23 = vmul.f32 %v5910_v45, %v1770_v46 }
 0xfb7   :  { %4813 = vmatmul.mubr.msk.f32.vlgmr.msra.gmra.mrb[12].mxu1 %vm153_vm0, %v1772_v23 }
 0xfb8   :  { %5222 = vmatpush1.bf16.msra.mxu1 %v6282_v18  ;;  %1949 = vmatprep.mubr.f32.mxu1 %v6198_v61 }
 0xfb9   :  { %5224 = vmatprep.subr.bf16.mxu1 %v6289_v26 }
 0xfbc   :  { %5226 = vmatpush1.bf16.msra.mxu1 %v6294_v31 }
 0xfbd   :  { %5228 = vmatprep.subr.bf16.mxu1 %v6300_v36 }
 0xfc0   :  { %5230 = vmatpush1.bf16.msra.mxu1 %v6305_v44 }
 0xfc1   :  { %5232 = vmatprep.subr.bf16.mxu1 %v6311_v49 }
 0xfc4   :  { %5234 = vmatpush1.bf16.msra.mxu1 %v6320_v56 }
 0xfc5   :  { %5284 = vmatprep.subr.bf16.mxu1 %v6280_v17 }
 0xfc7   :  { %4816 = vmatmul.mubr.msk.f32.vlgmr.msra.gmra.mrb[12].mxu1 %vm153_vm0, %v1881_v43 }
 0xfc8   :  { %5286 = vmatpush1.bf16.msra.mxu1 %v6285_v22  ;;  %2308 = vmatprep.mubr.f32.mxu1 %v6198_v61 }
 0xfc9   :  { %5288 = vmatprep.subr.bf16.mxu1 %v6291_v27 }
 0xfcc   :  { %5290 = vmatpush1.bf16.msra.mxu1 %v6298_v35 }
 0xfcd   :  { %5292 = vmatprep.subr.bf16.mxu1 %v6302_v40 }
 0xfd0   :  { %5294 = vmatpush1.bf16.msra.mxu1 %v6309_v48 }
 0xfd1   :  { %5296 = vmatprep.subr.bf16.mxu1 %v6314_v51 }
 0xfd4   :  { %5298 = vmatpush1.bf16.msra.mxu1 %v6322_v58 }
 0xfd5   :  { %5300 = vmatprep.subr.bf16.mxu1 %v6373_v53 }
0x103c   :  { %v2022_v54 = vpop.f32.mrb[12].mxu0 }
0x103d   :  { %v2024_v52 = vpop.f32.mrb[13].mxu0  ;;  %v2138_v1 = vadd.f32 %v2136_v63, %v2022_v54 }
0x103e   :  { %v2139_v38 = vadd.f32 %v2137_v47, %v2024_v52 }
0x103f   :  { %v4821_v19 = vmul.f32 -1.442695, %v2138_v1 }
0x1040   :  { %5911 = vtanh.f32 %v2139_v38  ;;  %v4822_v29 = vmul.f32 -1.442695, %v2139_v38 }
0x104a   :  { %v5912_v55 = vpop.eup %5911 }
0x104b   :  { %2155 = vrot.lane.b32.xlu0 %v5912_v55, %s6197_s11 }
0x109a   :  { %v1951_v0 = vpop.f32.mrb[12].mxu1 }
0x109b   :  { %v1953_v2 = vpop.f32.mrb[13].mxu1  ;;  %v2027_v57 = vadd.f32 %v1951_v0, %v6359_v24 }
0x109c   :  { %v2028_v3 = vadd.f32 %v1953_v2, %v6348_v9  ;;  %v2425_v2 = vld [vmem:[#allocation3 + $0x88] sm:$0xff] }
0x109d   :  { %v4818_v25 = vmul.f32 -1.442695, %v2027_v57 }
0x109e   :  { %5913 = vtanh.f32 %v2028_v3 }
0x109f   :  { %5915 = vpow2.f32 %v4821_v19 }
0x10a8   :  { %v5914_v6 = vpop.eup %5913 }
0x10a9   :  { %2046 = vrot.lane.b32.xlu1 %v5914_v6, %s6197_s11  ;;  %v5916_v8 = vpop.eup %5915 }
0x10aa   :  { %v2146_v12 = vadd.f32 1.0, %v5916_v8  ;;  %v2424_v8 = vld [vmem:[#allocation3 + $0x80] sm:$0xff] }
0x10ac   :  { %5917 = vrcp.f32 %v2146_v12 }
0x10ad   :  { %5919 = vpow2.f32 %v4818_v25 }
0x10b6   :  { %v5918_v50 = vpop.eup %5917 }
0x10b7   :  { %v5920_v30 = vpop.eup %5919  ;;  %v2153_v7 = vmul.f32 %v5918_v50, %v6670_v28 }
0x10b8   :  { %v2037_v32 = vadd.f32 1.0, %v5920_v30 }
0x10ba   :  { %5921 = vrcp.f32 %v2037_v32 }
0x10bd   :  { %v2156_v20 = vpop.permute.xlu0 %2155 }
0x10be   :  { %v2158_v21 = vmul.f32 %v5918_v50, %v2156_v20 }
0x10c0   :  { %2160 = vrot.lane.b32.xlu0 %v2158_v21, %s6197_s11 }
0x10c4   :  { %v5922_v41 = vpop.eup %5921 }
0x10c5   :  { %v2044_v43 = vmul.f32 %v5922_v41, %v6675_v33  ;;  %v4819_v33 = vmul.f32 -1.442695, %v2028_v3 }
0x111b   :  { %v2047_v34 = vpop.permute.xlu1 %2046 }
0x111c   :  { %v2049_v37 = vmul.f32 %v5922_v41, %v2047_v34 }
0x111e   :  { %2051 = vrot.lane.b32.xlu1 %v2049_v37, %s6197_s11 }
0x1132   :  { %v2161_v60 = vpop.permute.xlu0 %2160 }
0x1133   :  { %v6716_v39 = vadd.f32 %v2161_v60, %v2153_v7 }
0x1135   :  { %5923 = vtanh.f32 %v6716_v39 }
0x113f   :  { %v5924_v42 = vpop.eup %5923 }
0x1140   :  { %2166 = vrot.lane.b32.xlu0 %v5924_v42, %s6197_s11 }
0x1190   :  { %v2052_v14 = vpop.permute.xlu1 %2051 }
0x1191   :  { %v6721_v15 = vadd.f32 %v2052_v14, %v2044_v43 }
0x1193   :  { %5925 = vtanh.f32 %v6721_v15 }
0x1194   :  { %5927 = vpow2.f32 %v4822_v29 }
0x119d   :  { %v5926_v45 = vpop.eup %5925 }
0x119e   :  { %2057 = vrot.lane.b32.xlu1 %v5926_v45, %s6197_s11  ;;  %v5928_v28 = vpop.eup %5927 }
0x119f   :  { %v2147_v46 = vadd.f32 1.0, %v5928_v28 }
0x11a1   :  { %5929 = vrcp.f32 %v2147_v46 }
0x11a2   :  { %5931 = vpow2.f32 %v4819_v33 }
0x11ab   :  { %v5930_v23 = vpop.eup %5929 }
0x11ac   :  { %v5932_v52 = vpop.eup %5931 }
0x11ad   :  { %v2038_v38 = vadd.f32 1.0, %v5932_v52 }
0x11af   :  { %5933 = vrcp.f32 %v2038_v38 }
0x11b2   :  { %v2167_v47 = vpop.permute.xlu0 %2166 }
0x11b3   :  { %v2169_v54 = vmul.f32 %v5930_v23, %v2167_v47 }
0x11b5   :  { %4824 = vmatmul.mubr.msk.f32.vlgmr.msra.gmra.mrb[14].mxu1 %vm153_vm0, %v2169_v54 }
0x11b6   :  { %5302 = vmatpush1.bf16.msra.mxu1 %v6384_v59  ;;  %2416 = vmatprep.mubr.f32.mxu1 %v6198_v61 }
0x11b7   :  { %5304 = vmatprep.subr.bf16.mxu1 %v6386_v62 }
0x11b9   :  { %v5934_v55 = vpop.eup %5933 }
0x11ba   :  { %5306 = vmatpush1.bf16.msra.mxu1 %v6403_v4 }
0x11bb   :  { %5308 = vmatprep.subr.bf16.mxu1 %v6406_v5 }
0x11be   :  { %5310 = vmatpush1.bf16.msra.mxu1 %v6421_v10 }
0x11bf   :  { %5312 = vmatprep.subr.bf16.mxu1 %v6424_v11 }
0x11c2   :  { %5314 = vmatpush1.bf16.msra.mxu1 %v6433_v16 }
0x11c3   :  { %5316 = vmatprep.subr.bf16.mxu1 %v6278_v13 }
0x1210   :  { %v2058_v63 = vpop.permute.xlu1 %2057 }
0x1211   :  { %v2060_v0 = vmul.f32 %v5934_v55, %v2058_v63 }
0x1213   :  { %4820 = vmatmul.mubr.msk.f32.vlgmr.msra.gmra.mrb[14].mxu0 %vm153_vm0, %v2060_v0 }
0x1214   :  { %5270 = vmatpush1.bf16.msra.mxu0 %v6282_v18  ;;  %2237 = vmatprep.mubr.f32.mxu0 %v6198_v61 }
0x1215   :  { %5272 = vmatprep.subr.bf16.mxu0 %v6289_v26 }
0x1218   :  { %5274 = vmatpush1.bf16.msra.mxu0 %v6294_v31 }
0x1219   :  { %5276 = vmatprep.subr.bf16.mxu0 %v6300_v36 }
0x121c   :  { %5278 = vmatpush1.bf16.msra.mxu0 %v6305_v44 }
0x121d   :  { %5280 = vmatprep.subr.bf16.mxu0 %v6311_v49 }
0x1220   :  { %5282 = vmatpush1.bf16.msra.mxu0 %v6320_v56 }
0x1221   :  { %5332 = vmatprep.subr.bf16.mxu0 %v6280_v17 }
0x1223   :  { %4823 = vmatmul.mubr.msk.f32.vlgmr.msra.gmra.mrb[14].mxu0 %vm153_vm0, %v2169_v54 }
0x1224   :  { %5334 = vmatpush1.bf16.msra.mxu0 %v6285_v22  ;;  %2596 = vmatprep.mubr.f32.mxu0 %v6198_v61 }
0x1225   :  { %5336 = vmatprep.subr.bf16.mxu0 %v6291_v27 }
0x1228   :  { %5338 = vmatpush1.bf16.msra.mxu0 %v6298_v35 }
0x1229   :  { %5340 = vmatprep.subr.bf16.mxu0 %v6302_v40 }
0x122c   :  { %5342 = vmatpush1.bf16.msra.mxu0 %v6309_v48 }
0x122d   :  { %5344 = vmatprep.subr.bf16.mxu0 %v6314_v51 }
0x1230   :  { %5346 = vmatpush1.bf16.msra.mxu0 %v6322_v58 }
0x1231   :  { %5348 = vmatprep.subr.bf16.mxu0 %v6373_v53 }
0x1288   :  { %v2310_v3 = vpop.f32.mrb[14].mxu1 }
0x1289   :  { %v2312_v1 = vpop.f32.mrb[15].mxu1  ;;  %v2426_v12 = vadd.f32 %v2424_v8, %v2310_v3 }
0x128a   :  { %v2427_v19 = vadd.f32 %v2425_v2, %v2312_v1 }
0x128b   :  { %v4828_v50 = vmul.f32 -1.442695, %v2426_v12 }
0x128c   :  { %5935 = vtanh.f32 %v2427_v19  ;;  %v4829_v54 = vmul.f32 -1.442695, %v2427_v19 }
0x128d   :  { %5937 = vpow2.f32 %v4828_v50  ;;  %v2713_v50 = vld [vmem:[#allocation3 + $0x98] sm:$0xff] }
0x1296   :  { %v5936_v6 = vpop.eup %5935 }
0x1297   :  { %2443 = vrot.lane.b32.xlu0 %v5936_v6, %s6197_s11  ;;  %v5938_v25 = vpop.eup %5937 }
0x1298   :  { %v2434_v30 = vadd.f32 1.0, %v5938_v25 }
0x12f6   :  { %v2239_v20 = vpop.f32.mrb[14].mxu0 }
0x12f7   :  { %v2241_v21 = vpop.f32.mrb[15].mxu0  ;;  %v2315_v7 = vadd.f32 %v2239_v20, %v6359_v24 }
0x12f8   :  { %v2316_v57 = vadd.f32 %v2241_v21, %v6348_v9 }
0x12f9   :  { %v4825_v60 = vmul.f32 -1.442695, %v2315_v7 }
0x12fa   :  { %5939 = vtanh.f32 %v2316_v57 }
0x12fb   :  { %5941 = vrcp.f32 %v2434_v30  ;;  %v2712_v30 = vld [vmem:[#allocation3 + $0x90] sm:$0xff] }
0x12fc   :  { %5943 = vpow2.f32 %v4825_v60 }
0x1304   :  { %v5940_v32 = vpop.eup %5939 }
0x1305   :  { %2334 = vrot.lane.b32.xlu1 %v5940_v32, %s6197_s11  ;;  %v5942_v41 = vpop.eup %5941 }
0x1306   :  { %v5944_v42 = vpop.eup %5943  ;;  %v2441_v28 = vmul.f32 %v5942_v41, %v6716_v39 }
0x1307   :  { %v2325_v43 = vadd.f32 1.0, %v5944_v42 }
0x1309   :  { %v2444_v34 = vpop.permute.xlu0 %2443  ;;  %5945 = vrcp.f32 %v2325_v43 }
0x130a   :  { %v2446_v37 = vmul.f32 %v5942_v41, %v2444_v34 }
0x130c   :  { %2448 = vrot.lane.b32.xlu0 %v2446_v37, %s6197_s11 }
0x1313   :  { %v5946_v14 = vpop.eup %5945 }
0x1314   :  { %v2332_v33 = vmul.f32 %v5946_v14, %v6721_v15  ;;  %v4826_v15 = vmul.f32 -1.442695, %v2316_v57 }
0x1377   :  { %v2335_v29 = vpop.permute.xlu1 %2334 }
0x1378   :  { %v2337_v45 = vmul.f32 %v5946_v14, %v2335_v29 }
0x137a   :  { %2339 = vrot.lane.b32.xlu1 %v2337_v45, %s6197_s11 }
0x137e   :  { %v2449_v46 = vpop.permute.xlu0 %2448 }
0x137f   :  { %v6762_v23 = vadd.f32 %v2449_v46, %v2441_v28 }
0x1381   :  { %5947 = vtanh.f32 %v6762_v23 }
0x1382   :  { %5949 = vpow2.f32 %v4829_v54 }
0x138b   :  { %v5948_v47 = vpop.eup %5947 }
0x138c   :  { %2454 = vrot.lane.b32.xlu0 %v5948_v47, %s6197_s11  ;;  %v5950_v55 = vpop.eup %5949 }
0x138d   :  { %v2435_v63 = vadd.f32 1.0, %v5950_v55 }
0x13ec   :  { %v2340_v52 = vpop.permute.xlu1 %2339 }
0x13ed   :  { %v6767_v38 = vadd.f32 %v2340_v52, %v2332_v33 }
0x13ef   :  { %5951 = vtanh.f32 %v6767_v38 }
0x13f0   :  { %5953 = vrcp.f32 %v2435_v63 }
0x13f1   :  { %5955 = vpow2.f32 %v4826_v15 }
0x13f9   :  { %v5952_v39 = vpop.eup %5951 }
0x13fa   :  { %2345 = vrot.lane.b32.xlu1 %v5952_v39, %s6197_s11  ;;  %v5954_v0 = vpop.eup %5953 }
0x13fb   :  { %v5956_v1 = vpop.eup %5955 }
0x13fc   :  { %v2326_v19 = vadd.f32 1.0, %v5956_v1 }
0x13fe   :  { %v2455_v2 = vpop.permute.xlu0 %2454  ;;  %5957 = vrcp.f32 %v2326_v19 }
0x13ff   :  { %v2457_v3 = vmul.f32 %v5954_v0, %v2455_v2 }
0x1401   :  { %4831 = vmatmul.mubr.msk.f32.vlgmr.msra.gmra.mrb[16].mxu0 %vm153_vm0, %v2457_v3 }
0x1402   :  { %5350 = vmatpush1.bf16.msra.mxu0 %v6384_v59  ;;  %2704 = vmatprep.mubr.f32.mxu0 %v6198_v61 }
0x1403   :  { %5352 = vmatprep.subr.bf16.mxu0 %v6386_v62 }
0x1406   :  { %5354 = vmatpush1.bf16.msra.mxu0 %v6403_v4 }
0x1407   :  { %5356 = vmatprep.subr.bf16.mxu0 %v6406_v5 }
0x1408   :  { %v5958_v6 = vpop.eup %5957 }
0x140a   :  { %5358 = vmatpush1.bf16.msra.mxu0 %v6421_v10 }
0x140b   :  { %5360 = vmatprep.subr.bf16.mxu0 %v6424_v11 }
0x140e   :  { %5362 = vmatpush1.bf16.msra.mxu0 %v6433_v16 }
0x140f   :  { %5364 = vmatprep.subr.bf16.mxu0 %v6278_v13 }
0x146c   :  { %v2346_v8 = vpop.permute.xlu1 %2345 }
0x146d   :  { %v2348_v12 = vmul.f32 %v5958_v6, %v2346_v8 }
0x146f   :  { %4827 = vmatmul.mubr.msk.f32.vlgmr.msra.gmra.mrb[16].mxu1 %vm153_vm0, %v2348_v12 }
0x1470   :  { %5318 = vmatpush1.bf16.msra.mxu1 %v6282_v18  ;;  %2525 = vmatprep.mubr.f32.mxu1 %v6198_v61 }
0x1471   :  { %5320 = vmatprep.subr.bf16.mxu1 %v6289_v26 }
0x1474   :  { %5322 = vmatpush1.bf16.msra.mxu1 %v6294_v31 }
0x1475   :  { %5324 = vmatprep.subr.bf16.mxu1 %v6300_v36 }
0x1478   :  { %5326 = vmatpush1.bf16.msra.mxu1 %v6305_v44 }
0x1479   :  { %5328 = vmatprep.subr.bf16.mxu1 %v6311_v49 }
0x147c   :  { %5330 = vmatpush1.bf16.msra.mxu1 %v6320_v56 }
0x147d   :  { %5380 = vmatprep.subr.bf16.mxu1 %v6280_v17 }
0x147f   :  { %4830 = vmatmul.mubr.msk.f32.vlgmr.msra.gmra.mrb[16].mxu1 %vm153_vm0, %v2457_v3 }
0x1480   :  { %5382 = vmatpush1.bf16.msra.mxu1 %v6285_v22  ;;  %2884 = vmatprep.mubr.f32.mxu1 %v6198_v61 }
0x1481   :  { %5384 = vmatprep.subr.bf16.mxu1 %v6291_v27 }
0x1484   :  { %5386 = vmatpush1.bf16.msra.mxu1 %v6298_v35 }
0x1485   :  { %5388 = vmatprep.subr.bf16.mxu1 %v6302_v40 }
0x1488   :  { %5390 = vmatpush1.bf16.msra.mxu1 %v6309_v48 }
0x1489   :  { %5392 = vmatprep.subr.bf16.mxu1 %v6314_v51 }
0x148c   :  { %5394 = vmatpush1.bf16.msra.mxu1 %v6322_v58 }
0x148d   :  { %5396 = vmatprep.subr.bf16.mxu1 %v6373_v53 }
0x14d4   :  { %v2598_v20 = vpop.f32.mrb[16].mxu0 }
0x14d5   :  { %v2600_v21 = vpop.f32.mrb[17].mxu0  ;;  %v2714_v32 = vadd.f32 %v2712_v30, %v2598_v20 }
0x14d6   :  { %v2715_v57 = vadd.f32 %v2713_v50, %v2600_v21 }
0x14d7   :  { %v4835_v41 = vmul.f32 -1.442695, %v2714_v32 }
0x14d8   :  { %5959 = vtanh.f32 %v2715_v57  ;;  %v4836_v3 = vmul.f32 -1.442695, %v2715_v57 }
0x14d9   :  { %5961 = vpow2.f32 %v4835_v41  ;;  %v3001_v41 = vld [vmem:[#allocation3 + $0xa8] sm:$0xff] }
0x14e2   :  { %v5960_v25 = vpop.eup %5959 }
0x14e3   :  { %2731 = vrot.lane.b32.xlu0 %v5960_v25, %s6197_s11  ;;  %v5962_v34 = vpop.eup %5961 }
0x14e4   :  { %v2722_v37 = vadd.f32 1.0, %v5962_v34 }
0x14e6   :  { %5963 = vrcp.f32 %v2722_v37 }
0x14f0   :  { %v5964_v43 = vpop.eup %5963 }
0x14f1   :  { %v2729_v33 = vmul.f32 %v5964_v43, %v6762_v23 }
0x1552   :  { %v2527_v7 = vpop.f32.mrb[16].mxu1 }
0x1553   :  { %v2529_v60 = vpop.f32.mrb[17].mxu1  ;;  %v2603_v28 = vadd.f32 %v2527_v7, %v6359_v24 }
0x1554   :  { %v2604_v42 = vadd.f32 %v2529_v60, %v6348_v9 }
0x1555   :  { %v2732_v14 = vpop.permute.xlu0 %2731  ;;  %v4832_v46 = vmul.f32 -1.442695, %v2603_v28 }
0x1556   :  { %5965 = vtanh.f32 %v2604_v42  ;;  %v2734_v29 = vmul.f32 %v5964_v43, %v2732_v14 }
0x1557   :  { %5967 = vpow2.f32 %v4832_v46 }
0x1558   :  { %2736 = vrot.lane.b32.xlu0 %v2734_v29, %s6197_s11 }
0x1560   :  { %v5966_v45 = vpop.eup %5965 }
0x1561   :  { %2622 = vrot.lane.b32.xlu1 %v5966_v45, %s6197_s11  ;;  %v5968_v47 = vpop.eup %5967 }
0x1562   :  { %v2613_v54 = vadd.f32 1.0, %v5968_v47 }
0x1564   :  { %5969 = vrcp.f32 %v2613_v54 }
0x156e   :  { %v5970_v63 = vpop.eup %5969 }
0x156f   :  { %v2620_v23 = vmul.f32 %v5970_v63, %v6767_v38  ;;  %v4833_v38 = vmul.f32 -1.442695, %v2604_v42  ;;  %v3000_v42 = vld [vmem:[#allocation3 + $0xa0] sm:$0xff] }
0x15ca   :  { %v2737_v52 = vpop.permute.xlu0 %2736 }
0x15cb   :  { %v6807_v55 = vadd.f32 %v2737_v52, %v2729_v33 }
0x15cd   :  { %5971 = vtanh.f32 %v6807_v55 }
0x15ce   :  { %5973 = vpow2.f32 %v4836_v3 }
0x15d3   :  { %v2623_v39 = vpop.permute.xlu1 %2622 }
0x15d4   :  { %v2625_v0 = vmul.f32 %v5970_v63, %v2623_v39 }
0x15d6   :  { %2627 = vrot.lane.b32.xlu1 %v2625_v0, %s6197_s11 }
0x15d7   :  { %v5972_v2 = vpop.eup %5971 }
0x15d8   :  { %2742 = vrot.lane.b32.xlu0 %v5972_v2, %s6197_s11  ;;  %v5974_v15 = vpop.eup %5973 }
0x15d9   :  { %v2723_v1 = vadd.f32 1.0, %v5974_v15 }
0x15db   :  { %5975 = vrcp.f32 %v2723_v1 }
0x15e5   :  { %v5976_v8 = vpop.eup %5975 }
0x1648   :  { %v2628_v19 = vpop.permute.xlu1 %2627 }
0x1649   :  { %v6813_v6 = vadd.f32 %v2628_v19, %v2620_v23 }
0x164a   :  { %v2743_v12 = vpop.permute.xlu0 %2742 }
0x164b   :  { %5977 = vtanh.f32 %v6813_v6  ;;  %v2745_v50 = vmul.f32 %v5976_v8, %v2743_v12 }
0x164c   :  { %5979 = vpow2.f32 %v4833_v38 }
0x164d   :  { %4838 = vmatmul.mubr.msk.f32.vlgmr.msra.gmra.mrb[18].mxu1 %vm153_vm0, %v2745_v50 }
0x164e   :  { %5398 = vmatpush1.bf16.msra.mxu1 %v6384_v59  ;;  %2992 = vmatprep.mubr.f32.mxu1 %v6198_v61 }
0x164f   :  { %5400 = vmatprep.subr.bf16.mxu1 %v6386_v62 }
0x1652   :  { %5402 = vmatpush1.bf16.msra.mxu1 %v6403_v4 }
0x1653   :  { %5404 = vmatprep.subr.bf16.mxu1 %v6406_v5 }
0x1655   :  { %v5978_v20 = vpop.eup %5977 }
0x1656   :  { %2633 = vrot.lane.b32.xlu1 %v5978_v20, %s6197_s11  ;;  %5406 = vmatpush1.bf16.msra.mxu1 %v6421_v10  ;;  %v5980_v21 = vpop.eup %5979 }
0x1657   :  { %5408 = vmatprep.subr.bf16.mxu1 %v6424_v11  ;;  %v2614_v57 = vadd.f32 1.0, %v5980_v21 }
0x1659   :  { %5981 = vrcp.f32 %v2614_v57 }
0x165a   :  { %5410 = vmatpush1.bf16.msra.mxu1 %v6433_v16 }
0x165b   :  { %5412 = vmatprep.subr.bf16.mxu1 %v6278_v13 }
0x1663   :  { %v5982_v25 = vpop.eup %5981 }
0x16c8   :  { %v2634_v30 = vpop.permute.xlu1 %2633 }
0x16c9   :  { %v2636_v32 = vmul.f32 %v5982_v25, %v2634_v30 }
0x16cb   :  { %4834 = vmatmul.mubr.msk.f32.vlgmr.msra.gmra.mrb[18].mxu0 %vm153_vm0, %v2636_v32 }
0x16cc   :  { %5366 = vmatpush1.bf16.msra.mxu0 %v6282_v18  ;;  %2813 = vmatprep.mubr.f32.mxu0 %v6198_v61 }
0x16cd   :  { %5368 = vmatprep.subr.bf16.mxu0 %v6289_v26 }
0x16d0   :  { %5370 = vmatpush1.bf16.msra.mxu0 %v6294_v31 }
0x16d1   :  { %5372 = vmatprep.subr.bf16.mxu0 %v6300_v36 }
0x16d4   :  { %5374 = vmatpush1.bf16.msra.mxu0 %v6305_v44 }
0x16d5   :  { %5376 = vmatprep.subr.bf16.mxu0 %v6311_v49 }
0x16d8   :  { %5378 = vmatpush1.bf16.msra.mxu0 %v6320_v56 }
0x16d9   :  { %5428 = vmatprep.subr.bf16.mxu0 %v6280_v17 }
0x16db   :  { %4837 = vmatmul.mubr.msk.f32.vlgmr.msra.gmra.mrb[18].mxu0 %vm153_vm0, %v2745_v50 }
0x16dc   :  { %5430 = vmatpush1.bf16.msra.mxu0 %v6285_v22  ;;  %3172 = vmatprep.mubr.f32.mxu0 %v6198_v61 }
0x16dd   :  { %5432 = vmatprep.subr.bf16.mxu0 %v6291_v27 }
0x16e0   :  { %5434 = vmatpush1.bf16.msra.mxu0 %v6298_v35 }
0x16e1   :  { %5436 = vmatprep.subr.bf16.mxu0 %v6302_v40 }
0x16e4   :  { %5438 = vmatpush1.bf16.msra.mxu0 %v6309_v48 }
0x16e5   :  { %5440 = vmatprep.subr.bf16.mxu0 %v6314_v51 }
0x16e8   :  { %5442 = vmatpush1.bf16.msra.mxu0 %v6322_v58 }
0x16e9   :  { %5444 = vmatprep.subr.bf16.mxu0 %v6373_v53 }
0x1720   :  { %v2886_v34 = vpop.f32.mrb[18].mxu1 }
0x1721   :  { %v2888_v37 = vpop.f32.mrb[19].mxu1  ;;  %v3002_v43 = vadd.f32 %v3000_v42, %v2886_v34 }
0x1722   :  { %v3003_v7 = vadd.f32 %v3001_v41, %v2888_v37 }
0x1723   :  { %v4842_v14 = vmul.f32 -1.442695, %v3002_v43 }
0x1724   :  { %5983 = vtanh.f32 %v3003_v7  ;;  %v4843_v20 = vmul.f32 -1.442695, %v3003_v7 }
0x1725   :  { %5985 = vpow2.f32 %v4842_v14  ;;  %v3289_v14 = vld [vmem:[#allocation3 + $0xb8] sm:$0xff] }
0x172e   :  { %v5984_v60 = vpop.eup %5983 }
0x172f   :  { %3019 = vrot.lane.b32.xlu0 %v5984_v60, %s6197_s11  ;;  %v5986_v29 = vpop.eup %5985 }
0x1730   :  { %v3010_v45 = vadd.f32 1.0, %v5986_v29 }
0x1732   :  { %5987 = vrcp.f32 %v3010_v45 }
0x173c   :  { %v5988_v28 = vpop.eup %5987 }
0x173d   :  { %v3017_v2 = vmul.f32 %v5988_v28, %v6807_v55 }
0x17a1   :  { %v3020_v46 = vpop.permute.xlu0 %3019 }
0x17a2   :  { %v3022_v47 = vmul.f32 %v5988_v28, %v3020_v46 }
0x17a4   :  { %3024 = vrot.lane.b32.xlu0 %v3022_v47, %s6197_s11  ;;  %v3288_v47 = vld [vmem:[#allocation3 + $0xb0] sm:$0xff] }
0x17ae   :  { %v2815_v54 = vpop.f32.mrb[18].mxu0 }
0x17af   :  { %v2817_v33 = vpop.f32.mrb[19].mxu0  ;;  %v2891_v39 = vadd.f32 %v2815_v54, %v6359_v24 }
0x17b0   :  { %v2892_v52 = vadd.f32 %v2817_v33, %v6348_v9 }
0x17b1   :  { %v4839_v0 = vmul.f32 -1.442695, %v2891_v39 }
0x17b2   :  { %5989 = vtanh.f32 %v2892_v52  ;;  %v4840_v37 = vmul.f32 -1.442695, %v2892_v52 }
0x17b3   :  { %5991 = vpow2.f32 %v4839_v0 }
0x17bc   :  { %v5990_v63 = vpop.eup %5989 }
0x17bd   :  { %2910 = vrot.lane.b32.xlu1 %v5990_v63, %s6197_s11  ;;  %v5992_v1 = vpop.eup %5991 }
0x17be   :  { %v2901_v23 = vadd.f32 1.0, %v5992_v1 }
0x1816   :  { %v3025_v3 = vpop.permute.xlu0 %3024 }
0x1817   :  { %v6853_v15 = vadd.f32 %v3025_v3, %v3017_v2 }
0x1819   :  { %5993 = vtanh.f32 %v6853_v15 }
0x181a   :  { %5995 = vrcp.f32 %v2901_v23 }
0x181b   :  { %5997 = vpow2.f32 %v4843_v20 }
0x1823   :  { %v5994_v19 = vpop.eup %5993 }
0x1824   :  { %3030 = vrot.lane.b32.xlu0 %v5994_v19, %s6197_s11  ;;  %v5996_v8 = vpop.eup %5995 }
0x1825   :  { %v5998_v38 = vpop.eup %5997  ;;  %v2908_v30 = vmul.f32 %v5996_v8, %v6813_v6 }
0x1826   :  { %v3011_v55 = vadd.f32 1.0, %v5998_v38 }
0x1828   :  { %5999 = vrcp.f32 %v3011_v55 }
0x182f   :  { %v2911_v12 = vpop.permute.xlu1 %2910 }
0x1830   :  { %v2913_v50 = vmul.f32 %v5996_v8, %v2911_v12 }
0x1832   :  { %2915 = vrot.lane.b32.xlu1 %v2913_v50, %s6197_s11  ;;  %v6000_v21 = vpop.eup %5999 }
0x1896   :  { %v3031_v57 = vpop.permute.xlu0 %3030 }
0x1897   :  { %v3033_v25 = vmul.f32 %v6000_v21, %v3031_v57 }
0x1899   :  { %4845 = vmatmul.mubr.msk.f32.vlgmr.msra.gmra.mrb[20].mxu0 %vm153_vm0, %v3033_v25 }
0x189a   :  { %5446 = vmatpush1.bf16.msra.mxu0 %v6384_v59  ;;  %3280 = vmatprep.mubr.f32.mxu0 %v6198_v61 }
0x189b   :  { %5448 = vmatprep.subr.bf16.mxu0 %v6386_v62 }
0x189e   :  { %5450 = vmatpush1.bf16.msra.mxu0 %v6403_v4 }
0x189f   :  { %5452 = vmatprep.subr.bf16.mxu0 %v6406_v5 }
0x18a2   :  { %5454 = vmatpush1.bf16.msra.mxu0 %v6421_v10 }
0x18a3   :  { %5456 = vmatprep.subr.bf16.mxu0 %v6424_v11 }
0x18a4   :  { %v2916_v32 = vpop.permute.xlu1 %2915 }
0x18a5   :  { %v6865_v41 = vadd.f32 %v2916_v32, %v2908_v30 }
0x18a6   :  { %5458 = vmatpush1.bf16.msra.mxu0 %v6433_v16 }
0x18a7   :  { %6001 = vtanh.f32 %v6865_v41  ;;  %5460 = vmatprep.subr.bf16.mxu0 %v6278_v13 }
0x18a8   :  { %6003 = vpow2.f32 %v4840_v37 }
0x18b1   :  { %v6002_v34 = vpop.eup %6001 }
0x18b2   :  { %2921 = vrot.lane.b32.xlu1 %v6002_v34, %s6197_s11  ;;  %v6004_v7 = vpop.eup %6003 }
0x18b3   :  { %v2902_v6 = vadd.f32 1.0, %v6004_v7 }
0x18b5   :  { %6005 = vrcp.f32 %v2902_v6 }
0x18bf   :  { %v6006_v60 = vpop.eup %6005 }
0x1924   :  { %v2922_v42 = vpop.permute.xlu1 %2921 }
0x1925   :  { %v2924_v43 = vmul.f32 %v6006_v60, %v2922_v42 }
0x1927   :  { %4841 = vmatmul.mubr.msk.f32.vlgmr.msra.gmra.mrb[20].mxu1 %vm153_vm0, %v2924_v43 }
0x1928   :  { %5414 = vmatpush1.bf16.msra.mxu1 %v6282_v18  ;;  %3101 = vmatprep.mubr.f32.mxu1 %v6198_v61 }
0x1929   :  { %5416 = vmatprep.subr.bf16.mxu1 %v6289_v26 }
0x192c   :  { %5418 = vmatpush1.bf16.msra.mxu1 %v6294_v31 }
0x192d   :  { %5420 = vmatprep.subr.bf16.mxu1 %v6300_v36 }
0x1930   :  { %5422 = vmatpush1.bf16.msra.mxu1 %v6305_v44 }
0x1931   :  { %5424 = vmatprep.subr.bf16.mxu1 %v6311_v49 }
0x1934   :  { %5426 = vmatpush1.bf16.msra.mxu1 %v6320_v56 }
0x1935   :  { %5476 = vmatprep.subr.bf16.mxu1 %v6280_v17 }
0x1937   :  { %4844 = vmatmul.mubr.msk.f32.vlgmr.msra.gmra.mrb[20].mxu1 %vm153_vm0, %v3033_v25 }
0x1938   :  { %5478 = vmatpush1.bf16.msra.mxu1 %v6285_v22  ;;  %3460 = vmatprep.mubr.f32.mxu1 %v6198_v61 }
0x1939   :  { %5480 = vmatprep.subr.bf16.mxu1 %v6291_v27 }
0x193c   :  { %5482 = vmatpush1.bf16.msra.mxu1 %v6298_v35 }
0x193d   :  { %5484 = vmatprep.subr.bf16.mxu1 %v6302_v40 }
0x1940   :  { %5486 = vmatpush1.bf16.msra.mxu1 %v6309_v48 }
0x1941   :  { %5488 = vmatprep.subr.bf16.mxu1 %v6314_v51 }
0x1944   :  { %5490 = vmatpush1.bf16.msra.mxu1 %v6322_v58 }
0x1945   :  { %5492 = vmatprep.subr.bf16.mxu1 %v6373_v53 }
0x196c   :  { %v3174_v29 = vpop.f32.mrb[20].mxu0 }
0x196d   :  { %v3176_v45 = vpop.f32.mrb[21].mxu0  ;;  %v3290_v54 = vadd.f32 %v3288_v47, %v3174_v29 }
0x196e   :  { %v3291_v28 = vadd.f32 %v3289_v14, %v3176_v45 }
0x196f   :  { %v4849_v33 = vmul.f32 -1.442695, %v3290_v54 }
0x1970   :  { %6007 = vtanh.f32 %v3291_v28 }
0x1971   :  { %6009 = vpow2.f32 %v4849_v33 }
0x197a   :  { %v6008_v46 = vpop.eup %6007 }
0x197b   :  { %3307 = vrot.lane.b32.xlu0 %v6008_v46, %s6197_s11  ;;  %v6010_v52 = vpop.eup %6009 }
0x197c   :  { %v3298_v63 = vadd.f32 1.0, %v6010_v52 }
0x197e   :  { %6011 = vrcp.f32 %v3298_v63 }
0x1988   :  { %v6012_v39 = vpop.eup %6011 }
0x1989   :  { %v3305_v8 = vmul.f32 %v6012_v39, %v6853_v15  ;;  %v4850_v15 = vmul.f32 -1.442695, %v3291_v28 }
0x19ed   :  { %v3308_v0 = vpop.permute.xlu0 %3307 }
0x19ee   :  { %v3310_v2 = vmul.f32 %v6012_v39, %v3308_v0 }
0x19f0   :  { %3312 = vrot.lane.b32.xlu0 %v3310_v2, %s6197_s11  ;;  %v3576_v2 = vld [vmem:[#allocation3 + $0xc0] sm:$0xff] }
0x1a0a   :  { %v3103_v3 = vpop.f32.mrb[20].mxu1 }
0x1a0b   :  { %v3105_v1 = vpop.f32.mrb[21].mxu1  ;;  %v3179_v20 = vadd.f32 %v3103_v3, %v6359_v24 }
0x1a0c   :  { %v3180_v23 = vadd.f32 %v3105_v1, %v6348_v9 }
0x1a0d   :  { %v4846_v38 = vmul.f32 -1.442695, %v3179_v20 }
0x1a0e   :  { %6013 = vtanh.f32 %v3180_v23  ;;  %v4847_v45 = vmul.f32 -1.442695, %v3180_v23 }
0x1a18   :  { %v6014_v19 = vpop.eup %6013 }
0x1a19   :  { %3198 = vrot.lane.b32.xlu1 %v6014_v19, %s6197_s11 }
0x1a62   :  { %v3313_v12 = vpop.permute.xlu0 %3312 }
0x1a63   :  { %v6898_v50 = vadd.f32 %v3313_v12, %v3305_v8 }
0x1a65   :  { %6015 = vtanh.f32 %v6898_v50 }
0x1a66   :  { %6017 = vpow2.f32 %v4846_v38 }
0x1a6f   :  { %v6016_v55 = vpop.eup %6015 }
0x1a70   :  { %3318 = vrot.lane.b32.xlu0 %v6016_v55, %s6197_s11  ;;  %v6018_v21 = vpop.eup %6017 }
0x1a71   :  { %v3189_v57 = vadd.f32 1.0, %v6018_v21 }
0x1a73   :  { %6019 = vrcp.f32 %v3189_v57 }
0x1a74   :  { %6021 = vpow2.f32 %v4850_v15 }
0x1a7d   :  { %v6020_v25 = vpop.eup %6019 }
0x1a7e   :  { %v6022_v34 = vpop.eup %6021  ;;  %v3196_v42 = vmul.f32 %v6020_v25, %v6865_v41  ;;  %v3577_v41 = vld [vmem:[#allocation3 + $0xc8] sm:$0xff] }
0x1a7f   :  { %v3299_v37 = vadd.f32 1.0, %v6022_v34 }
0x1a81   :  { %6023 = vrcp.f32 %v3299_v37 }
0x1a8b   :  { %v3199_v30 = vpop.permute.xlu1 %3198  ;;  %v6024_v7 = vpop.eup %6023 }
0x1a8c   :  { %v3201_v32 = vmul.f32 %v6020_v25, %v3199_v30 }
0x1a8e   :  { %3203 = vrot.lane.b32.xlu1 %v3201_v32, %s6197_s11 }
0x1ae2   :  { %v3319_v6 = vpop.permute.xlu0 %3318 }
0x1ae3   :  { %v3321_v60 = vmul.f32 %v6024_v7, %v3319_v6 }
0x1ae5   :  { %4852 = vmatmul.mubr.msk.f32.vlgmr.msra.gmra.mrb[22].mxu1 %vm153_vm0, %v3321_v60 }
0x1ae6   :  { %5494 = vmatpush1.bf16.msra.mxu1 %v6384_v59  ;;  %3568 = vmatprep.mubr.f32.mxu1 %v6198_v61 }
0x1ae7   :  { %5496 = vmatprep.subr.bf16.mxu1 %v6386_v62 }
0x1aea   :  { %5498 = vmatpush1.bf16.msra.mxu1 %v6403_v4 }
0x1aeb   :  { %5500 = vmatprep.subr.bf16.mxu1 %v6406_v5 }
0x1aee   :  { %5502 = vmatpush1.bf16.msra.mxu1 %v6421_v10 }
0x1aef   :  { %5504 = vmatprep.subr.bf16.mxu1 %v6424_v11 }
0x1af2   :  { %5506 = vmatpush1.bf16.msra.mxu1 %v6433_v16 }
0x1af3   :  { %5508 = vmatprep.subr.bf16.mxu1 %v6278_v13 }
0x1b00   :  { %v3204_v43 = vpop.permute.xlu1 %3203 }
0x1b01   :  { %v6915_v14 = vadd.f32 %v3204_v43, %v3196_v42 }
0x1b03   :  { %6025 = vtanh.f32 %v6915_v14 }
0x1b04   :  { %6027 = vpow2.f32 %v4847_v45 }
0x1b0d   :  { %v6026_v29 = vpop.eup %6025 }
0x1b0e   :  { %3209 = vrot.lane.b32.xlu1 %v6026_v29, %s6197_s11  ;;  %v6028_v28 = vpop.eup %6027 }
0x1b0f   :  { %v3190_v46 = vadd.f32 1.0, %v6028_v28 }
0x1b11   :  { %6029 = vrcp.f32 %v3190_v46 }
0x1b1b   :  { %v6030_v47 = vpop.eup %6029 }
0x1b80   :  { %v3210_v54 = vpop.permute.xlu1 %3209 }
0x1b81   :  { %v3212_v33 = vmul.f32 %v6030_v47, %v3210_v54 }
0x1b83   :  { %4848 = vmatmul.mubr.msk.f32.vlgmr.msra.gmra.mrb[22].mxu0 %vm153_vm0, %v3212_v33 }
0x1b84   :  { %5462 = vmatpush1.bf16.msra.mxu0 %v6282_v18  ;;  %3389 = vmatprep.mubr.f32.mxu0 %v6198_v61 }
0x1b85   :  { %5464 = vmatprep.subr.bf16.mxu0 %v6289_v26 }
0x1b88   :  { %5466 = vmatpush1.bf16.msra.mxu0 %v6294_v31 }
0x1b89   :  { %5468 = vmatprep.subr.bf16.mxu0 %v6300_v36 }
0x1b8c   :  { %5470 = vmatpush1.bf16.msra.mxu0 %v6305_v44 }
0x1b8d   :  { %5472 = vmatprep.subr.bf16.mxu0 %v6311_v49 }
0x1b90   :  { %5474 = vmatpush1.bf16.msra.mxu0 %v6320_v56 }
0x1b91   :  { %5524 = vmatprep.subr.bf16.mxu0 %v6280_v17 }
0x1b93   :  { %4851 = vmatmul.mubr.msk.f32.vlgmr.msra.gmra.mrb[22].mxu0 %vm153_vm0, %v3321_v60 }
0x1b94   :  { %5526 = vmatpush1.bf16.msra.mxu0 %v6285_v22  ;;  %3748 = vmatprep.mubr.f32.mxu0 %v6198_v61 }
0x1b95   :  { %5528 = vmatprep.subr.bf16.mxu0 %v6291_v27 }
0x1b98   :  { %5530 = vmatpush1.bf16.msra.mxu0 %v6298_v35 }
0x1b99   :  { %5532 = vmatprep.subr.bf16.mxu0 %v6302_v40 }
0x1b9c   :  { %5534 = vmatpush1.bf16.msra.mxu0 %v6309_v48 }
0x1b9d   :  { %5536 = vmatprep.subr.bf16.mxu0 %v6314_v51 }
0x1ba0   :  { %5538 = vmatpush1.bf16.msra.mxu0 %v6322_v58 }
0x1ba1   :  { %5540 = vmatprep.subr.bf16.mxu0 %v6373_v53 }
0x1bb8   :  { %v3462_v52 = vpop.f32.mrb[22].mxu1 }
0x1bb9   :  { %v3464_v63 = vpop.f32.mrb[23].mxu1  ;;  %v3578_v3 = vadd.f32 %v3576_v2, %v3462_v52 }
0x1bba   :  { %v3579_v39 = vadd.f32 %v3577_v41, %v3464_v63 }
0x1bbb   :  { %v4856_v1 = vmul.f32 -1.442695, %v3578_v3 }
0x1bbc   :  { %6031 = vtanh.f32 %v3579_v39 }
0x1bbd   :  { %6033 = vpow2.f32 %v4856_v1 }
0x1bc6   :  { %v6032_v0 = vpop.eup %6031 }
0x1bc7   :  { %3595 = vrot.lane.b32.xlu0 %v6032_v0, %s6197_s11  ;;  %v6034_v23 = vpop.eup %6033 }
0x1bc8   :  { %v3586_v19 = vadd.f32 1.0, %v6034_v23 }
0x1bca   :  { %6035 = vrcp.f32 %v3586_v19 }
0x1bd4   :  { %v6036_v8 = vpop.eup %6035 }
0x1bd5   :  { %v3593_v25 = vmul.f32 %v6036_v8, %v6898_v50  ;;  %v4857_v50 = vmul.f32 -1.442695, %v3579_v39 }
0x1c39   :  { %v3596_v12 = vpop.permute.xlu0 %3595 }
0x1c3a   :  { %v3598_v20 = vmul.f32 %v6036_v8, %v3596_v12 }
0x1c3c   :  { %3600 = vrot.lane.b32.xlu0 %v3598_v20, %s6197_s11  ;;  %v3864_v20 = vld [vmem:[#allocation3 + $0xd0] sm:$0xff] }
0x1c66   :  { %v3391_v38 = vpop.f32.mrb[22].mxu0 }
0x1c67   :  { %v3393_v55 = vpop.f32.mrb[23].mxu0  ;;  %v3467_v34 = vadd.f32 %v3391_v38, %v6359_v24 }
0x1c68   :  { %v3468_v21 = vadd.f32 %v3393_v55, %v6348_v9 }
0x1c69   :  { %v4853_v37 = vmul.f32 -1.442695, %v3467_v34 }
0x1c6a   :  { %6037 = vtanh.f32 %v3468_v21  ;;  %v4854_v63 = vmul.f32 -1.442695, %v3468_v21 }
0x1c74   :  { %v6038_v57 = vpop.eup %6037 }
0x1c75   :  { %3486 = vrot.lane.b32.xlu1 %v6038_v57, %s6197_s11 }
0x1cae   :  { %v3601_v30 = vpop.permute.xlu0 %3600 }
0x1caf   :  { %v6944_v32 = vadd.f32 %v3601_v30, %v3593_v25 }
0x1cb1   :  { %6039 = vtanh.f32 %v6944_v32 }
0x1cb2   :  { %6041 = vpow2.f32 %v4853_v37 }
0x1cbb   :  { %v6040_v15 = vpop.eup %6039 }
0x1cbc   :  { %3606 = vrot.lane.b32.xlu0 %v6040_v15, %s6197_s11  ;;  %v6042_v7 = vpop.eup %6041 }
0x1cbd   :  { %v3477_v6 = vadd.f32 1.0, %v6042_v7 }
0x1cbf   :  { %6043 = vrcp.f32 %v3477_v6 }
0x1cc0   :  { %6045 = vpow2.f32 %v4857_v50 }
0x1cc9   :  { %v6044_v60 = vpop.eup %6043 }
0x1cca   :  { %v6046_v29 = vpop.eup %6045  ;;  %v3484_v54 = vmul.f32 %v6044_v60, %v6915_v14  ;;  %v3865_v14 = vld [vmem:[#allocation3 + $0xd8] sm:$0xff] }
0x1ccb   :  { %v3587_v45 = vadd.f32 1.0, %v6046_v29 }
0x1ccd   :  { %6047 = vrcp.f32 %v3587_v45 }
0x1cd7   :  { %v6048_v28 = vpop.eup %6047 }
0x1ce7   :  { %v3487_v42 = vpop.permute.xlu1 %3486 }
0x1ce8   :  { %v3489_v43 = vmul.f32 %v6044_v60, %v3487_v42 }
0x1cea   :  { %3491 = vrot.lane.b32.xlu1 %v3489_v43, %s6197_s11 }
0x1d2e   :  { %v3607_v46 = vpop.permute.xlu0 %3606 }
0x1d2f   :  { %v3609_v47 = vmul.f32 %v6048_v28, %v3607_v46 }
0x1d31   :  { %4859 = vmatmul.mubr.msk.f32.vlgmr.msra.gmra.mrb[24].mxu0 %vm153_vm0, %v3609_v47 }
0x1d32   :  { %5542 = vmatpush1.bf16.msra.mxu0 %v6384_v59  ;;  %3856 = vmatprep.mubr.f32.mxu0 %v6198_v61 }
0x1d33   :  { %5544 = vmatprep.subr.bf16.mxu0 %v6386_v62 }
0x1d36   :  { %5546 = vmatpush1.bf16.msra.mxu0 %v6403_v4 }
0x1d37   :  { %5548 = vmatprep.subr.bf16.mxu0 %v6406_v5 }
0x1d3a   :  { %5550 = vmatpush1.bf16.msra.mxu0 %v6421_v10 }
0x1d3b   :  { %5552 = vmatprep.subr.bf16.mxu0 %v6424_v11 }
0x1d3e   :  { %5554 = vmatpush1.bf16.msra.mxu0 %v6433_v16 }
0x1d3f   :  { %5556 = vmatprep.subr.bf16.mxu0 %v6278_v13 }
0x1d5c   :  { %v3492_v33 = vpop.permute.xlu1 %3491 }
0x1d5d   :  { %v6961_v41 = vadd.f32 %v3492_v33, %v3484_v54 }
0x1d5f   :  { %6049 = vtanh.f32 %v6961_v41 }
0x1d60   :  { %6051 = vpow2.f32 %v4854_v63 }
0x1d69   :  { %v6050_v52 = vpop.eup %6049 }
0x1d6a   :  { %3497 = vrot.lane.b32.xlu1 %v6050_v52, %s6197_s11  ;;  %v6052_v39 = vpop.eup %6051 }
0x1d6b   :  { %v3478_v0 = vadd.f32 1.0, %v6052_v39 }
0x1d6d   :  { %6053 = vrcp.f32 %v3478_v0 }
0x1d77   :  { %v6054_v2 = vpop.eup %6053 }
0x1ddc   :  { %v3498_v3 = vpop.permute.xlu1 %3497 }
0x1ddd   :  { %v3500_v1 = vmul.f32 %v6054_v2, %v3498_v3 }
0x1ddf   :  { %4855 = vmatmul.mubr.msk.f32.vlgmr.msra.gmra.mrb[24].mxu1 %vm153_vm0, %v3500_v1 }
0x1de0   :  { %5510 = vmatpush1.bf16.msra.mxu1 %v6282_v18  ;;  %3677 = vmatprep.mubr.f32.mxu1 %v6198_v61 }
0x1de1   :  { %5512 = vmatprep.subr.bf16.mxu1 %v6289_v26 }
0x1de4   :  { %5514 = vmatpush1.bf16.msra.mxu1 %v6294_v31 }
0x1de5   :  { %5516 = vmatprep.subr.bf16.mxu1 %v6300_v36 }
0x1de8   :  { %5518 = vmatpush1.bf16.msra.mxu1 %v6305_v44 }
0x1de9   :  { %5520 = vmatprep.subr.bf16.mxu1 %v6311_v49 }
0x1dec   :  { %5522 = vmatpush1.bf16.msra.mxu1 %v6320_v56 }
0x1ded   :  { %5572 = vmatprep.subr.bf16.mxu1 %v6280_v17 }
0x1def   :  { %4858 = vmatmul.mubr.msk.f32.vlgmr.msra.gmra.mrb[24].mxu1 %vm153_vm0, %v3609_v47 }
0x1df0   :  { %5574 = vmatpush1.bf16.msra.mxu1 %v6285_v22  ;;  %4036 = vmatprep.mubr.f32.mxu1 %v6198_v61 }
0x1df1   :  { %5576 = vmatprep.subr.bf16.mxu1 %v6291_v27 }
0x1df4   :  { %5578 = vmatpush1.bf16.msra.mxu1 %v6298_v35 }
0x1df5   :  { %5580 = vmatprep.subr.bf16.mxu1 %v6302_v40 }
0x1df8   :  { %5582 = vmatpush1.bf16.msra.mxu1 %v6309_v48 }
0x1df9   :  { %5584 = vmatprep.subr.bf16.mxu1 %v6314_v51 }
0x1dfc   :  { %5586 = vmatpush1.bf16.msra.mxu1 %v6322_v58 }
0x1dfd   :  { %5588 = vmatprep.subr.bf16.mxu1 %v6373_v53 }
0x1e04   :  { %v3750_v23 = vpop.f32.mrb[24].mxu0 }
0x1e05   :  { %v3752_v19 = vpop.f32.mrb[25].mxu0  ;;  %v3866_v38 = vadd.f32 %v3864_v20, %v3750_v23 }
0x1e06   :  { %v3867_v8 = vadd.f32 %v3865_v14, %v3752_v19 }
0x1e07   :  { %v4863_v55 = vmul.f32 -1.442695, %v3866_v38 }
0x1e08   :  { %6055 = vtanh.f32 %v3867_v8 }
0x1e09   :  { %6057 = vpow2.f32 %v4863_v55 }
0x1e12   :  { %v6056_v12 = vpop.eup %6055 }
0x1e13   :  { %3883 = vrot.lane.b32.xlu0 %v6056_v12, %s6197_s11  ;;  %v6058_v21 = vpop.eup %6057 }
0x1e14   :  { %v3874_v57 = vadd.f32 1.0, %v6058_v21 }
0x1e16   :  { %6059 = vrcp.f32 %v3874_v57 }
0x1e20   :  { %v6060_v25 = vpop.eup %6059 }
0x1e21   :  { %v3881_v60 = vmul.f32 %v6060_v25, %v6944_v32  ;;  %v4864_v32 = vmul.f32 -1.442695, %v3867_v8 }
0x1e85   :  { %v3884_v30 = vpop.permute.xlu0 %3883 }
0x1e86   :  { %v3886_v15 = vmul.f32 %v6060_v25, %v3884_v30 }
0x1e88   :  { %3888 = vrot.lane.b32.xlu0 %v3886_v15, %s6197_s11 }
0x1ec2   :  { %v3679_v34 = vpop.f32.mrb[24].mxu1 }
0x1ec3   :  { %v3681_v37 = vpop.f32.mrb[25].mxu1  ;;  %v3755_v29 = vadd.f32 %v3679_v34, %v6359_v24 }
0x1ec4   :  { %v3756_v7 = vadd.f32 %v3681_v37, %v6348_v9 }
0x1ec5   :  { %v4860_v45 = vmul.f32 -1.442695, %v3755_v29 }
0x1ec6   :  { %6061 = vtanh.f32 %v3756_v7  ;;  %v4861_v19 = vmul.f32 -1.442695, %v3756_v7 }
0x1ed0   :  { %v6062_v6 = vpop.eup %6061 }
0x1ed1   :  { %3774 = vrot.lane.b32.xlu1 %v6062_v6, %s6197_s11 }
0x1efa   :  { %v3889_v42 = vpop.permute.xlu0 %3888 }
0x1efb   :  { %v6990_v43 = vadd.f32 %v3889_v42, %v3881_v60 }
0x1efd   :  { %6063 = vtanh.f32 %v6990_v43 }
0x1efe   :  { %6065 = vpow2.f32 %v4860_v45 }
0x1f07   :  { %v6064_v50 = vpop.eup %6063 }
0x1f08   :  { %3894 = vrot.lane.b32.xlu0 %v6064_v50, %s6197_s11  ;;  %v6066_v28 = vpop.eup %6065 }
0x1f09   :  { %v3765_v46 = vadd.f32 1.0, %v6066_v28 }
0x1f0b   :  { %6067 = vrcp.f32 %v3765_v46 }
0x1f0c   :  { %6069 = vpow2.f32 %v4864_v32 }
0x1f15   :  { %v6068_v47 = vpop.eup %6067 }
0x1f16   :  { %v6070_v52 = vpop.eup %6069  ;;  %v3772_v3 = vmul.f32 %v6068_v47, %v6961_v41  ;;  %v4153_v41 = vld [vmem:[#allocation3 + $0xe8] sm:$0xff] }
0x1f17   :  { %v3875_v63 = vadd.f32 1.0, %v6070_v52 }
0x1f19   :  { %6071 = vrcp.f32 %v3875_v63 }
0x1f23   :  { %v6072_v39 = vpop.eup %6071 }
0x1f43   :  { %v3775_v54 = vpop.permute.xlu1 %3774 }
0x1f44   :  { %v3777_v33 = vmul.f32 %v6068_v47, %v3775_v54 }
0x1f46   :  { %3779 = vrot.lane.b32.xlu1 %v3777_v33, %s6197_s11 }
0x1f7a   :  { %v3895_v0 = vpop.permute.xlu0 %3894 }
0x1f7b   :  { %v3897_v2 = vmul.f32 %v6072_v39, %v3895_v0 }
0x1f7d   :  { %4866 = vmatmul.mubr.msk.f32.vlgmr.msra.gmra.mrb[26].mxu1 %vm153_vm0, %v3897_v2 }
0x1f7e   :  { %5590 = vmatpush1.bf16.msra.mxu1 %v6384_v59  ;;  %4144 = vmatprep.mubr.f32.mxu1 %v6198_v61 }
0x1f7f   :  { %5592 = vmatprep.subr.bf16.mxu1 %v6386_v62 }
0x1f82   :  { %5594 = vmatpush1.bf16.msra.mxu1 %v6403_v4 }
0x1f83   :  { %5596 = vmatprep.subr.bf16.mxu1 %v6406_v5 }
0x1f86   :  { %5598 = vmatpush1.bf16.msra.mxu1 %v6421_v10 }
0x1f87   :  { %5600 = vmatprep.subr.bf16.mxu1 %v6424_v11 }
0x1f8a   :  { %5602 = vmatpush1.bf16.msra.mxu1 %v6433_v16 }
0x1f8b   :  { %5604 = vmatprep.subr.bf16.mxu1 %v6278_v13 }
0x1fb8   :  { %v3780_v1 = vpop.permute.xlu1 %3779 }
0x1fb9   :  { %v7007_v14 = vadd.f32 %v3780_v1, %v3772_v3 }
0x1fbb   :  { %6073 = vtanh.f32 %v7007_v14 }
0x1fbc   :  { %6075 = vpow2.f32 %v4861_v19 }
0x1fc5   :  { %v6074_v23 = vpop.eup %6073 }
0x1fc6   :  { %3785 = vrot.lane.b32.xlu1 %v6074_v23, %s6197_s11  ;;  %v6076_v8 = vpop.eup %6075 }
0x1fc7   :  { %v3766_v12 = vadd.f32 1.0, %v6076_v8  ;;  %v4440_v8 = vld [vmem:[#allocation3 + $0xf0] sm:$0xff] }
0x1fc9   :  { %6077 = vrcp.f32 %v3766_v12 }
0x1fd3   :  { %v6078_v20 = vpop.eup %6077 }
0x2038   :  { %v3786_v38 = vpop.permute.xlu1 %3785 }
0x2039   :  { %v3788_v55 = vmul.f32 %v6078_v20, %v3786_v38 }
0x203b   :  { %4862 = vmatmul.mubr.msk.f32.vlgmr.msra.gmra.mrb[26].mxu0 %vm153_vm0, %v3788_v55 }
0x203c   :  { %5558 = vmatpush1.bf16.msra.mxu0 %v6282_v18  ;;  %3965 = vmatprep.mubr.f32.mxu0 %v6198_v61 }
0x203d   :  { %5560 = vmatprep.subr.bf16.mxu0 %v6289_v26 }
0x2040   :  { %5562 = vmatpush1.bf16.msra.mxu0 %v6294_v31 }
0x2041   :  { %5564 = vmatprep.subr.bf16.mxu0 %v6300_v36 }
0x2044   :  { %5566 = vmatpush1.bf16.msra.mxu0 %v6305_v44 }
0x2045   :  { %5568 = vmatprep.subr.bf16.mxu0 %v6311_v49 }
0x2048   :  { %5570 = vmatpush1.bf16.msra.mxu0 %v6320_v56 }
0x2049   :  { %5620 = vmatprep.subr.bf16.mxu0 %v6280_v17 }
0x204b   :  { %4865 = vmatmul.mubr.msk.f32.vlgmr.msra.gmra.mrb[26].mxu0 %vm153_vm0, %v3897_v2 }
0x204c   :  { %5622 = vmatpush1.bf16.msra.mxu0 %v6285_v22  ;;  %4324 = vmatprep.mubr.f32.mxu0 %v6198_v61  ;;  %v4152_v22 = vld [vmem:[#allocation3 + $0xe0] sm:$0xff] }
0x204d   :  { %5624 = vmatprep.subr.bf16.mxu0 %v6291_v27 }
0x2050   :  { %5626 = vmatpush1.bf16.msra.mxu0 %v6298_v35  ;;  %v4038_v21 = vpop.f32.mrb[26].mxu1 }
0x2051   :  { %5628 = vmatprep.subr.bf16.mxu0 %v6302_v40  ;;  %v4040_v57 = vpop.f32.mrb[27].mxu1  ;;  %v4154_v27 = vadd.f32 %v4152_v22, %v4038_v21 }
0x2052   :  { %v4155_v25 = vadd.f32 %v4153_v41, %v4040_v57 }
0x2053   :  { %v4870_v35 = vmul.f32 -1.442695, %v4154_v27 }
0x2054   :  { %5630 = vmatpush1.bf16.msra.mxu0 %v6309_v48  ;;  %6079 = vtanh.f32 %v4155_v25 }
0x2055   :  { %5632 = vmatprep.subr.bf16.mxu0 %v6314_v51  ;;  %6081 = vpow2.f32 %v4870_v35 }
0x2058   :  { %5634 = vmatpush1.bf16.msra.mxu0 %v6322_v58 }
0x2059   :  { %5636 = vmatprep.subr.bf16.mxu0 %v6373_v53 }
0x205e   :  { %v6080_v17 = vpop.eup %6079 }
0x205f   :  { %4171 = vrot.lane.b32.xlu0 %v6080_v17, %s6197_s11  ;;  %v6082_v40 = vpop.eup %6081 }
0x2060   :  { %v4162_v30 = vadd.f32 1.0, %v6082_v40 }
0x2062   :  { %6083 = vrcp.f32 %v4162_v30 }
0x206c   :  { %v6084_v15 = vpop.eup %6083 }
0x206d   :  { %v4169_v7 = vmul.f32 %v6084_v15, %v6990_v43  ;;  %v4871_v43 = vmul.f32 -1.442695, %v4155_v25 }
0x20d1   :  { %v4172_v48 = vpop.permute.xlu0 %4171 }
0x20d2   :  { %v4174_v34 = vmul.f32 %v6084_v15, %v4172_v48 }
0x20d4   :  { %4176 = vrot.lane.b32.xlu0 %v4174_v34, %s6197_s11 }
0x211e   :  { %v3967_v51 = vpop.f32.mrb[26].mxu0 }
0x211f   :  { %v3969_v37 = vpop.f32.mrb[27].mxu0  ;;  %v4043_v50 = vadd.f32 %v3967_v51, %v6359_v24 }
0x2120   :  { %v4044_v58 = vadd.f32 %v3969_v37, %v6348_v9 }
0x2121   :  { %v4867_v29 = vmul.f32 -1.442695, %v4043_v50 }
0x2122   :  { %6085 = vtanh.f32 %v4044_v58 }
0x212c   :  { %v6086_v53 = vpop.eup %6085 }
0x212d   :  { %4062 = vrot.lane.b32.xlu1 %v6086_v53, %s6197_s11 }
0x2146   :  { %v4177_v6 = vpop.permute.xlu0 %4176 }
0x2147   :  { %v7036_v60 = vadd.f32 %v4177_v6, %v4169_v7 }
0x2149   :  { %6087 = vtanh.f32 %v7036_v60 }
0x214a   :  { %6089 = vpow2.f32 %v4867_v29 }
0x2153   :  { %v6088_v42 = vpop.eup %6087 }
0x2154   :  { %4182 = vrot.lane.b32.xlu0 %v6088_v42, %s6197_s11  ;;  %v6090_v45 = vpop.eup %6089 }
0x2155   :  { %v4053_v28 = vadd.f32 1.0, %v6090_v45 }
0x2157   :  { %6091 = vrcp.f32 %v4053_v28 }
0x2158   :  { %6093 = vpow2.f32 %v4871_v43 }
0x2161   :  { %v6092_v46 = vpop.eup %6091 }
0x2162   :  { %v6094_v33 = vpop.eup %6093  ;;  %v4060_v0 = vmul.f32 %v6092_v46, %v7007_v14 }
0x2163   :  { %v4163_v32 = vadd.f32 1.0, %v6094_v33 }
0x2165   :  { %6095 = vrcp.f32 %v4163_v32 }
0x216f   :  { %v6096_v52 = vpop.eup %6095 }
0x219f   :  { %v4063_v47 = vpop.permute.xlu1 %4062 }
0x21a0   :  { %v4065_v54 = vmul.f32 %v6092_v46, %v4063_v47 }
0x21a2   :  { %4067 = vrot.lane.b32.xlu1 %v4065_v54, %s6197_s11 }
0x21c6   :  { %v4183_v63 = vpop.permute.xlu0 %4182 }
0x21c7   :  { %v4185_v39 = vmul.f32 %v6096_v52, %v4183_v63 }
0x21c9   :  { %4873 = vmatmul.mubr.msk.f32.vlgmr.msra.gmra.mrb[28].mxu0 %vm153_vm0, %v4185_v39 }
0x21ca   :  { %5638 = vmatpush1.bf16.msra.mxu0 %v6384_v59  ;;  %4432 = vmatprep.mubr.f32.mxu0 %v6198_v61 }
0x21cb   :  { %5640 = vmatprep.subr.bf16.mxu0 %v6386_v62  ;;  %v4868_v62 = vmul.f32 -1.442695, %v4044_v58 }
0x21ce   :  { %5642 = vmatpush1.bf16.msra.mxu0 %v6403_v4 }
0x21cf   :  { %5644 = vmatprep.subr.bf16.mxu0 %v6406_v5 }
0x21d2   :  { %5646 = vmatpush1.bf16.msra.mxu0 %v6421_v10 }
0x21d3   :  { %5648 = vmatprep.subr.bf16.mxu0 %v6424_v11 }
0x21d6   :  { %5650 = vmatpush1.bf16.msra.mxu0 %v6433_v16 }
0x21d7   :  { %5652 = vmatprep.subr.bf16.mxu0 %v6278_v13  ;;  %v4441_v13 = vld [vmem:[#allocation3 + $0xf8] sm:$0xff] }
0x2214   :  { %v4068_v2 = vpop.permute.xlu1 %4067 }
0x2215   :  { %v4070_v59 = vadd.f32 %v4068_v2, %v4060_v0 }
0x2217   :  { %6097 = vtanh.f32 %v4070_v59 }
0x2218   :  { %6099 = vpow2.f32 %v4868_v62  ;;  %v4583_v62 = vld [vmem:[%s7143_s4 + $0x8] sm:$0xff] }
0x2221   :  { %v6098_v3 = vpop.eup %6097 }
0x2222   :  { %4073 = vrot.lane.b32.xlu1 %v6098_v3, %s6197_s11  ;;  %v6100_v4 = vpop.eup %6099 }
0x2223   :  { %v4054_v5 = vadd.f32 1.0, %v6100_v4  ;;  %v6199_v4 = vmov 0.0|0.0  }
0x2225   :  { %6101 = vrcp.f32 %v4054_v5 }
0x222f   :  { %v6102_v10 = vpop.eup %6101 }
0x2294   :  { %v4074_v1 = vpop.permute.xlu1 %4073 }
0x2295   :  { %v4076_v11 = vmul.f32 %v6102_v10, %v4074_v1  ;;  %v4585_v10 = vld [vmem:[%s7143_s4 + $0x18] sm:$0xff] }
0x2297   :  { %4869 = vmatmul.mubr.msk.f32.vlgmr.msra.gmra.mrb[28].mxu1 %vm153_vm0, %v4076_v11  ;;  %v4586_v11 = vld [vmem:[%s7143_s4 + $0x20] sm:$0xff] }
0x2298   :  { %5606 = vmatpush1.bf16.msra.mxu1 %v6282_v18  ;;  %4253 = vmatprep.mubr.f32.mxu1 %v6198_v61 }
0x2299   :  { %5608 = vmatprep.subr.bf16.mxu1 %v6289_v26 }
0x229c   :  { %5610 = vmatpush1.bf16.msra.mxu1 %v6294_v31  ;;  %v4326_v16 = vpop.f32.mrb[28].mxu0 }
0x229d   :  { %5612 = vmatprep.subr.bf16.mxu1 %v6300_v36  ;;  %v4328_v14 = vpop.f32.mrb[29].mxu0  ;;  %v4442_v12 = vadd.f32 %v4440_v8, %v4326_v16 }
0x229e   :  { %v4443_v23 = vadd.f32 %v4441_v13, %v4328_v14  ;;  %v4587_v13 = vld [vmem:[%s7143_s4 + $0x28] sm:$0xff]  ;;  %v4588_v14 = vld [vmem:[%s7143_s4 + $0x30] sm:$0xff] }
0x229f   :  { %v4877_v20 = vmul.f32 -1.442695, %v4442_v12  ;;  %v5674_v16 = vpack.c.bf16 %v4587_v13, %v4586_v11 }
0x22a0   :  { %5614 = vmatpush1.bf16.msra.mxu1 %v6305_v44  ;;  %6103 = vtanh.f32 %v4443_v23  ;;  %v4878_v28 = vmul.f32 -1.442695, %v4443_v23  ;;  %v4589_v23 = vld [vmem:[%s7143_s4 + $0x38] sm:$0xff] }
0x22a1   :  { %5616 = vmatprep.subr.bf16.mxu1 %v6311_v49  ;;  %6105 = vpow2.f32 %v4877_v20 }
0x22a4   :  { %5618 = vmatpush1.bf16.msra.mxu1 %v6320_v56 }
0x22a5   :  { %5667 = vmatprep.subr.bf16.mxu1 %v6199_v4 }
0x22a7   :  { %4872 = vmatmul.mubr.msk.f32.vlgmr.msra.gmra.mrb[28].mxu1 %vm153_vm0, %v4185_v39 }
0x22a8   :  { %4917 = vmatprep.mubr.msk.f32.mxu1 %vm6200_vm1, %v6198_v61 }
0x22aa   :  { %v6104_v19 = vpop.eup %6103 }
0x22ab   :  { %4459 = vrot.lane.b32.xlu0 %v6104_v19, %s6197_s11  ;;  %v6106_v38 = vpop.eup %6105  ;;  %v5677_v19 = vpack.c.bf16 %v4589_v23, %v4588_v14 }
0x22ac   :  { %v4450_v55 = vadd.f32 1.0, %v6106_v38 }
0x22ae   :  { %6107 = vrcp.f32 %v4450_v55 }
0x22b8   :  { %v6108_v41 = vpop.eup %6107 }
0x22b9   :  { %v4457_v35 = vmul.f32 %v6108_v41, %v7036_v60 }
0x231d   :  { %v4460_v21 = vpop.permute.xlu0 %4459 }
0x231e   :  { %v4462_v57 = vmul.f32 %v6108_v41, %v4460_v21 }
0x2320   :  { %4464 = vrot.lane.b32.xlu0 %v4462_v57, %s6197_s11  ;;  %v4673_v57 = vld [vmem:[%s7145_s6] sm:$0xff] }
0x237a   :  { %v4255_v25 = vpop.f32.mrb[28].mxu1 }
0x237b   :  { %v4257_v17 = vpop.f32.mrb[29].mxu1  ;;  %v4331_v48 = vadd.f32 %v4255_v25, %v6359_v24  ;;  %v4674_v25 = vld [vmem:[%s7145_s6 + $0x8] sm:$0xff] }
0x237c   :  { %v4332_v22 = vadd.f32 %v4257_v17, %v6348_v9 }
0x237d   :  { %v4874_v34 = vmul.f32 -1.442695, %v4331_v48  ;;  %v4882_v48 = vld [vmem:[%s7144_s5] ss:$0 sm:$0xff] }
0x237e   :  { %6109 = vtanh.f32 %v4332_v22  ;;  %v4875_v29 = vmul.f32 -1.442695, %v4332_v22 }
0x2388   :  { %v6110_v27 = vpop.eup %6109 }
0x2389   :  { %4350 = vrot.lane.b32.xlu1 %v6110_v27, %s6197_s11  ;;  %v5680_v27 = vpack.c.bf16 %v4674_v25, %v4673_v57 }
0x2392   :  { %v4465_v40 = vpop.permute.xlu0 %4464 }
0x2393   :  { %v4467_v30 = vadd.f32 %v4465_v40, %v4457_v35  ;;  %v4675_v40 = vld [vmem:[%s7145_s6 + $0x10] sm:$0xff] }
0x2395   :  { %6111 = vtanh.f32 %v4467_v30  ;;  %v4676_v30 = vld [vmem:[%s7145_s6 + $0x18] sm:$0xff] }
0x2396   :  { %6113 = vpow2.f32 %v4874_v34 }
0x239f   :  { %v6112_v15 = vpop.eup %6111 }
0x23a0   :  { %4470 = vrot.lane.b32.xlu0 %v6112_v15, %s6197_s11  ;;  %v6114_v51 = vpop.eup %6113  ;;  %v5683_v15 = vpack.c.bf16 %v4676_v30, %v4675_v40 }
0x23a1   :  { %v4341_v37 = vadd.f32 1.0, %v6114_v51 }
0x23a3   :  { %6115 = vrcp.f32 %v4341_v37 }
0x23ad   :  { %v6116_v58 = vpop.eup %6115 }
0x23ae   :  { %v4348_v6 = vmul.f32 %v6116_v58, %v4070_v59 }
0x23fb   :  { %v4351_v53 = vpop.permute.xlu1 %4350 }
0x23fc   :  { %v4353_v7 = vmul.f32 %v6116_v58, %v4351_v53  ;;  %v4884_v53 = vld [vmem:[#allocation2] ss:$0 sm:$0xff] }
0x23fe   :  { %4355 = vrot.lane.b32.xlu1 %v4353_v7, %s6197_s11 }
0x2412   :  { %v4471_v52 = vpop.permute.xlu0 %4470 }
0x2470   :  { %v4356_v60 = vpop.permute.xlu1 %4355 }
0x2471   :  { %v7072_v42 = vadd.f32 %v4356_v60, %v4348_v6 }
0x2473   :  { %6117 = vtanh.f32 %v7072_v42 }
0x2474   :  { %6119 = vpow2.f32 %v4875_v29 }
0x2475   :  { %6121 = vpow2.f32 %v4878_v28 }
0x247d   :  { %v6118_v50 = vpop.eup %6117 }
0x247e   :  { %4361 = vrot.lane.b32.xlu1 %v6118_v50, %s6197_s11  ;;  %v6120_v45 = vpop.eup %6119 }
0x247f   :  { %v4342_v46 = vadd.f32 1.0, %v6120_v45  ;;  %v6122_v47 = vpop.eup %6121 }
0x2480   :  { %v4451_v32 = vadd.f32 1.0, %v6122_v47 }
0x2481   :  { %6123 = vrcp.f32 %v4342_v46 }
0x2482   :  { %6125 = vrcp.f32 %v4451_v32 }
0x248b   :  { %v6124_v54 = vpop.eup %6123 }
0x248c   :  { %v6126_v63 = vpop.eup %6125 }
0x248d   :  { %v4473_v39 = vmul.f32 %v6126_v63, %v4471_v52 }
0x24f0   :  { %v4362_v43 = vpop.permute.xlu1 %4361 }
0x24f1   :  { %v4364_v33 = vmul.f32 %v6124_v54, %v4362_v43 }
0x24f3   :  { %4876 = vmatmul.mubr.msk.f32.vlgmr.msra.gmra.mrb[30].mxu0 %vm153_vm0, %v4364_v33 }
0x24f4   :  { %5654 = vmatpush1.bf16.msra.mxu0 %v6282_v18  ;;  %4541 = vmatprep.mubr.f32.mxu0 %v6198_v61 }
0x24f5   :  { %5656 = vmatprep.subr.bf16.mxu0 %v6289_v26 }
0x24f8   :  { %5658 = vmatpush1.bf16.msra.mxu0 %v6294_v31 }
0x24f9   :  { %5660 = vmatprep.subr.bf16.mxu0 %v6300_v36 }
0x24fc   :  { %5662 = vmatpush1.bf16.msra.mxu0 %v6305_v44 }
0x24fd   :  { %5664 = vmatprep.subr.bf16.mxu0 %v6311_v49 }
0x2500   :  { %5666 = vmatpush1.bf16.msra.mxu0 %v6320_v56 }
0x2503   :  { %4879 = vmatmul.mubr.msk.f32.vlgmr.msra.gmra.mrb[30].mxu0 %vm153_vm0, %v4473_v39 }
0x25d6   :  { %v4543_v18 = vpop.f32.mrb[30].mxu0 }
0x25d7   :  { %v4545_v0 = vpop.f32.mrb[31].mxu0  ;;  %v4548_v31 = vadd.f32 %v4543_v18, %v6359_v24  ;;  %v4584_v24 = vld [vmem:[%s7143_s4 + $0x10] sm:$0xff] }
0x25d8   :  { %v4549_v26 = vadd.f32 %v4545_v0, %v6348_v9  ;;  %v4582_v9 = vld [vmem:[%s7143_s4] sm:$0xff]  ;;  %v5671_v1 = vpack.c.bf16 %v4585_v10, %v4584_v24 }
0x25d9   :  { %v4880_v36 = vmul.f32 -1.442695, %v4548_v31  ;;  %v5668_v5 = vpack.c.bf16 %v4583_v62, %v4582_v9 }
0x25da   :  { %6127 = vtanh.f32 %v4549_v26  ;;  %v4881_v55 = vmul.f32 -1.442695, %v4549_v26 }
0x25db   :  { %6129 = vpow2.f32 %v4880_v36  ;;  %5669 = vmatpush3.bf16.msra.mxu1 %v5668_v5 }
0x25dc   :  { %5670 = vmatprep.subr.bf16.mxu1 %v6199_v4 }
0x25df   :  { %5672 = vmatpush3.bf16.msra.mxu1 %v5671_v1 }
0x25e0   :  { %5673 = vmatprep.subr.bf16.mxu1 %v6199_v4 }
0x25e3   :  { %5675 = vmatpush3.bf16.msra.mxu1 %v5674_v16 }
0x25e4   :  { %v6128_v2 = vpop.eup %6127  ;;  %5676 = vmatprep.subr.bf16.mxu1 %v6199_v4 }
0x25e5   :  { %4567 = vrot.lane.b32.xlu1 %v6128_v2, %s6197_s11  ;;  %v6130_v44 = vpop.eup %6129 }
0x25e6   :  { %v4558_v49 = vadd.f32 1.0, %v6130_v44 }
0x25e7   :  { %5678 = vmatpush3.bf16.msra.mxu1 %v5677_v19 }
0x25e8   :  { %6131 = vrcp.f32 %v4558_v49  ;;  %5679 = vmatprep.subr.bf16.mxu1 %v6199_v4 }
0x25f2   :  { %v6132_v59 = vpop.eup %6131 }
0x25f3   :  { %v4565_v8 = vmul.f32 %v6132_v59, %v7072_v42 }
0x2657   :  { %v4568_v56 = vpop.permute.xlu1 %4567 }
0x2658   :  { %v4570_v3 = vmul.f32 %v6132_v59, %v4568_v56 }
0x265a   :  { %4572 = vrot.lane.b32.xlu0 %v4570_v3, %s6197_s11 }
0x26cc   :  { %v4573_v12 = vpop.permute.xlu0 %4572 }
0x26cd   :  { %v4575_v20 = vadd.f32 %v4573_v12, %v4565_v8 }
0x26cf   :  { %6133 = vtanh.f32 %v4575_v20 }
0x26d0   :  { %6135 = vpow2.f32 %v4881_v55 }
0x26d9   :  { %v6134_v38 = vpop.eup %6133 }
0x26da   :  { %4578 = vrot.lane.b32.xlu1 %v6134_v38, %s6197_s11  ;;  %v6136_v41 = vpop.eup %6135 }
0x26db   :  { %v4559_v21 = vadd.f32 1.0, %v6136_v41 }
0x26dd   :  { %6137 = vrcp.f32 %v4559_v21 }
0x26e7   :  { %v6138_v17 = vpop.eup %6137 }
0x274c   :  { %v4579_v22 = vpop.permute.xlu1 %4578 }
0x274d   :  { %v4581_v35 = vmul.f32 %v6138_v17, %v4579_v22 }
0x274f   :  { %4918 = vmatmul.mubr.msk.f32.vlgmr.msra.gmra.mrb[30].mxu1 %vm153_vm0, %v4581_v35 }
0x2750   :  { %5681 = vmatpush3.bf16.msra.mxu1 %v5680_v27  ;;  %4928 = vmatprep.mubr.msk.f32.mxu1 %vm6200_vm1, %v6198_v61 }
0x2751   :  { %5682 = vmatprep.subr.bf16.mxu1 %v6199_v4 }
0x2754   :  { %5684 = vmatpush3.bf16.msra.mxu1 %v5683_v15 }
0x2822   :  { %v4666_v34 = vpop.f32.mrb[30].mxu1 }
0x2823   :  { %v4667_v51 = vadd.f32 %v4882_v48, %v4666_v34  ;;  %v4919_v37 = vpop.f32.mrb[31].mxu1 }
0x2825   :  { %vm4670_vm2 = vcmp.ge.f32.partialorder %v4667_v51, 0.0  ;;  %v4671_v61 = vmul.f32 0.2, %v4667_v51 }
0x2827   :  { %v4672_v58 = vsel %vm4670_vm2, %v4667_v51, %v4671_v61 }
0x2828   :  { %4929 = vmatmul.mubr.msk.f32.vlgmr.msra.gmra.mrb[32].mxu1 %vm4684_vm3, %v4672_v58 }
0x28fb   :  { %v4754_v7 = vpop.f32.mrb[32].mxu1 }
0x28fc   :  { %v4755_v6 = vadd.f32 %v4884_v53, %v4754_v7  ;;  %v4930_v60 = vpop.f32.mrb[33].mxu1 }
0x28fe   :  { %v4886_v42 = vmul.f32 -1.442695, %v4755_v6 }
0x2900   :  { %6139 = vpow2.f32 %v4886_v42 }
0x290a   :  { %v6140_v50 = vpop.eup %6139 }
0x290b   :  { %v4761_v29 = vadd.f32 1.0, %v6140_v50 }
0x290d   :  { %6141 = vrcp.f32 %v4761_v29 }
0x2917   :  { %v6142_v45 = vpop.eup %6141 }
0x2918   :  { %4765 = vst.msk [vmem:[%s7147_s8] sm:$0xff] %vm4764_vm4, %v6142_v45 }
0x2919   :  { %4770 = vsyncpa [#allocation4], 1 }
0x291a   :  { %4771 = vsyncpa [#allocation6], 1 }

</bundles_post_ra>
